<compile_context>
chip_gen: v7x
topology: tpu7x:2x2x1
jax: 0.10.0
libtpu: 0.0.40
codegen_flags: <defaults>
</compile_context>

<pallas_src>
import jax
import jax.numpy as jnp
from jax import lax
from jax.experimental import pallas as pl
from jax.experimental.pallas import tpu as pltpu


# ----------------------------------------------------------------------------
# In-kernel helpers
# ----------------------------------------------------------------------------
def _maxpool_3x3_s2(y, h_in, w_in, c, row_ref, out_ref):
    """MaxPool2d(3, stride=2, ceil_mode=True) on a (h_in, w_in*c) VMEM slab."""
    h_out = -(-(h_in - 3) // 2) + 1
    w_out = -(-(w_in - 3) // 2) + 1
    # pass 1: max over the 3-row window (windows past the edge drop OOB rows,
    # matching ceil_mode with implicit -inf padding)
    for i in range(h_out):
        r = 2 * i
        m = y[r:r + 1, :]
        for dr in (1, 2):
            if r + dr < h_in:
                m = jnp.maximum(m, y[r + dr:r + dr + 1, :])
        row_ref[i:i + 1, :] = m
    # pass 2: max over the 3-column window, one channel block per output column
    for j in range(w_out):
        w = 2 * j
        m = row_ref[:, w * c:(w + 1) * c]
        for dw in (1, 2):
            if w + dw < w_in:
                m = jnp.maximum(m, row_ref[:, (w + dw) * c:(w + dw + 1) * c])
        out_ref[:, j * c:(j + 1) * c] = m


def _rnet_kernel(x_ref, t1_ref, b1_ref, a1_ref, t2_ref, b2_ref, a2_ref,
                 t3_ref, b3_ref, a3_ref, w4_ref, b4_ref, a4_ref,
                 w5_ref, b5_ref, out_ref,
                 row1_ref, p1_ref, row2_ref, p2_ref):
    f32 = jnp.float32
    bf16 = jnp.bfloat16

    def bias_prelu(acc, b_ref, a_ref):
        acc = acc + b_ref[...]
        return jnp.where(acc >= 0.0, acc, a_ref[...] * acc)

    # ---- conv1: 3x3, 3->28   (24,24,3) -> (22, 22*28) ------------------------
    acc = None
    for dy in range(3):
        for ci in range(3):
            lhs = x_ref[0, ci, dy:dy + 22, :].astype(bf16)               # (22, 24)
            d = jnp.dot(lhs, t1_ref[dy, ci], preferred_element_type=f32)  # (22, 616)
            acc = d if acc is None else acc + d
    y1 = bias_prelu(acc, b1_ref, a1_ref)                                  # (22, 616)

    # ---- pool1: 3x3 s2 ceil  (22,22) -> (11,11) ------------------------------
    _maxpool_3x3_s2(y1, 22, 22, 28, row1_ref, p1_ref)

    # ---- conv2: 3x3, 28->48  (11, 11*28) -> (9, 9*48) ------------------------
    acc = None
    for dy in range(3):
        lhs = p1_ref[dy:dy + 9, :].astype(bf16)                           # (9, 308)
        d = jnp.dot(lhs, t2_ref[dy], preferred_element_type=f32)          # (9, 432)
        acc = d if acc is None else acc + d
    y2 = bias_prelu(acc, b2_ref, a2_ref)                                  # (9, 432)

    # ---- pool2: 3x3 s2 ceil  (9,9) -> (4,4) ----------------------------------
    _maxpool_3x3_s2(y2, 9, 9, 48, row2_ref, p2_ref)

    # ---- conv3: 2x2, 48->64  (4, 4*48) -> (3, 3*64) --------------------------
    acc = None
    for dy in range(2):
        lhs = p2_ref[dy:dy + 3, :].astype(bf16)                           # (3, 192)
        d = jnp.dot(lhs, t3_ref[dy], preferred_element_type=f32)          # (3, 192)
        acc = d if acc is None else acc + d
    y3 = bias_prelu(acc, b3_ref, a3_ref)                                  # (3, 192)

    # ---- dense4: 576 -> 128 (torch permute(0,3,2,1)+flatten folded into w4h) -
    acc = None
    for h in range(3):
        lhs = y3[h:h + 1, :].astype(bf16)                                 # (1, 192)
        d = jnp.dot(lhs, w4_ref[h], preferred_element_type=f32)           # (1, 128)
        acc = d if acc is None else acc + d
    hid = bias_prelu(acc, b4_ref, a4_ref)                                 # (1, 128)

    # ---- heads: [dense5_1 | dense5_2] as one lane-dense matmul ---------------
    z = jnp.dot(hid.astype(bf16), w5_ref[...],
                preferred_element_type=f32) + b5_ref[...]                 # (1, 128)
    c0, c1 = z[:, 0:1], z[:, 1:2]
    m = jnp.maximum(c0, c1)
    e0 = jnp.exp(c0 - m)
    e1 = jnp.exp(c1 - m)
    inv = 1.0 / (e0 + e1)

    out_ref[...] = jnp.zeros((1, 8, 128), f32)
    out_ref[0, 0:1, 0:1] = e0 * inv          # prob[:, 0]
    out_ref[0, 0:1, 1:2] = e1 * inv          # prob[:, 1]
    out_ref[0, 0:1, 2:6] = z[:, 2:6]         # regression


# ----------------------------------------------------------------------------
# Parameter handling
# ----------------------------------------------------------------------------
def init_params(seed=0):
    """Deterministic synthetic parameters in PyTorch layout."""
    key = jax.random.PRNGKey(seed)
    ks = iter(jax.random.split(key, 16))

    def nrm(shape, scale=0.1):
        return jax.random.normal(next(ks), shape, jnp.float32) * scale

    p = {}
    p['w1'] = nrm((28, 3, 3, 3));  p['b1'] = nrm((28,), 0.01)
    p['a1'] = jnp.full((28,), 0.25, jnp.float32)
    p['w2'] = nrm((48, 28, 3, 3)); p['b2'] = nrm((48,), 0.01)
    p['a2'] = jnp.full((48,), 0.25, jnp.float32)
    p['w3'] = nrm((64, 48, 2, 2)); p['b3'] = nrm((64,), 0.01)
    p['a3'] = jnp.full((64,), 0.25, jnp.float32)
    p['w4'] = nrm((128, 576));     p['b4'] = nrm((128,), 0.01)
    p['a4'] = jnp.full((128,), 0.25, jnp.float32)
    p['w51'] = nrm((2, 128));      p['b51'] = nrm((2,), 0.01)
    p['w52'] = nrm((4, 128));      p['b52'] = nrm((4,), 0.01)
    return p


def pack_params(p, mm_dtype=jnp.bfloat16):
    """One-time weight preprocessing: banded (Toeplitz-over-W) conv matrices,
    permuted dense4 weight, concatenated+lane-padded head weight, tiled biases."""
    def band(w_in, w_out, kw):
        # band[dx, w_in, w_out] = 1  iff  w_in == w_out + dx
        return jnp.stack([jnp.eye(w_in, w_out, k=-dx, dtype=jnp.float32)
                          for dx in range(kw)])

    # conv1 kept per-(dy, ci) so the raw NCHW input can be consumed directly.
    t1 = jnp.einsum('xab,oiyx->yiabo', band(24, 22, 3), p['w1']).reshape(3, 3, 24, 22 * 28)
    t2 = jnp.einsum('xab,oiyx->yaibo', band(11, 9, 3), p['w2']).reshape(3, 11 * 28, 9 * 48)
    t3 = jnp.einsum('xab,oiyx->yaibo', band(4, 3, 2), p['w3']).reshape(2, 4 * 48, 3 * 64)

    # dense4: torch flattening order is (w, h, c); our slab rows are h with
    # columns (w, c)  ->  per-row weight w4h[h][(w*64 + c), out]
    w4h = jnp.transpose(p['w4'].T.reshape(3, 3, 64, 128), (1, 0, 2, 3)).reshape(3, 192, 128)

    # heads: cols 0:2 = dense5_1, cols 2:6 = dense5_2, rest zero (lane dense)
    w5 = jnp.zeros((128, 128), jnp.float32)
    w5 = w5.at[:, 0:2].set(p['w51'].T).at[:, 2:6].set(p['w52'].T)
    b5 = jnp.zeros((128,), jnp.float32).at[0:2].set(p['b51']).at[2:6].set(p['b52'])

    return {
        't1': t1.astype(mm_dtype), 't2': t2.astype(mm_dtype), 't3': t3.astype(mm_dtype),
        'w4': w4h.astype(mm_dtype), 'w5': w5.astype(mm_dtype),
        'b1': jnp.tile(p['b1'], 22)[None, :], 'a1': jnp.tile(p['a1'], 22)[None, :],
        'b2': jnp.tile(p['b2'], 9)[None, :],  'a2': jnp.tile(p['a2'], 9)[None, :],
        'b3': jnp.tile(p['b3'], 3)[None, :],  'a3': jnp.tile(p['a3'], 3)[None, :],
        'b4': p['b4'][None, :],               'a4': p['a4'][None, :],
        'b5': b5[None, :],
    }


# ----------------------------------------------------------------------------
# Forward pass (single fused pallas_call)
# ----------------------------------------------------------------------------
def _const_spec(shape):
    zeros = (0,) * len(shape)
    return pl.BlockSpec(shape, lambda i, zeros=zeros: zeros)


def rnet_forward(packed, x):
    assert x.shape[1:] == (3, 24, 24), "R-Net expects 3x24x24 crops"
    n = x.shape[0]

    out = pl.pallas_call(
        _rnet_kernel,
        out_shape=jax.ShapeDtypeStruct((n, 8, 128), jnp.float32),
        grid=(n,),
        in_specs=[
            pl.BlockSpec((1, 3, 24, 24), lambda i: (i, 0, 0, 0)),      # x (one image)
            _const_spec(packed['t1'].shape),
            _const_spec(packed['b1'].shape), _const_spec(packed['a1'].shape),
            _const_spec(packed['t2'].shape),
            _const_spec(packed['b2'].shape), _const_spec(packed['a2'].shape),
            _const_spec(packed['t3'].shape),
            _const_spec(packed['b3'].shape), _const_spec(packed['a3'].shape),
            _const_spec(packed['w4'].shape),
            _const_spec(packed['b4'].shape), _const_spec(packed['a4'].shape),
            _const_spec(packed['w5'].shape),
            _const_spec(packed['b5'].shape),
        ],
        out_specs=pl.BlockSpec((1, 8, 128), lambda i: (i, 0, 0)),
        scratch_shapes=[
            pltpu.VMEM((11, 22 * 28), jnp.float32),   # pool1 row-max stage
            pltpu.VMEM((11, 11 * 28), jnp.float32),   # pool1 output
            pltpu.VMEM((4, 9 * 48), jnp.float32),     # pool2 row-max stage
            pltpu.VMEM((4, 4 * 48), jnp.float32),     # pool2 output
        ],
        compiler_params=pltpu.CompilerParams(dimension_semantics=("parallel",)),
    )(x, packed['t1'], packed['b1'], packed['a1'],
      packed['t2'], packed['b2'], packed['a2'],
      packed['t3'], packed['b3'], packed['a3'],
      packed['w4'], packed['b4'], packed['a4'],
      packed['w5'], packed['b5'])

    probability = out[:, 0, 0:2]
    regression = out[:, 0, 2:6]
    return regression, probability


# ----------------------------------------------------------------------------
# Pure-JAX reference (mirrors the PyTorch module exactly, f32)
# ----------------------------------------------------------------------------
def rnet_reference(p, x):
    dn = ('NCHW', 'OIHW', 'NCHW')

    def prelu(y, a):
        return jnp.where(y >= 0, y, a.reshape(1, -1, 1, 1) * y)

    def pool(y):  # MaxPool2d(3, 2, ceil_mode=True)
        return lax.reduce_window(y, -jnp.inf, lax.max, (1, 1, 3, 3), (1, 1, 2, 2),
                                 [(0, 0), (0, 0), (0, 1), (0, 1)])

    y = lax.conv_general_dilated(x, p['w1'], (1, 1), 'VALID', dimension_numbers=dn)
    y = prelu(y + p['b1'].reshape(1, -1, 1, 1), p['a1'])
    y = pool(y)
    y = lax.conv_general_dilated(y, p['w2'], (1, 1), 'VALID', dimension_numbers=dn)
    y = prelu(y + p['b2'].reshape(1, -1, 1, 1), p['a2'])
    y = pool(y)
    y = lax.conv_general_dilated(y, p['w3'], (1, 1), 'VALID', dimension_numbers=dn)
    y = prelu(y + p['b3'].reshape(1, -1, 1, 1), p['a3'])
    flat = jnp.transpose(y, (0, 3, 2, 1)).reshape(y.shape[0], -1)
    h = flat @ p['w4'].T + p['b4']
    h = jnp.where(h >= 0, h, p['a4'] * h)
    cls = h @ p['w51'].T + p['b51']
    prob = jax.nn.softmax(cls, axis=1)
    reg = h @ p['w52'].T + p['b52']
    return reg, prob


if __name__ == "__main__":
    # TODO(synk): pretrained torch checkpoint ('./.pt/rnet.pt') is not loaded;
    # deterministic synthetic weights are used instead.
    params = init_params(seed=0)
    packed = pack_params(params)
    x = jax.random.normal(jax.random.PRNGKey(0), (2, 3, 24, 24), jnp.float32)

    fwd = jax.jit(rnet_forward)
    regression, probability = fwd(packed, x)
    jax.block_until_ready((regression, probability))

    assert regression.shape == (2, 4)
    assert probability.shape == (2, 2)
    assert bool(jnp.allclose(jnp.sum(probability, axis=1), 1.0, atol=1e-5))

    # cross-check against the f32 pure-JAX reference (loose tol: bf16 matmuls)
    reg_ref, prob_ref = rnet_reference(params, x)
    assert bool(jnp.allclose(regression, reg_ref, atol=0.35)), (regression, reg_ref)
    assert bool(jnp.allclose(probability, prob_ref, atol=0.12)), (probability, prob_ref)

    print("KERNEL_OK")
</pallas_src>

<mosaic_0001>
module attributes {stable_mosaic.version = 11 : i64} {
  func.func @_rnet_kernel(%arg0: i32, %arg1: memref<1x3x24x24xf32, #tpu.memory_space<vmem>>, %arg2: memref<3x3x24x616xbf16, #tpu.memory_space<vmem>>, %arg3: memref<1x616xf32, #tpu.memory_space<vmem>>, %arg4: memref<1x616xf32, #tpu.memory_space<vmem>>, %arg5: memref<3x308x432xbf16, #tpu.memory_space<vmem>>, %arg6: memref<1x432xf32, #tpu.memory_space<vmem>>, %arg7: memref<1x432xf32, #tpu.memory_space<vmem>>, %arg8: memref<2x192x192xbf16, #tpu.memory_space<vmem>>, %arg9: memref<1x192xf32, #tpu.memory_space<vmem>>, %arg10: memref<1x192xf32, #tpu.memory_space<vmem>>, %arg11: memref<3x192x128xbf16, #tpu.memory_space<vmem>>, %arg12: memref<1x128xf32, #tpu.memory_space<vmem>>, %arg13: memref<1x128xf32, #tpu.memory_space<vmem>>, %arg14: memref<128x128xbf16, #tpu.memory_space<vmem>>, %arg15: memref<1x128xf32, #tpu.memory_space<vmem>>, %arg16: memref<1x8x128xf32, #tpu.memory_space<vmem>>, %arg17: memref<11x616xf32, #tpu.memory_space<vmem>>, %arg18: memref<11x308xf32, #tpu.memory_space<vmem>>, %arg19: memref<4x432xf32, #tpu.memory_space<vmem>>, %arg20: memref<4x192xf32, #tpu.memory_space<vmem>>) attributes {dimension_semantics = [#tpu.dimension_semantics<parallel>], iteration_bounds = array<i64: 2>, scalar_prefetch = 0 : i64, scratch_operands = 4 : i64, tpu.core_type = #tpu.core_type<tc>, window_params = [{transform_indices = @transform_0, window_bounds = array<i64: 1, 3, 24, 24>}, {pipeline_mode = #tpu.pipeline_mode<synchronous>, transform_indices = @transform_1, window_bounds = array<i64: 3, 3, 24, 616>}, {pipeline_mode = #tpu.pipeline_mode<synchronous>, transform_indices = @transform_2, window_bounds = array<i64: 1, 616>}, {pipeline_mode = #tpu.pipeline_mode<synchronous>, transform_indices = @transform_3, window_bounds = array<i64: 1, 616>}, {pipeline_mode = #tpu.pipeline_mode<synchronous>, transform_indices = @transform_4, window_bounds = array<i64: 3, 308, 432>}, {pipeline_mode = #tpu.pipeline_mode<synchronous>, transform_indices = @transform_5, window_bounds = array<i64: 1, 432>}, {pipeline_mode = #tpu.pipeline_mode<synchronous>, transform_indices = @transform_6, window_bounds = array<i64: 1, 432>}, {pipeline_mode = #tpu.pipeline_mode<synchronous>, transform_indices = @transform_7, window_bounds = array<i64: 2, 192, 192>}, {pipeline_mode = #tpu.pipeline_mode<synchronous>, transform_indices = @transform_8, window_bounds = array<i64: 1, 192>}, {pipeline_mode = #tpu.pipeline_mode<synchronous>, transform_indices = @transform_9, window_bounds = array<i64: 1, 192>}, {pipeline_mode = #tpu.pipeline_mode<synchronous>, transform_indices = @transform_10, window_bounds = array<i64: 3, 192, 128>}, {pipeline_mode = #tpu.pipeline_mode<synchronous>, transform_indices = @transform_11, window_bounds = array<i64: 1, 128>}, {pipeline_mode = #tpu.pipeline_mode<synchronous>, transform_indices = @transform_12, window_bounds = array<i64: 1, 128>}, {pipeline_mode = #tpu.pipeline_mode<synchronous>, transform_indices = @transform_13, window_bounds = array<i64: 128, 128>}, {pipeline_mode = #tpu.pipeline_mode<synchronous>, transform_indices = @transform_14, window_bounds = array<i64: 1, 128>}, {transform_indices = @transform_15, window_bounds = array<i64: 1, 8, 128>}]} {
    %c0 = arith.constant 0 : index
    %c0_0 = arith.constant 0 : index
    %c0_1 = arith.constant 0 : index
    %c0_2 = arith.constant 0 : index
    %0 = vector.load %arg1[%c0, %c0_0, %c0_1, %c0_2] : memref<1x3x24x24xf32, #tpu.memory_space<vmem>>, vector<1x1x22x24xf32>
    %1 = vector.shape_cast %0 : vector<1x1x22x24xf32> to vector<22x24xf32>
    %2 = arith.truncf %1 : vector<22x24xf32> to vector<22x24xbf16>
    %c0_3 = arith.constant 0 : index
    %c0_4 = arith.constant 0 : index
    %c0_5 = arith.constant 0 : index
    %c0_6 = arith.constant 0 : index
    %3 = vector.load %arg2[%c0_3, %c0_4, %c0_5, %c0_6] : memref<3x3x24x616xbf16, #tpu.memory_space<vmem>>, vector<1x1x24x616xbf16>
    %4 = vector.shape_cast %3 : vector<1x1x24x616xbf16> to vector<24x616xbf16>
    %cst = arith.constant dense<0.000000e+00> : vector<22x616xf32>
    %5 = tpu.matmul %2, %4, %cst {dimension_numbers = #tpu.dot_dimension_numbers<[1], [0], [0], [1], [0, 0, 1, 1], [], []>} : vector<22x24xbf16>, vector<24x616xbf16>, vector<22x616xf32> -> vector<22x616xf32>
    %c0_7 = arith.constant 0 : index
    %c1 = arith.constant 1 : index
    %c0_8 = arith.constant 0 : index
    %c0_9 = arith.constant 0 : index
    %6 = vector.load %arg1[%c0_7, %c1, %c0_8, %c0_9] : memref<1x3x24x24xf32, #tpu.memory_space<vmem>>, vector<1x1x22x24xf32>
    %7 = vector.shape_cast %6 : vector<1x1x22x24xf32> to vector<22x24xf32>
    %8 = arith.truncf %7 : vector<22x24xf32> to vector<22x24xbf16>
    %c0_10 = arith.constant 0 : index
    %c1_11 = arith.constant 1 : index
    %c0_12 = arith.constant 0 : index
    %c0_13 = arith.constant 0 : index
    %9 = vector.load %arg2[%c0_10, %c1_11, %c0_12, %c0_13] : memref<3x3x24x616xbf16, #tpu.memory_space<vmem>>, vector<1x1x24x616xbf16>
    %10 = vector.shape_cast %9 : vector<1x1x24x616xbf16> to vector<24x616xbf16>
    %cst_14 = arith.constant dense<0.000000e+00> : vector<22x616xf32>
    %11 = tpu.matmul %8, %10, %cst_14 {dimension_numbers = #tpu.dot_dimension_numbers<[1], [0], [0], [1], [0, 0, 1, 1], [], []>} : vector<22x24xbf16>, vector<24x616xbf16>, vector<22x616xf32> -> vector<22x616xf32>
    %12 = arith.addf %5, %11 : vector<22x616xf32>
    %c0_15 = arith.constant 0 : index
    %c2 = arith.constant 2 : index
    %c0_16 = arith.constant 0 : index
    %c0_17 = arith.constant 0 : index
    %13 = vector.load %arg1[%c0_15, %c2, %c0_16, %c0_17] : memref<1x3x24x24xf32, #tpu.memory_space<vmem>>, vector<1x1x22x24xf32>
    %14 = vector.shape_cast %13 : vector<1x1x22x24xf32> to vector<22x24xf32>
    %15 = arith.truncf %14 : vector<22x24xf32> to vector<22x24xbf16>
    %c0_18 = arith.constant 0 : index
    %c2_19 = arith.constant 2 : index
    %c0_20 = arith.constant 0 : index
    %c0_21 = arith.constant 0 : index
    %16 = vector.load %arg2[%c0_18, %c2_19, %c0_20, %c0_21] : memref<3x3x24x616xbf16, #tpu.memory_space<vmem>>, vector<1x1x24x616xbf16>
    %17 = vector.shape_cast %16 : vector<1x1x24x616xbf16> to vector<24x616xbf16>
    %cst_22 = arith.constant dense<0.000000e+00> : vector<22x616xf32>
    %18 = tpu.matmul %15, %17, %cst_22 {dimension_numbers = #tpu.dot_dimension_numbers<[1], [0], [0], [1], [0, 0, 1, 1], [], []>} : vector<22x24xbf16>, vector<24x616xbf16>, vector<22x616xf32> -> vector<22x616xf32>
    %19 = arith.addf %12, %18 : vector<22x616xf32>
    %c0_23 = arith.constant 0 : index
    %c0_24 = arith.constant 0 : index
    %c1_25 = arith.constant 1 : index
    %c0_26 = arith.constant 0 : index
    %20 = vector.load %arg1[%c0_23, %c0_24, %c1_25, %c0_26] : memref<1x3x24x24xf32, #tpu.memory_space<vmem>>, vector<1x1x22x24xf32>
    %21 = vector.shape_cast %20 : vector<1x1x22x24xf32> to vector<22x24xf32>
    %22 = arith.truncf %21 : vector<22x24xf32> to vector<22x24xbf16>
    %c1_27 = arith.constant 1 : index
    %c0_28 = arith.constant 0 : index
    %c0_29 = arith.constant 0 : index
    %c0_30 = arith.constant 0 : index
    %23 = vector.load %arg2[%c1_27, %c0_28, %c0_29, %c0_30] : memref<3x3x24x616xbf16, #tpu.memory_space<vmem>>, vector<1x1x24x616xbf16>
    %24 = vector.shape_cast %23 : vector<1x1x24x616xbf16> to vector<24x616xbf16>
    %cst_31 = arith.constant dense<0.000000e+00> : vector<22x616xf32>
    %25 = tpu.matmul %22, %24, %cst_31 {dimension_numbers = #tpu.dot_dimension_numbers<[1], [0], [0], [1], [0, 0, 1, 1], [], []>} : vector<22x24xbf16>, vector<24x616xbf16>, vector<22x616xf32> -> vector<22x616xf32>
    %26 = arith.addf %19, %25 : vector<22x616xf32>
    %c0_32 = arith.constant 0 : index
    %c1_33 = arith.constant 1 : index
    %c1_34 = arith.constant 1 : index
    %c0_35 = arith.constant 0 : index
    %27 = vector.load %arg1[%c0_32, %c1_33, %c1_34, %c0_35] : memref<1x3x24x24xf32, #tpu.memory_space<vmem>>, vector<1x1x22x24xf32>
    %28 = vector.shape_cast %27 : vector<1x1x22x24xf32> to vector<22x24xf32>
    %29 = arith.truncf %28 : vector<22x24xf32> to vector<22x24xbf16>
    %c1_36 = arith.constant 1 : index
    %c1_37 = arith.constant 1 : index
    %c0_38 = arith.constant 0 : index
    %c0_39 = arith.constant 0 : index
    %30 = vector.load %arg2[%c1_36, %c1_37, %c0_38, %c0_39] : memref<3x3x24x616xbf16, #tpu.memory_space<vmem>>, vector<1x1x24x616xbf16>
    %31 = vector.shape_cast %30 : vector<1x1x24x616xbf16> to vector<24x616xbf16>
    %cst_40 = arith.constant dense<0.000000e+00> : vector<22x616xf32>
    %32 = tpu.matmul %29, %31, %cst_40 {dimension_numbers = #tpu.dot_dimension_numbers<[1], [0], [0], [1], [0, 0, 1, 1], [], []>} : vector<22x24xbf16>, vector<24x616xbf16>, vector<22x616xf32> -> vector<22x616xf32>
    %33 = arith.addf %26, %32 : vector<22x616xf32>
    %c0_41 = arith.constant 0 : index
    %c2_42 = arith.constant 2 : index
    %c1_43 = arith.constant 1 : index
    %c0_44 = arith.constant 0 : index
    %34 = vector.load %arg1[%c0_41, %c2_42, %c1_43, %c0_44] : memref<1x3x24x24xf32, #tpu.memory_space<vmem>>, vector<1x1x22x24xf32>
    %35 = vector.shape_cast %34 : vector<1x1x22x24xf32> to vector<22x24xf32>
    %36 = arith.truncf %35 : vector<22x24xf32> to vector<22x24xbf16>
    %c1_45 = arith.constant 1 : index
    %c2_46 = arith.constant 2 : index
    %c0_47 = arith.constant 0 : index
    %c0_48 = arith.constant 0 : index
    %37 = vector.load %arg2[%c1_45, %c2_46, %c0_47, %c0_48] : memref<3x3x24x616xbf16, #tpu.memory_space<vmem>>, vector<1x1x24x616xbf16>
    %38 = vector.shape_cast %37 : vector<1x1x24x616xbf16> to vector<24x616xbf16>
    %cst_49 = arith.constant dense<0.000000e+00> : vector<22x616xf32>
    %39 = tpu.matmul %36, %38, %cst_49 {dimension_numbers = #tpu.dot_dimension_numbers<[1], [0], [0], [1], [0, 0, 1, 1], [], []>} : vector<22x24xbf16>, vector<24x616xbf16>, vector<22x616xf32> -> vector<22x616xf32>
    %40 = arith.addf %33, %39 : vector<22x616xf32>
    %c0_50 = arith.constant 0 : index
    %c0_51 = arith.constant 0 : index
    %c2_52 = arith.constant 2 : index
    %c0_53 = arith.constant 0 : index
    %41 = vector.load %arg1[%c0_50, %c0_51, %c2_52, %c0_53] : memref<1x3x24x24xf32, #tpu.memory_space<vmem>>, vector<1x1x22x24xf32>
    %42 = vector.shape_cast %41 : vector<1x1x22x24xf32> to vector<22x24xf32>
    %43 = arith.truncf %42 : vector<22x24xf32> to vector<22x24xbf16>
    %c2_54 = arith.constant 2 : index
    %c0_55 = arith.constant 0 : index
    %c0_56 = arith.constant 0 : index
    %c0_57 = arith.constant 0 : index
    %44 = vector.load %arg2[%c2_54, %c0_55, %c0_56, %c0_57] : memref<3x3x24x616xbf16, #tpu.memory_space<vmem>>, vector<1x1x24x616xbf16>
    %45 = vector.shape_cast %44 : vector<1x1x24x616xbf16> to vector<24x616xbf16>
    %cst_58 = arith.constant dense<0.000000e+00> : vector<22x616xf32>
    %46 = tpu.matmul %43, %45, %cst_58 {dimension_numbers = #tpu.dot_dimension_numbers<[1], [0], [0], [1], [0, 0, 1, 1], [], []>} : vector<22x24xbf16>, vector<24x616xbf16>, vector<22x616xf32> -> vector<22x616xf32>
    %47 = arith.addf %40, %46 : vector<22x616xf32>
    %c0_59 = arith.constant 0 : index
    %c1_60 = arith.constant 1 : index
    %c2_61 = arith.constant 2 : index
    %c0_62 = arith.constant 0 : index
    %48 = vector.load %arg1[%c0_59, %c1_60, %c2_61, %c0_62] : memref<1x3x24x24xf32, #tpu.memory_space<vmem>>, vector<1x1x22x24xf32>
    %49 = vector.shape_cast %48 : vector<1x1x22x24xf32> to vector<22x24xf32>
    %50 = arith.truncf %49 : vector<22x24xf32> to vector<22x24xbf16>
    %c2_63 = arith.constant 2 : index
    %c1_64 = arith.constant 1 : index
    %c0_65 = arith.constant 0 : index
    %c0_66 = arith.constant 0 : index
    %51 = vector.load %arg2[%c2_63, %c1_64, %c0_65, %c0_66] : memref<3x3x24x616xbf16, #tpu.memory_space<vmem>>, vector<1x1x24x616xbf16>
    %52 = vector.shape_cast %51 : vector<1x1x24x616xbf16> to vector<24x616xbf16>
    %cst_67 = arith.constant dense<0.000000e+00> : vector<22x616xf32>
    %53 = tpu.matmul %50, %52, %cst_67 {dimension_numbers = #tpu.dot_dimension_numbers<[1], [0], [0], [1], [0, 0, 1, 1], [], []>} : vector<22x24xbf16>, vector<24x616xbf16>, vector<22x616xf32> -> vector<22x616xf32>
    %54 = arith.addf %47, %53 : vector<22x616xf32>
    %c0_68 = arith.constant 0 : index
    %c2_69 = arith.constant 2 : index
    %c2_70 = arith.constant 2 : index
    %c0_71 = arith.constant 0 : index
    %55 = vector.load %arg1[%c0_68, %c2_69, %c2_70, %c0_71] : memref<1x3x24x24xf32, #tpu.memory_space<vmem>>, vector<1x1x22x24xf32>
    %56 = vector.shape_cast %55 : vector<1x1x22x24xf32> to vector<22x24xf32>
    %57 = arith.truncf %56 : vector<22x24xf32> to vector<22x24xbf16>
    %c2_72 = arith.constant 2 : index
    %c2_73 = arith.constant 2 : index
    %c0_74 = arith.constant 0 : index
    %c0_75 = arith.constant 0 : index
    %58 = vector.load %arg2[%c2_72, %c2_73, %c0_74, %c0_75] : memref<3x3x24x616xbf16, #tpu.memory_space<vmem>>, vector<1x1x24x616xbf16>
    %59 = vector.shape_cast %58 : vector<1x1x24x616xbf16> to vector<24x616xbf16>
    %cst_76 = arith.constant dense<0.000000e+00> : vector<22x616xf32>
    %60 = tpu.matmul %57, %59, %cst_76 {dimension_numbers = #tpu.dot_dimension_numbers<[1], [0], [0], [1], [0, 0, 1, 1], [], []>} : vector<22x24xbf16>, vector<24x616xbf16>, vector<22x616xf32> -> vector<22x616xf32>
    %61 = arith.addf %54, %60 : vector<22x616xf32>
    %c0_77 = arith.constant 0 : index
    %c0_78 = arith.constant 0 : index
    %62 = vector.load %arg3[%c0_77, %c0_78] : memref<1x616xf32, #tpu.memory_space<vmem>>, vector<1x616xf32>
    %63 = vector.broadcast %62 : vector<1x616xf32> to vector<22x616xf32>
    %64 = arith.addf %61, %63 : vector<22x616xf32>
    %cst_79 = arith.constant 0.000000e+00 : f32
    %65 = vector.broadcast %cst_79 : f32 to vector<22x616xf32>
    %66 = arith.cmpf oge, %64, %65 : vector<22x616xf32>
    %c0_80 = arith.constant 0 : index
    %c0_81 = arith.constant 0 : index
    %67 = vector.load %arg4[%c0_80, %c0_81] : memref<1x616xf32, #tpu.memory_space<vmem>>, vector<1x616xf32>
    %68 = vector.broadcast %67 : vector<1x616xf32> to vector<22x616xf32>
    %69 = arith.mulf %68, %64 : vector<22x616xf32>
    %70 = arith.select %66, %64, %69 : vector<22x616xi1>, vector<22x616xf32>
    %71 = vector.extract_strided_slice %70 {offsets = [0, 0], sizes = [1, 616], strides = [1, 1]} : vector<22x616xf32> to vector<1x616xf32>
    %72 = vector.extract_strided_slice %70 {offsets = [1, 0], sizes = [1, 616], strides = [1, 1]} : vector<22x616xf32> to vector<1x616xf32>
    %73 = arith.maximumf %71, %72 : vector<1x616xf32>
    %74 = vector.extract_strided_slice %70 {offsets = [2, 0], sizes = [1, 616], strides = [1, 1]} : vector<22x616xf32> to vector<1x616xf32>
    %75 = arith.maximumf %73, %74 : vector<1x616xf32>
    %c0_82 = arith.constant 0 : index
    %c0_83 = arith.constant 0 : index
    %76 = vector.load %arg17[%c0_82, %c0_83] : memref<11x616xf32, #tpu.memory_space<vmem>>, vector<1x616xf32>
    tpu.vector_store %arg17[%c0_82, %c0_83], %75 {strides = array<i32>} : memref<11x616xf32, #tpu.memory_space<vmem>>, vector<1x616xf32>,
    %77 = vector.extract_strided_slice %70 {offsets = [2, 0], sizes = [1, 616], strides = [1, 1]} : vector<22x616xf32> to vector<1x616xf32>
    %78 = vector.extract_strided_slice %70 {offsets = [3, 0], sizes = [1, 616], strides = [1, 1]} : vector<22x616xf32> to vector<1x616xf32>
    %79 = arith.maximumf %77, %78 : vector<1x616xf32>
    %80 = vector.extract_strided_slice %70 {offsets = [4, 0], sizes = [1, 616], strides = [1, 1]} : vector<22x616xf32> to vector<1x616xf32>
    %81 = arith.maximumf %79, %80 : vector<1x616xf32>
    %c1_84 = arith.constant 1 : index
    %c0_85 = arith.constant 0 : index
    %82 = vector.load %arg17[%c1_84, %c0_85] : memref<11x616xf32, #tpu.memory_space<vmem>>, vector<1x616xf32>
    tpu.vector_store %arg17[%c1_84, %c0_85], %81 {strides = array<i32>} : memref<11x616xf32, #tpu.memory_space<vmem>>, vector<1x616xf32>,
    %83 = vector.extract_strided_slice %70 {offsets = [4, 0], sizes = [1, 616], strides = [1, 1]} : vector<22x616xf32> to vector<1x616xf32>
    %84 = vector.extract_strided_slice %70 {offsets = [5, 0], sizes = [1, 616], strides = [1, 1]} : vector<22x616xf32> to vector<1x616xf32>
    %85 = arith.maximumf %83, %84 : vector<1x616xf32>
    %86 = vector.extract_strided_slice %70 {offsets = [6, 0], sizes = [1, 616], strides = [1, 1]} : vector<22x616xf32> to vector<1x616xf32>
    %87 = arith.maximumf %85, %86 : vector<1x616xf32>
    %c2_86 = arith.constant 2 : index
    %c0_87 = arith.constant 0 : index
    %88 = vector.load %arg17[%c2_86, %c0_87] : memref<11x616xf32, #tpu.memory_space<vmem>>, vector<1x616xf32>
    tpu.vector_store %arg17[%c2_86, %c0_87], %87 {strides = array<i32>} : memref<11x616xf32, #tpu.memory_space<vmem>>, vector<1x616xf32>,
    %89 = vector.extract_strided_slice %70 {offsets = [6, 0], sizes = [1, 616], strides = [1, 1]} : vector<22x616xf32> to vector<1x616xf32>
    %90 = vector.extract_strided_slice %70 {offsets = [7, 0], sizes = [1, 616], strides = [1, 1]} : vector<22x616xf32> to vector<1x616xf32>
    %91 = arith.maximumf %89, %90 : vector<1x616xf32>
    %92 = vector.extract_strided_slice %70 {offsets = [8, 0], sizes = [1, 616], strides = [1, 1]} : vector<22x616xf32> to vector<1x616xf32>
    %93 = arith.maximumf %91, %92 : vector<1x616xf32>
    %c3 = arith.constant 3 : index
    %c0_88 = arith.constant 0 : index
    %94 = vector.load %arg17[%c3, %c0_88] : memref<11x616xf32, #tpu.memory_space<vmem>>, vector<1x616xf32>
    tpu.vector_store %arg17[%c3, %c0_88], %93 {strides = array<i32>} : memref<11x616xf32, #tpu.memory_space<vmem>>, vector<1x616xf32>,
    %95 = vector.extract_strided_slice %70 {offsets = [8, 0], sizes = [1, 616], strides = [1, 1]} : vector<22x616xf32> to vector<1x616xf32>
    %96 = vector.extract_strided_slice %70 {offsets = [9, 0], sizes = [1, 616], strides = [1, 1]} : vector<22x616xf32> to vector<1x616xf32>
    %97 = arith.maximumf %95, %96 : vector<1x616xf32>
    %98 = vector.extract_strided_slice %70 {offsets = [10, 0], sizes = [1, 616], strides = [1, 1]} : vector<22x616xf32> to vector<1x616xf32>
    %99 = arith.maximumf %97, %98 : vector<1x616xf32>
    %c4 = arith.constant 4 : index
    %c0_89 = arith.constant 0 : index
    %100 = vector.load %arg17[%c4, %c0_89] : memref<11x616xf32, #tpu.memory_space<vmem>>, vector<1x616xf32>
    tpu.vector_store %arg17[%c4, %c0_89], %99 {strides = array<i32>} : memref<11x616xf32, #tpu.memory_space<vmem>>, vector<1x616xf32>,
    %101 = vector.extract_strided_slice %70 {offsets = [10, 0], sizes = [1, 616], strides = [1, 1]} : vector<22x616xf32> to vector<1x616xf32>
    %102 = vector.extract_strided_slice %70 {offsets = [11, 0], sizes = [1, 616], strides = [1, 1]} : vector<22x616xf32> to vector<1x616xf32>
    %103 = arith.maximumf %101, %102 : vector<1x616xf32>
    %104 = vector.extract_strided_slice %70 {offsets = [12, 0], sizes = [1, 616], strides = [1, 1]} : vector<22x616xf32> to vector<1x616xf32>
    %105 = arith.maximumf %103, %104 : vector<1x616xf32>
    %c5 = arith.constant 5 : index
    %c0_90 = arith.constant 0 : index
    %106 = vector.load %arg17[%c5, %c0_90] : memref<11x616xf32, #tpu.memory_space<vmem>>, vector<1x616xf32>
    tpu.vector_store %arg17[%c5, %c0_90], %105 {strides = array<i32>} : memref<11x616xf32, #tpu.memory_space<vmem>>, vector<1x616xf32>,
    %107 = vector.extract_strided_slice %70 {offsets = [12, 0], sizes = [1, 616], strides = [1, 1]} : vector<22x616xf32> to vector<1x616xf32>
    %108 = vector.extract_strided_slice %70 {offsets = [13, 0], sizes = [1, 616], strides = [1, 1]} : vector<22x616xf32> to vector<1x616xf32>
    %109 = arith.maximumf %107, %108 : vector<1x616xf32>
    %110 = vector.extract_strided_slice %70 {offsets = [14, 0], sizes = [1, 616], strides = [1, 1]} : vector<22x616xf32> to vector<1x616xf32>
    %111 = arith.maximumf %109, %110 : vector<1x616xf32>
    %c6 = arith.constant 6 : index
    %c0_91 = arith.constant 0 : index
    %112 = vector.load %arg17[%c6, %c0_91] : memref<11x616xf32, #tpu.memory_space<vmem>>, vector<1x616xf32>
    tpu.vector_store %arg17[%c6, %c0_91], %111 {strides = array<i32>} : memref<11x616xf32, #tpu.memory_space<vmem>>, vector<1x616xf32>,
    %113 = vector.extract_strided_slice %70 {offsets = [14, 0], sizes = [1, 616], strides = [1, 1]} : vector<22x616xf32> to vector<1x616xf32>
    %114 = vector.extract_strided_slice %70 {offsets = [15, 0], sizes = [1, 616], strides = [1, 1]} : vector<22x616xf32> to vector<1x616xf32>
    %115 = arith.maximumf %113, %114 : vector<1x616xf32>
    %116 = vector.extract_strided_slice %70 {offsets = [16, 0], sizes = [1, 616], strides = [1, 1]} : vector<22x616xf32> to vector<1x616xf32>
    %117 = arith.maximumf %115, %116 : vector<1x616xf32>
    %c7 = arith.constant 7 : index
    %c0_92 = arith.constant 0 : index
    %118 = vector.load %arg17[%c7, %c0_92] : memref<11x616xf32, #tpu.memory_space<vmem>>, vector<1x616xf32>
    tpu.vector_store %arg17[%c7, %c0_92], %117 {strides = array<i32>} : memref<11x616xf32, #tpu.memory_space<vmem>>, vector<1x616xf32>,
    %119 = vector.extract_strided_slice %70 {offsets = [16, 0], sizes = [1, 616], strides = [1, 1]} : vector<22x616xf32> to vector<1x616xf32>
    %120 = vector.extract_strided_slice %70 {offsets = [17, 0], sizes = [1, 616], strides = [1, 1]} : vector<22x616xf32> to vector<1x616xf32>
    %121 = arith.maximumf %119, %120 : vector<1x616xf32>
    %122 = vector.extract_strided_slice %70 {offsets = [18, 0], sizes = [1, 616], strides = [1, 1]} : vector<22x616xf32> to vector<1x616xf32>
    %123 = arith.maximumf %121, %122 : vector<1x616xf32>
    %c8 = arith.constant 8 : index
    %c0_93 = arith.constant 0 : index
    %124 = vector.load %arg17[%c8, %c0_93] : memref<11x616xf32, #tpu.memory_space<vmem>>, vector<1x616xf32>
    tpu.vector_store %arg17[%c8, %c0_93], %123 {strides = array<i32>} : memref<11x616xf32, #tpu.memory_space<vmem>>, vector<1x616xf32>,
    %125 = vector.extract_strided_slice %70 {offsets = [18, 0], sizes = [1, 616], strides = [1, 1]} : vector<22x616xf32> to vector<1x616xf32>
    %126 = vector.extract_strided_slice %70 {offsets = [19, 0], sizes = [1, 616], strides = [1, 1]} : vector<22x616xf32> to vector<1x616xf32>
    %127 = arith.maximumf %125, %126 : vector<1x616xf32>
    %128 = vector.extract_strided_slice %70 {offsets = [20, 0], sizes = [1, 616], strides = [1, 1]} : vector<22x616xf32> to vector<1x616xf32>
    %129 = arith.maximumf %127, %128 : vector<1x616xf32>
    %c9 = arith.constant 9 : index
    %c0_94 = arith.constant 0 : index
    %130 = vector.load %arg17[%c9, %c0_94] : memref<11x616xf32, #tpu.memory_space<vmem>>, vector<1x616xf32>
    tpu.vector_store %arg17[%c9, %c0_94], %129 {strides = array<i32>} : memref<11x616xf32, #tpu.memory_space<vmem>>, vector<1x616xf32>,
    %131 = vector.extract_strided_slice %70 {offsets = [20, 0], sizes = [1, 616], strides = [1, 1]} : vector<22x616xf32> to vector<1x616xf32>
    %132 = vector.extract_strided_slice %70 {offsets = [21, 0], sizes = [1, 616], strides = [1, 1]} : vector<22x616xf32> to vector<1x616xf32>
    %133 = arith.maximumf %131, %132 : vector<1x616xf32>
    %c10 = arith.constant 10 : index
    %c0_95 = arith.constant 0 : index
    %134 = vector.load %arg17[%c10, %c0_95] : memref<11x616xf32, #tpu.memory_space<vmem>>, vector<1x616xf32>
    tpu.vector_store %arg17[%c10, %c0_95], %133 {strides = array<i32>} : memref<11x616xf32, #tpu.memory_space<vmem>>, vector<1x616xf32>,
    %c0_96 = arith.constant 0 : index
    %c0_97 = arith.constant 0 : index
    %135 = vector.load %arg17[%c0_96, %c0_97] : memref<11x616xf32, #tpu.memory_space<vmem>>, vector<11x28xf32>
    %c0_98 = arith.constant 0 : index
    %c28 = arith.constant 28 : index
    %136 = vector.load %arg17[%c0_98, %c28] : memref<11x616xf32, #tpu.memory_space<vmem>>, vector<11x28xf32>
    %137 = arith.maximumf %135, %136 : vector<11x28xf32>
    %c0_99 = arith.constant 0 : index
    %c56 = arith.constant 56 : index
    %138 = vector.load %arg17[%c0_99, %c56] : memref<11x616xf32, #tpu.memory_space<vmem>>, vector<11x28xf32>
    %139 = arith.maximumf %137, %138 : vector<11x28xf32>
    %c0_100 = arith.constant 0 : index
    %c0_101 = arith.constant 0 : index
    %140 = vector.load %arg18[%c0_100, %c0_101] : memref<11x308xf32, #tpu.memory_space<vmem>>, vector<11x28xf32>
    tpu.vector_store %arg18[%c0_100, %c0_101], %139 {strides = array<i32>} : memref<11x308xf32, #tpu.memory_space<vmem>>, vector<11x28xf32>,
    %c0_102 = arith.constant 0 : index
    %c56_103 = arith.constant 56 : index
    %141 = vector.load %arg17[%c0_102, %c56_103] : memref<11x616xf32, #tpu.memory_space<vmem>>, vector<11x28xf32>
    %c0_104 = arith.constant 0 : index
    %c84 = arith.constant 84 : index
    %142 = vector.load %arg17[%c0_104, %c84] : memref<11x616xf32, #tpu.memory_space<vmem>>, vector<11x28xf32>
    %143 = arith.maximumf %141, %142 : vector<11x28xf32>
    %c0_105 = arith.constant 0 : index
    %c112 = arith.constant 112 : index
    %144 = vector.load %arg17[%c0_105, %c112] : memref<11x616xf32, #tpu.memory_space<vmem>>, vector<11x28xf32>
    %145 = arith.maximumf %143, %144 : vector<11x28xf32>
    %c0_106 = arith.constant 0 : index
    %c28_107 = arith.constant 28 : index
    %146 = vector.load %arg18[%c0_106, %c28_107] : memref<11x308xf32, #tpu.memory_space<vmem>>, vector<11x28xf32>
    tpu.vector_store %arg18[%c0_106, %c28_107], %145 {strides = array<i32>} : memref<11x308xf32, #tpu.memory_space<vmem>>, vector<11x28xf32>,
    %c0_108 = arith.constant 0 : index
    %c112_109 = arith.constant 112 : index
    %147 = vector.load %arg17[%c0_108, %c112_109] : memref<11x616xf32, #tpu.memory_space<vmem>>, vector<11x28xf32>
    %c0_110 = arith.constant 0 : index
    %c140 = arith.constant 140 : index
    %148 = vector.load %arg17[%c0_110, %c140] : memref<11x616xf32, #tpu.memory_space<vmem>>, vector<11x28xf32>
    %149 = arith.maximumf %147, %148 : vector<11x28xf32>
    %c0_111 = arith.constant 0 : index
    %c168 = arith.constant 168 : index
    %150 = vector.load %arg17[%c0_111, %c168] : memref<11x616xf32, #tpu.memory_space<vmem>>, vector<11x28xf32>
    %151 = arith.maximumf %149, %150 : vector<11x28xf32>
    %c0_112 = arith.constant 0 : index
    %c56_113 = arith.constant 56 : index
    %152 = vector.load %arg18[%c0_112, %c56_113] : memref<11x308xf32, #tpu.memory_space<vmem>>, vector<11x28xf32>
    tpu.vector_store %arg18[%c0_112, %c56_113], %151 {strides = array<i32>} : memref<11x308xf32, #tpu.memory_space<vmem>>, vector<11x28xf32>,
    %c0_114 = arith.constant 0 : index
    %c168_115 = arith.constant 168 : index
    %153 = vector.load %arg17[%c0_114, %c168_115] : memref<11x616xf32, #tpu.memory_space<vmem>>, vector<11x28xf32>
    %c0_116 = arith.constant 0 : index
    %c196 = arith.constant 196 : index
    %154 = vector.load %arg17[%c0_116, %c196] : memref<11x616xf32, #tpu.memory_space<vmem>>, vector<11x28xf32>
    %155 = arith.maximumf %153, %154 : vector<11x28xf32>
    %c0_117 = arith.constant 0 : index
    %c224 = arith.constant 224 : index
    %156 = vector.load %arg17[%c0_117, %c224] : memref<11x616xf32, #tpu.memory_space<vmem>>, vector<11x28xf32>
    %157 = arith.maximumf %155, %156 : vector<11x28xf32>
    %c0_118 = arith.constant 0 : index
    %c84_119 = arith.constant 84 : index
    %158 = vector.load %arg18[%c0_118, %c84_119] : memref<11x308xf32, #tpu.memory_space<vmem>>, vector<11x28xf32>
    tpu.vector_store %arg18[%c0_118, %c84_119], %157 {strides = array<i32>} : memref<11x308xf32, #tpu.memory_space<vmem>>, vector<11x28xf32>,
    %c0_120 = arith.constant 0 : index
    %c224_121 = arith.constant 224 : index
    %159 = vector.load %arg17[%c0_120, %c224_121] : memref<11x616xf32, #tpu.memory_space<vmem>>, vector<11x28xf32>
    %c0_122 = arith.constant 0 : index
    %c252 = arith.constant 252 : index
    %160 = vector.load %arg17[%c0_122, %c252] : memref<11x616xf32, #tpu.memory_space<vmem>>, vector<11x28xf32>
    %161 = arith.maximumf %159, %160 : vector<11x28xf32>
    %c0_123 = arith.constant 0 : index
    %c280 = arith.constant 280 : index
    %162 = vector.load %arg17[%c0_123, %c280] : memref<11x616xf32, #tpu.memory_space<vmem>>, vector<11x28xf32>
    %163 = arith.maximumf %161, %162 : vector<11x28xf32>
    %c0_124 = arith.constant 0 : index
    %c112_125 = arith.constant 112 : index
    %164 = vector.load %arg18[%c0_124, %c112_125] : memref<11x308xf32, #tpu.memory_space<vmem>>, vector<11x28xf32>
    tpu.vector_store %arg18[%c0_124, %c112_125], %163 {strides = array<i32>} : memref<11x308xf32, #tpu.memory_space<vmem>>, vector<11x28xf32>,
    %c0_126 = arith.constant 0 : index
    %c280_127 = arith.constant 280 : index
    %165 = vector.load %arg17[%c0_126, %c280_127] : memref<11x616xf32, #tpu.memory_space<vmem>>, vector<11x28xf32>
    %c0_128 = arith.constant 0 : index
    %c308 = arith.constant 308 : index
    %166 = vector.load %arg17[%c0_128, %c308] : memref<11x616xf32, #tpu.memory_space<vmem>>, vector<11x28xf32>
    %167 = arith.maximumf %165, %166 : vector<11x28xf32>
    %c0_129 = arith.constant 0 : index
    %c336 = arith.constant 336 : index
    %168 = vector.load %arg17[%c0_129, %c336] : memref<11x616xf32, #tpu.memory_space<vmem>>, vector<11x28xf32>
    %169 = arith.maximumf %167, %168 : vector<11x28xf32>
    %c0_130 = arith.constant 0 : index
    %c140_131 = arith.constant 140 : index
    %170 = vector.load %arg18[%c0_130, %c140_131] : memref<11x308xf32, #tpu.memory_space<vmem>>, vector<11x28xf32>
    tpu.vector_store %arg18[%c0_130, %c140_131], %169 {strides = array<i32>} : memref<11x308xf32, #tpu.memory_space<vmem>>, vector<11x28xf32>,
    %c0_132 = arith.constant 0 : index
    %c336_133 = arith.constant 336 : index
    %171 = vector.load %arg17[%c0_132, %c336_133] : memref<11x616xf32, #tpu.memory_space<vmem>>, vector<11x28xf32>
    %c0_134 = arith.constant 0 : index
    %c364 = arith.constant 364 : index
    %172 = vector.load %arg17[%c0_134, %c364] : memref<11x616xf32, #tpu.memory_space<vmem>>, vector<11x28xf32>
    %173 = arith.maximumf %171, %172 : vector<11x28xf32>
    %c0_135 = arith.constant 0 : index
    %c392 = arith.constant 392 : index
    %174 = vector.load %arg17[%c0_135, %c392] : memref<11x616xf32, #tpu.memory_space<vmem>>, vector<11x28xf32>
    %175 = arith.maximumf %173, %174 : vector<11x28xf32>
    %c0_136 = arith.constant 0 : index
    %c168_137 = arith.constant 168 : index
    %176 = vector.load %arg18[%c0_136, %c168_137] : memref<11x308xf32, #tpu.memory_space<vmem>>, vector<11x28xf32>
    tpu.vector_store %arg18[%c0_136, %c168_137], %175 {strides = array<i32>} : memref<11x308xf32, #tpu.memory_space<vmem>>, vector<11x28xf32>,
    %c0_138 = arith.constant 0 : index
    %c392_139 = arith.constant 392 : index
    %177 = vector.load %arg17[%c0_138, %c392_139] : memref<11x616xf32, #tpu.memory_space<vmem>>, vector<11x28xf32>
    %c0_140 = arith.constant 0 : index
    %c420 = arith.constant 420 : index
    %178 = vector.load %arg17[%c0_140, %c420] : memref<11x616xf32, #tpu.memory_space<vmem>>, vector<11x28xf32>
    %179 = arith.maximumf %177, %178 : vector<11x28xf32>
    %c0_141 = arith.constant 0 : index
    %c448 = arith.constant 448 : index
    %180 = vector.load %arg17[%c0_141, %c448] : memref<11x616xf32, #tpu.memory_space<vmem>>, vector<11x28xf32>
    %181 = arith.maximumf %179, %180 : vector<11x28xf32>
    %c0_142 = arith.constant 0 : index
    %c196_143 = arith.constant 196 : index
    %182 = vector.load %arg18[%c0_142, %c196_143] : memref<11x308xf32, #tpu.memory_space<vmem>>, vector<11x28xf32>
    tpu.vector_store %arg18[%c0_142, %c196_143], %181 {strides = array<i32>} : memref<11x308xf32, #tpu.memory_space<vmem>>, vector<11x28xf32>,
    %c0_144 = arith.constant 0 : index
    %c448_145 = arith.constant 448 : index
    %183 = vector.load %arg17[%c0_144, %c448_145] : memref<11x616xf32, #tpu.memory_space<vmem>>, vector<11x28xf32>
    %c0_146 = arith.constant 0 : index
    %c476 = arith.constant 476 : index
    %184 = vector.load %arg17[%c0_146, %c476] : memref<11x616xf32, #tpu.memory_space<vmem>>, vector<11x28xf32>
    %185 = arith.maximumf %183, %184 : vector<11x28xf32>
    %c0_147 = arith.constant 0 : index
    %c504 = arith.constant 504 : index
    %186 = vector.load %arg17[%c0_147, %c504] : memref<11x616xf32, #tpu.memory_space<vmem>>, vector<11x28xf32>
    %187 = arith.maximumf %185, %186 : vector<11x28xf32>
    %c0_148 = arith.constant 0 : index
    %c224_149 = arith.constant 224 : index
    %188 = vector.load %arg18[%c0_148, %c224_149] : memref<11x308xf32, #tpu.memory_space<vmem>>, vector<11x28xf32>
    tpu.vector_store %arg18[%c0_148, %c224_149], %187 {strides = array<i32>} : memref<11x308xf32, #tpu.memory_space<vmem>>, vector<11x28xf32>,
    %c0_150 = arith.constant 0 : index
    %c504_151 = arith.constant 504 : index
    %189 = vector.load %arg17[%c0_150, %c504_151] : memref<11x616xf32, #tpu.memory_space<vmem>>, vector<11x28xf32>
    %c0_152 = arith.constant 0 : index
    %c532 = arith.constant 532 : index
    %190 = vector.load %arg17[%c0_152, %c532] : memref<11x616xf32, #tpu.memory_space<vmem>>, vector<11x28xf32>
    %191 = arith.maximumf %189, %190 : vector<11x28xf32>
    %c0_153 = arith.constant 0 : index
    %c560 = arith.constant 560 : index
    %192 = vector.load %arg17[%c0_153, %c560] : memref<11x616xf32, #tpu.memory_space<vmem>>, vector<11x28xf32>
    %193 = arith.maximumf %191, %192 : vector<11x28xf32>
    %c0_154 = arith.constant 0 : index
    %c252_155 = arith.constant 252 : index
    %194 = vector.load %arg18[%c0_154, %c252_155] : memref<11x308xf32, #tpu.memory_space<vmem>>, vector<11x28xf32>
    tpu.vector_store %arg18[%c0_154, %c252_155], %193 {strides = array<i32>} : memref<11x308xf32, #tpu.memory_space<vmem>>, vector<11x28xf32>,
    %c0_156 = arith.constant 0 : index
    %c560_157 = arith.constant 560 : index
    %195 = vector.load %arg17[%c0_156, %c560_157] : memref<11x616xf32, #tpu.memory_space<vmem>>, vector<11x28xf32>
    %c0_158 = arith.constant 0 : index
    %c588 = arith.constant 588 : index
    %196 = vector.load %arg17[%c0_158, %c588] : memref<11x616xf32, #tpu.memory_space<vmem>>, vector<11x28xf32>
    %197 = arith.maximumf %195, %196 : vector<11x28xf32>
    %c0_159 = arith.constant 0 : index
    %c280_160 = arith.constant 280 : index
    %198 = vector.load %arg18[%c0_159, %c280_160] : memref<11x308xf32, #tpu.memory_space<vmem>>, vector<11x28xf32>
    tpu.vector_store %arg18[%c0_159, %c280_160], %197 {strides = array<i32>} : memref<11x308xf32, #tpu.memory_space<vmem>>, vector<11x28xf32>,
    %c0_161 = arith.constant 0 : index
    %c0_162 = arith.constant 0 : index
    %199 = vector.load %arg18[%c0_161, %c0_162] : memref<11x308xf32, #tpu.memory_space<vmem>>, vector<9x308xf32>
    %200 = arith.truncf %199 : vector<9x308xf32> to vector<9x308xbf16>
    %c0_163 = arith.constant 0 : index
    %c0_164 = arith.constant 0 : index
    %c0_165 = arith.constant 0 : index
    %201 = vector.load %arg5[%c0_163, %c0_164, %c0_165] : memref<3x308x432xbf16, #tpu.memory_space<vmem>>, vector<1x308x432xbf16>
    %202 = vector.shape_cast %201 : vector<1x308x432xbf16> to vector<308x432xbf16>
    %cst_166 = arith.constant dense<0.000000e+00> : vector<9x432xf32>
    %203 = tpu.matmul %200, %202, %cst_166 {dimension_numbers = #tpu.dot_dimension_numbers<[1], [0], [0], [1], [0, 0, 1, 1], [], []>} : vector<9x308xbf16>, vector<308x432xbf16>, vector<9x432xf32> -> vector<9x432xf32>
    %c1_167 = arith.constant 1 : index
    %c0_168 = arith.constant 0 : index
    %204 = vector.load %arg18[%c1_167, %c0_168] : memref<11x308xf32, #tpu.memory_space<vmem>>, vector<9x308xf32>
    %205 = arith.truncf %204 : vector<9x308xf32> to vector<9x308xbf16>
    %c1_169 = arith.constant 1 : index
    %c0_170 = arith.constant 0 : index
    %c0_171 = arith.constant 0 : index
    %206 = vector.load %arg5[%c1_169, %c0_170, %c0_171] : memref<3x308x432xbf16, #tpu.memory_space<vmem>>, vector<1x308x432xbf16>
    %207 = vector.shape_cast %206 : vector<1x308x432xbf16> to vector<308x432xbf16>
    %cst_172 = arith.constant dense<0.000000e+00> : vector<9x432xf32>
    %208 = tpu.matmul %205, %207, %cst_172 {dimension_numbers = #tpu.dot_dimension_numbers<[1], [0], [0], [1], [0, 0, 1, 1], [], []>} : vector<9x308xbf16>, vector<308x432xbf16>, vector<9x432xf32> -> vector<9x432xf32>
    %209 = arith.addf %203, %208 : vector<9x432xf32>
    %c2_173 = arith.constant 2 : index
    %c0_174 = arith.constant 0 : index
    %210 = vector.load %arg18[%c2_173, %c0_174] : memref<11x308xf32, #tpu.memory_space<vmem>>, vector<9x308xf32>
    %211 = arith.truncf %210 : vector<9x308xf32> to vector<9x308xbf16>
    %c2_175 = arith.constant 2 : index
    %c0_176 = arith.constant 0 : index
    %c0_177 = arith.constant 0 : index
    %212 = vector.load %arg5[%c2_175, %c0_176, %c0_177] : memref<3x308x432xbf16, #tpu.memory_space<vmem>>, vector<1x308x432xbf16>
    %213 = vector.shape_cast %212 : vector<1x308x432xbf16> to vector<308x432xbf16>
    %cst_178 = arith.constant dense<0.000000e+00> : vector<9x432xf32>
    %214 = tpu.matmul %211, %213, %cst_178 {dimension_numbers = #tpu.dot_dimension_numbers<[1], [0], [0], [1], [0, 0, 1, 1], [], []>} : vector<9x308xbf16>, vector<308x432xbf16>, vector<9x432xf32> -> vector<9x432xf32>
    %215 = arith.addf %209, %214 : vector<9x432xf32>
    %c0_179 = arith.constant 0 : index
    %c0_180 = arith.constant 0 : index
    %216 = vector.load %arg6[%c0_179, %c0_180] : memref<1x432xf32, #tpu.memory_space<vmem>>, vector<1x432xf32>
    %217 = vector.broadcast %216 : vector<1x432xf32> to vector<9x432xf32>
    %218 = arith.addf %215, %217 : vector<9x432xf32>
    %cst_181 = arith.constant 0.000000e+00 : f32
    %219 = vector.broadcast %cst_181 : f32 to vector<9x432xf32>
    %220 = arith.cmpf oge, %218, %219 : vector<9x432xf32>
    %c0_182 = arith.constant 0 : index
    %c0_183 = arith.constant 0 : index
    %221 = vector.load %arg7[%c0_182, %c0_183] : memref<1x432xf32, #tpu.memory_space<vmem>>, vector<1x432xf32>
    %222 = vector.broadcast %221 : vector<1x432xf32> to vector<9x432xf32>
    %223 = arith.mulf %222, %218 : vector<9x432xf32>
    %224 = arith.select %220, %218, %223 : vector<9x432xi1>, vector<9x432xf32>
    %225 = vector.extract_strided_slice %224 {offsets = [0, 0], sizes = [1, 432], strides = [1, 1]} : vector<9x432xf32> to vector<1x432xf32>
    %226 = vector.extract_strided_slice %224 {offsets = [1, 0], sizes = [1, 432], strides = [1, 1]} : vector<9x432xf32> to vector<1x432xf32>
    %227 = arith.maximumf %225, %226 : vector<1x432xf32>
    %228 = vector.extract_strided_slice %224 {offsets = [2, 0], sizes = [1, 432], strides = [1, 1]} : vector<9x432xf32> to vector<1x432xf32>
    %229 = arith.maximumf %227, %228 : vector<1x432xf32>
    %c0_184 = arith.constant 0 : index
    %c0_185 = arith.constant 0 : index
    %230 = vector.load %arg19[%c0_184, %c0_185] : memref<4x432xf32, #tpu.memory_space<vmem>>, vector<1x432xf32>
    tpu.vector_store %arg19[%c0_184, %c0_185], %229 {strides = array<i32>} : memref<4x432xf32, #tpu.memory_space<vmem>>, vector<1x432xf32>,
    %231 = vector.extract_strided_slice %224 {offsets = [2, 0], sizes = [1, 432], strides = [1, 1]} : vector<9x432xf32> to vector<1x432xf32>
    %232 = vector.extract_strided_slice %224 {offsets = [3, 0], sizes = [1, 432], strides = [1, 1]} : vector<9x432xf32> to vector<1x432xf32>
    %233 = arith.maximumf %231, %232 : vector<1x432xf32>
    %234 = vector.extract_strided_slice %224 {offsets = [4, 0], sizes = [1, 432], strides = [1, 1]} : vector<9x432xf32> to vector<1x432xf32>
    %235 = arith.maximumf %233, %234 : vector<1x432xf32>
    %c1_186 = arith.constant 1 : index
    %c0_187 = arith.constant 0 : index
    %236 = vector.load %arg19[%c1_186, %c0_187] : memref<4x432xf32, #tpu.memory_space<vmem>>, vector<1x432xf32>
    tpu.vector_store %arg19[%c1_186, %c0_187], %235 {strides = array<i32>} : memref<4x432xf32, #tpu.memory_space<vmem>>, vector<1x432xf32>,
    %237 = vector.extract_strided_slice %224 {offsets = [4, 0], sizes = [1, 432], strides = [1, 1]} : vector<9x432xf32> to vector<1x432xf32>
    %238 = vector.extract_strided_slice %224 {offsets = [5, 0], sizes = [1, 432], strides = [1, 1]} : vector<9x432xf32> to vector<1x432xf32>
    %239 = arith.maximumf %237, %238 : vector<1x432xf32>
    %240 = vector.extract_strided_slice %224 {offsets = [6, 0], sizes = [1, 432], strides = [1, 1]} : vector<9x432xf32> to vector<1x432xf32>
    %241 = arith.maximumf %239, %240 : vector<1x432xf32>
    %c2_188 = arith.constant 2 : index
    %c0_189 = arith.constant 0 : index
    %242 = vector.load %arg19[%c2_188, %c0_189] : memref<4x432xf32, #tpu.memory_space<vmem>>, vector<1x432xf32>
    tpu.vector_store %arg19[%c2_188, %c0_189], %241 {strides = array<i32>} : memref<4x432xf32, #tpu.memory_space<vmem>>, vector<1x432xf32>,
    %243 = vector.extract_strided_slice %224 {offsets = [6, 0], sizes = [1, 432], strides = [1, 1]} : vector<9x432xf32> to vector<1x432xf32>
    %244 = vector.extract_strided_slice %224 {offsets = [7, 0], sizes = [1, 432], strides = [1, 1]} : vector<9x432xf32> to vector<1x432xf32>
    %245 = arith.maximumf %243, %244 : vector<1x432xf32>
    %246 = vector.extract_strided_slice %224 {offsets = [8, 0], sizes = [1, 432], strides = [1, 1]} : vector<9x432xf32> to vector<1x432xf32>
    %247 = arith.maximumf %245, %246 : vector<1x432xf32>
    %c3_190 = arith.constant 3 : index
    %c0_191 = arith.constant 0 : index
    %248 = vector.load %arg19[%c3_190, %c0_191] : memref<4x432xf32, #tpu.memory_space<vmem>>, vector<1x432xf32>
    tpu.vector_store %arg19[%c3_190, %c0_191], %247 {strides = array<i32>} : memref<4x432xf32, #tpu.memory_space<vmem>>, vector<1x432xf32>,
    %c0_192 = arith.constant 0 : index
    %c0_193 = arith.constant 0 : index
    %249 = vector.load %arg19[%c0_192, %c0_193] : memref<4x432xf32, #tpu.memory_space<vmem>>, vector<4x48xf32>
    %c0_194 = arith.constant 0 : index
    %c48 = arith.constant 48 : index
    %250 = vector.load %arg19[%c0_194, %c48] : memref<4x432xf32, #tpu.memory_space<vmem>>, vector<4x48xf32>
    %251 = arith.maximumf %249, %250 : vector<4x48xf32>
    %c0_195 = arith.constant 0 : index
    %c96 = arith.constant 96 : index
    %252 = vector.load %arg19[%c0_195, %c96] : memref<4x432xf32, #tpu.memory_space<vmem>>, vector<4x48xf32>
    %253 = arith.maximumf %251, %252 : vector<4x48xf32>
    %c0_196 = arith.constant 0 : index
    %c0_197 = arith.constant 0 : index
    %254 = vector.load %arg20[%c0_196, %c0_197] : memref<4x192xf32, #tpu.memory_space<vmem>>, vector<4x48xf32>
    tpu.vector_store %arg20[%c0_196, %c0_197], %253 {strides = array<i32>} : memref<4x192xf32, #tpu.memory_space<vmem>>, vector<4x48xf32>,
    %c0_198 = arith.constant 0 : index
    %c96_199 = arith.constant 96 : index
    %255 = vector.load %arg19[%c0_198, %c96_199] : memref<4x432xf32, #tpu.memory_space<vmem>>, vector<4x48xf32>
    %c0_200 = arith.constant 0 : index
    %c144 = arith.constant 144 : index
    %256 = vector.load %arg19[%c0_200, %c144] : memref<4x432xf32, #tpu.memory_space<vmem>>, vector<4x48xf32>
    %257 = arith.maximumf %255, %256 : vector<4x48xf32>
    %c0_201 = arith.constant 0 : index
    %c192 = arith.constant 192 : index
    %258 = vector.load %arg19[%c0_201, %c192] : memref<4x432xf32, #tpu.memory_space<vmem>>, vector<4x48xf32>
    %259 = arith.maximumf %257, %258 : vector<4x48xf32>
    %c0_202 = arith.constant 0 : index
    %c48_203 = arith.constant 48 : index
    %260 = vector.load %arg20[%c0_202, %c48_203] : memref<4x192xf32, #tpu.memory_space<vmem>>, vector<4x48xf32>
    tpu.vector_store %arg20[%c0_202, %c48_203], %259 {strides = array<i32>} : memref<4x192xf32, #tpu.memory_space<vmem>>, vector<4x48xf32>,
    %c0_204 = arith.constant 0 : index
    %c192_205 = arith.constant 192 : index
    %261 = vector.load %arg19[%c0_204, %c192_205] : memref<4x432xf32, #tpu.memory_space<vmem>>, vector<4x48xf32>
    %c0_206 = arith.constant 0 : index
    %c240 = arith.constant 240 : index
    %262 = vector.load %arg19[%c0_206, %c240] : memref<4x432xf32, #tpu.memory_space<vmem>>, vector<4x48xf32>
    %263 = arith.maximumf %261, %262 : vector<4x48xf32>
    %c0_207 = arith.constant 0 : index
    %c288 = arith.constant 288 : index
    %264 = vector.load %arg19[%c0_207, %c288] : memref<4x432xf32, #tpu.memory_space<vmem>>, vector<4x48xf32>
    %265 = arith.maximumf %263, %264 : vector<4x48xf32>
    %c0_208 = arith.constant 0 : index
    %c96_209 = arith.constant 96 : index
    %266 = vector.load %arg20[%c0_208, %c96_209] : memref<4x192xf32, #tpu.memory_space<vmem>>, vector<4x48xf32>
    tpu.vector_store %arg20[%c0_208, %c96_209], %265 {strides = array<i32>} : memref<4x192xf32, #tpu.memory_space<vmem>>, vector<4x48xf32>,
    %c0_210 = arith.constant 0 : index
    %c288_211 = arith.constant 288 : index
    %267 = vector.load %arg19[%c0_210, %c288_211] : memref<4x432xf32, #tpu.memory_space<vmem>>, vector<4x48xf32>
    %c0_212 = arith.constant 0 : index
    %c336_213 = arith.constant 336 : index
    %268 = vector.load %arg19[%c0_212, %c336_213] : memref<4x432xf32, #tpu.memory_space<vmem>>, vector<4x48xf32>
    %269 = arith.maximumf %267, %268 : vector<4x48xf32>
    %c0_214 = arith.constant 0 : index
    %c384 = arith.constant 384 : index
    %270 = vector.load %arg19[%c0_214, %c384] : memref<4x432xf32, #tpu.memory_space<vmem>>, vector<4x48xf32>
    %271 = arith.maximumf %269, %270 : vector<4x48xf32>
    %c0_215 = arith.constant 0 : index
    %c144_216 = arith.constant 144 : index
    %272 = vector.load %arg20[%c0_215, %c144_216] : memref<4x192xf32, #tpu.memory_space<vmem>>, vector<4x48xf32>
    tpu.vector_store %arg20[%c0_215, %c144_216], %271 {strides = array<i32>} : memref<4x192xf32, #tpu.memory_space<vmem>>, vector<4x48xf32>,
    %c0_217 = arith.constant 0 : index
    %c0_218 = arith.constant 0 : index
    %273 = vector.load %arg20[%c0_217, %c0_218] : memref<4x192xf32, #tpu.memory_space<vmem>>, vector<3x192xf32>
    %274 = arith.truncf %273 : vector<3x192xf32> to vector<3x192xbf16>
    %c0_219 = arith.constant 0 : index
    %c0_220 = arith.constant 0 : index
    %c0_221 = arith.constant 0 : index
    %275 = vector.load %arg8[%c0_219, %c0_220, %c0_221] : memref<2x192x192xbf16, #tpu.memory_space<vmem>>, vector<1x192x192xbf16>
    %276 = vector.shape_cast %275 : vector<1x192x192xbf16> to vector<192x192xbf16>
    %cst_222 = arith.constant dense<0.000000e+00> : vector<3x192xf32>
    %277 = tpu.matmul %274, %276, %cst_222 {dimension_numbers = #tpu.dot_dimension_numbers<[1], [0], [0], [1], [0, 0, 1, 1], [], []>} : vector<3x192xbf16>, vector<192x192xbf16>, vector<3x192xf32> -> vector<3x192xf32>
    %c1_223 = arith.constant 1 : index
    %c0_224 = arith.constant 0 : index
    %278 = vector.load %arg20[%c1_223, %c0_224] : memref<4x192xf32, #tpu.memory_space<vmem>>, vector<3x192xf32>
    %279 = arith.truncf %278 : vector<3x192xf32> to vector<3x192xbf16>
    %c1_225 = arith.constant 1 : index
    %c0_226 = arith.constant 0 : index
    %c0_227 = arith.constant 0 : index
    %280 = vector.load %arg8[%c1_225, %c0_226, %c0_227] : memref<2x192x192xbf16, #tpu.memory_space<vmem>>, vector<1x192x192xbf16>
    %281 = vector.shape_cast %280 : vector<1x192x192xbf16> to vector<192x192xbf16>
    %cst_228 = arith.constant dense<0.000000e+00> : vector<3x192xf32>
    %282 = tpu.matmul %279, %281, %cst_228 {dimension_numbers = #tpu.dot_dimension_numbers<[1], [0], [0], [1], [0, 0, 1, 1], [], []>} : vector<3x192xbf16>, vector<192x192xbf16>, vector<3x192xf32> -> vector<3x192xf32>
    %283 = arith.addf %277, %282 : vector<3x192xf32>
    %c0_229 = arith.constant 0 : index
    %c0_230 = arith.constant 0 : index
    %284 = vector.load %arg9[%c0_229, %c0_230] : memref<1x192xf32, #tpu.memory_space<vmem>>, vector<1x192xf32>
    %285 = vector.broadcast %284 : vector<1x192xf32> to vector<3x192xf32>
    %286 = arith.addf %283, %285 : vector<3x192xf32>
    %cst_231 = arith.constant 0.000000e+00 : f32
    %287 = vector.broadcast %cst_231 : f32 to vector<3x192xf32>
    %288 = arith.cmpf oge, %286, %287 : vector<3x192xf32>
    %c0_232 = arith.constant 0 : index
    %c0_233 = arith.constant 0 : index
    %289 = vector.load %arg10[%c0_232, %c0_233] : memref<1x192xf32, #tpu.memory_space<vmem>>, vector<1x192xf32>
    %290 = vector.broadcast %289 : vector<1x192xf32> to vector<3x192xf32>
    %291 = arith.mulf %290, %286 : vector<3x192xf32>
    %292 = arith.select %288, %286, %291 : vector<3x192xi1>, vector<3x192xf32>
    %293 = vector.extract_strided_slice %292 {offsets = [0, 0], sizes = [1, 192], strides = [1, 1]} : vector<3x192xf32> to vector<1x192xf32>
    %294 = arith.truncf %293 : vector<1x192xf32> to vector<1x192xbf16>
    %c0_234 = arith.constant 0 : index
    %c0_235 = arith.constant 0 : index
    %c0_236 = arith.constant 0 : index
    %295 = vector.load %arg11[%c0_234, %c0_235, %c0_236] : memref<3x192x128xbf16, #tpu.memory_space<vmem>>, vector<1x192x128xbf16>
    %296 = vector.shape_cast %295 : vector<1x192x128xbf16> to vector<192x128xbf16>
    %cst_237 = arith.constant dense<0.000000e+00> : vector<1x128xf32>
    %297 = tpu.matmul %294, %296, %cst_237 {dimension_numbers = #tpu.dot_dimension_numbers<[1], [0], [0], [1], [0, 0, 1, 1], [], []>} : vector<1x192xbf16>, vector<192x128xbf16>, vector<1x128xf32> -> vector<1x128xf32>
    %298 = vector.extract_strided_slice %292 {offsets = [1, 0], sizes = [1, 192], strides = [1, 1]} : vector<3x192xf32> to vector<1x192xf32>
    %299 = arith.truncf %298 : vector<1x192xf32> to vector<1x192xbf16>
    %c1_238 = arith.constant 1 : index
    %c0_239 = arith.constant 0 : index
    %c0_240 = arith.constant 0 : index
    %300 = vector.load %arg11[%c1_238, %c0_239, %c0_240] : memref<3x192x128xbf16, #tpu.memory_space<vmem>>, vector<1x192x128xbf16>
    %301 = vector.shape_cast %300 : vector<1x192x128xbf16> to vector<192x128xbf16>
    %cst_241 = arith.constant dense<0.000000e+00> : vector<1x128xf32>
    %302 = tpu.matmul %299, %301, %cst_241 {dimension_numbers = #tpu.dot_dimension_numbers<[1], [0], [0], [1], [0, 0, 1, 1], [], []>} : vector<1x192xbf16>, vector<192x128xbf16>, vector<1x128xf32> -> vector<1x128xf32>
    %303 = arith.addf %297, %302 : vector<1x128xf32>
    %304 = vector.extract_strided_slice %292 {offsets = [2, 0], sizes = [1, 192], strides = [1, 1]} : vector<3x192xf32> to vector<1x192xf32>
    %305 = arith.truncf %304 : vector<1x192xf32> to vector<1x192xbf16>
    %c2_242 = arith.constant 2 : index
    %c0_243 = arith.constant 0 : index
    %c0_244 = arith.constant 0 : index
    %306 = vector.load %arg11[%c2_242, %c0_243, %c0_244] : memref<3x192x128xbf16, #tpu.memory_space<vmem>>, vector<1x192x128xbf16>
    %307 = vector.shape_cast %306 : vector<1x192x128xbf16> to vector<192x128xbf16>
    %cst_245 = arith.constant dense<0.000000e+00> : vector<1x128xf32>
    %308 = tpu.matmul %305, %307, %cst_245 {dimension_numbers = #tpu.dot_dimension_numbers<[1], [0], [0], [1], [0, 0, 1, 1], [], []>} : vector<1x192xbf16>, vector<192x128xbf16>, vector<1x128xf32> -> vector<1x128xf32>
    %309 = arith.addf %303, %308 : vector<1x128xf32>
    %c0_246 = arith.constant 0 : index
    %c0_247 = arith.constant 0 : index
    %310 = vector.load %arg12[%c0_246, %c0_247] : memref<1x128xf32, #tpu.memory_space<vmem>>, vector<1x128xf32>
    %311 = arith.addf %309, %310 : vector<1x128xf32>
    %cst_248 = arith.constant 0.000000e+00 : f32
    %312 = vector.broadcast %cst_248 : f32 to vector<1x128xf32>
    %313 = arith.cmpf oge, %311, %312 : vector<1x128xf32>
    %c0_249 = arith.constant 0 : index
    %c0_250 = arith.constant 0 : index
    %314 = vector.load %arg13[%c0_249, %c0_250] : memref<1x128xf32, #tpu.memory_space<vmem>>, vector<1x128xf32>
    %315 = arith.mulf %314, %311 : vector<1x128xf32>
    %316 = arith.select %313, %311, %315 : vector<1x128xi1>, vector<1x128xf32>
    %317 = arith.truncf %316 : vector<1x128xf32> to vector<1x128xbf16>
    %c0_251 = arith.constant 0 : index
    %c0_252 = arith.constant 0 : index
    %318 = vector.load %arg14[%c0_251, %c0_252] : memref<128x128xbf16, #tpu.memory_space<vmem>>, vector<128x128xbf16>
    %cst_253 = arith.constant dense<0.000000e+00> : vector<1x128xf32>
    %319 = tpu.matmul %317, %318, %cst_253 {dimension_numbers = #tpu.dot_dimension_numbers<[1], [0], [0], [1], [0, 0, 1, 1], [], []>} : vector<1x128xbf16>, vector<128x128xbf16>, vector<1x128xf32> -> vector<1x128xf32>
    %c0_254 = arith.constant 0 : index
    %c0_255 = arith.constant 0 : index
    %320 = vector.load %arg15[%c0_254, %c0_255] : memref<1x128xf32, #tpu.memory_space<vmem>>, vector<1x128xf32>
    %321 = arith.addf %319, %320 : vector<1x128xf32>
    %322 = vector.extract_strided_slice %321 {offsets = [0, 0], sizes = [1, 1], strides = [1, 1]} : vector<1x128xf32> to vector<1x1xf32>
    %323 = vector.extract_strided_slice %321 {offsets = [0, 1], sizes = [1, 1], strides = [1, 1]} : vector<1x128xf32> to vector<1x1xf32>
    %324 = arith.maximumf %322, %323 : vector<1x1xf32>
    %325 = arith.subf %322, %324 : vector<1x1xf32>
    %326 = math.exp %325 : vector<1x1xf32>
    %327 = arith.subf %323, %324 : vector<1x1xf32>
    %328 = math.exp %327 : vector<1x1xf32>
    %329 = arith.addf %326, %328 : vector<1x1xf32>
    %cst_256 = arith.constant 1.000000e+00 : f32
    %330 = vector.broadcast %cst_256 : f32 to vector<1x1xf32>
    %331 = arith.divf %330, %329 : vector<1x1xf32>
    %cst_257 = arith.constant 0.000000e+00 : f32
    %332 = vector.broadcast %cst_257 : f32 to vector<1x8x128xf32>
    %c0_258 = arith.constant 0 : index
    %c0_259 = arith.constant 0 : index
    %c0_260 = arith.constant 0 : index
    %333 = vector.load %arg16[%c0_258, %c0_259, %c0_260] : memref<1x8x128xf32, #tpu.memory_space<vmem>>, vector<1x8x128xf32>
    tpu.vector_store %arg16[%c0_258, %c0_259, %c0_260], %332 {strides = array<i32>} : memref<1x8x128xf32, #tpu.memory_space<vmem>>, vector<1x8x128xf32>,
    %334 = arith.mulf %326, %331 : vector<1x1xf32>
    %c0_261 = arith.constant 0 : index
    %c0_262 = arith.constant 0 : index
    %c0_263 = arith.constant 0 : index
    %335 = vector.load %arg16[%c0_261, %c0_262, %c0_263] : memref<1x8x128xf32, #tpu.memory_space<vmem>>, vector<1x1x1xf32>
    %336 = vector.shape_cast %335 : vector<1x1x1xf32> to vector<1x1xf32>
    %337 = vector.shape_cast %334 : vector<1x1xf32> to vector<1x1x1xf32>
    tpu.vector_store %arg16[%c0_261, %c0_262, %c0_263], %337 {strides = array<i32>} : memref<1x8x128xf32, #tpu.memory_space<vmem>>, vector<1x1x1xf32>,
    %338 = arith.mulf %328, %331 : vector<1x1xf32>
    %c0_264 = arith.constant 0 : index
    %c0_265 = arith.constant 0 : index
    %c1_266 = arith.constant 1 : index
    %339 = vector.load %arg16[%c0_264, %c0_265, %c1_266] : memref<1x8x128xf32, #tpu.memory_space<vmem>>, vector<1x1x1xf32>
    %340 = vector.shape_cast %339 : vector<1x1x1xf32> to vector<1x1xf32>
    %341 = vector.shape_cast %338 : vector<1x1xf32> to vector<1x1x1xf32>
    tpu.vector_store %arg16[%c0_264, %c0_265, %c1_266], %341 {strides = array<i32>} : memref<1x8x128xf32, #tpu.memory_space<vmem>>, vector<1x1x1xf32>,
    %342 = vector.extract_strided_slice %321 {offsets = [0, 2], sizes = [1, 4], strides = [1, 1]} : vector<1x128xf32> to vector<1x4xf32>
    %c0_267 = arith.constant 0 : index
    %c0_268 = arith.constant 0 : index
    %c2_269 = arith.constant 2 : index
    %343 = vector.load %arg16[%c0_267, %c0_268, %c2_269] : memref<1x8x128xf32, #tpu.memory_space<vmem>>, vector<1x1x4xf32>
    %344 = vector.shape_cast %343 : vector<1x1x4xf32> to vector<1x4xf32>
    %345 = vector.shape_cast %342 : vector<1x4xf32> to vector<1x1x4xf32>
    tpu.vector_store %arg16[%c0_267, %c0_268, %c2_269], %345 {strides = array<i32>} : memref<1x8x128xf32, #tpu.memory_space<vmem>>, vector<1x1x4xf32>,
    return
  }
  func.func @transform_0(%arg0: i32) -> (i32, i32, i32, i32) {
    %c0_i32 = arith.constant 0 : i32
    %c0_i32_0 = arith.constant 0 : i32
    %c0_i32_1 = arith.constant 0 : i32
    %c0_i32_2 = arith.constant 0 : i32
    return %arg0, %c0_i32, %c0_i32_0, %c0_i32_1 : i32, i32, i32, i32
  }
  func.func @transform_1(%arg0: i32) -> (i32, i32, i32, i32) {
    %c0_i32 = arith.constant 0 : i32
    %c0_i32_0 = arith.constant 0 : i32
    %c0_i32_1 = arith.constant 0 : i32
    %c0_i32_2 = arith.constant 0 : i32
    %c0_i32_3 = arith.constant 0 : i32
    return %c0_i32, %c0_i32_0, %c0_i32_1, %c0_i32_2 : i32, i32, i32, i32
  }
  func.func @transform_2(%arg0: i32) -> (i32, i32) {
    %c0_i32 = arith.constant 0 : i32
    %c0_i32_0 = arith.constant 0 : i32
    %c0_i32_1 = arith.constant 0 : i32
    return %c0_i32, %c0_i32_0 : i32, i32
  }
  func.func @transform_3(%arg0: i32) -> (i32, i32) {
    %c0_i32 = arith.constant 0 : i32
    %c0_i32_0 = arith.constant 0 : i32
    %c0_i32_1 = arith.constant 0 : i32
    return %c0_i32, %c0_i32_0 : i32, i32
  }
  func.func @transform_4(%arg0: i32) -> (i32, i32, i32) {
    %c0_i32 = arith.constant 0 : i32
    %c0_i32_0 = arith.constant 0 : i32
    %c0_i32_1 = arith.constant 0 : i32
    %c0_i32_2 = arith.constant 0 : i32
    return %c0_i32, %c0_i32_0, %c0_i32_1 : i32, i32, i32
  }
  func.func @transform_5(%arg0: i32) -> (i32, i32) {
    %c0_i32 = arith.constant 0 : i32
    %c0_i32_0 = arith.constant 0 : i32
    %c0_i32_1 = arith.constant 0 : i32
    return %c0_i32, %c0_i32_0 : i32, i32
  }
  func.func @transform_6(%arg0: i32) -> (i32, i32) {
    %c0_i32 = arith.constant 0 : i32
    %c0_i32_0 = arith.constant 0 : i32
    %c0_i32_1 = arith.constant 0 : i32
    return %c0_i32, %c0_i32_0 : i32, i32
  }
  func.func @transform_7(%arg0: i32) -> (i32, i32, i32) {
    %c0_i32 = arith.constant 0 : i32
    %c0_i32_0 = arith.constant 0 : i32
    %c0_i32_1 = arith.constant 0 : i32
    %c0_i32_2 = arith.constant 0 : i32
    return %c0_i32, %c0_i32_0, %c0_i32_1 : i32, i32, i32
  }
  func.func @transform_8(%arg0: i32) -> (i32, i32) {
    %c0_i32 = arith.constant 0 : i32
    %c0_i32_0 = arith.constant 0 : i32
    %c0_i32_1 = arith.constant 0 : i32
    return %c0_i32, %c0_i32_0 : i32, i32
  }
  func.func @transform_9(%arg0: i32) -> (i32, i32) {
    %c0_i32 = arith.constant 0 : i32
    %c0_i32_0 = arith.constant 0 : i32
    %c0_i32_1 = arith.constant 0 : i32
    return %c0_i32, %c0_i32_0 : i32, i32
  }
  func.func @transform_10(%arg0: i32) -> (i32, i32, i32) {
    %c0_i32 = arith.constant 0 : i32
    %c0_i32_0 = arith.constant 0 : i32
    %c0_i32_1 = arith.constant 0 : i32
    %c0_i32_2 = arith.constant 0 : i32
    return %c0_i32, %c0_i32_0, %c0_i32_1 : i32, i32, i32
  }
  func.func @transform_11(%arg0: i32) -> (i32, i32) {
    %c0_i32 = arith.constant 0 : i32
    %c0_i32_0 = arith.constant 0 : i32
    %c0_i32_1 = arith.constant 0 : i32
    return %c0_i32, %c0_i32_0 : i32, i32
  }
  func.func @transform_12(%arg0: i32) -> (i32, i32) {
    %c0_i32 = arith.constant 0 : i32
    %c0_i32_0 = arith.constant 0 : i32
    %c0_i32_1 = arith.constant 0 : i32
    return %c0_i32, %c0_i32_0 : i32, i32
  }
  func.func @transform_13(%arg0: i32) -> (i32, i32) {
    %c0_i32 = arith.constant 0 : i32
    %c0_i32_0 = arith.constant 0 : i32
    %c0_i32_1 = arith.constant 0 : i32
    return %c0_i32, %c0_i32_0 : i32, i32
  }
  func.func @transform_14(%arg0: i32) -> (i32, i32) {
    %c0_i32 = arith.constant 0 : i32
    %c0_i32_0 = arith.constant 0 : i32
    %c0_i32_1 = arith.constant 0 : i32
    return %c0_i32, %c0_i32_0 : i32, i32
  }
  func.func @transform_15(%arg0: i32) -> (i32, i32, i32) {
    %c0_i32 = arith.constant 0 : i32
    %c0_i32_0 = arith.constant 0 : i32
    %c0_i32_1 = arith.constant 0 : i32
    return %arg0, %c0_i32, %c0_i32_0 : i32, i32, i32
  }
}

</mosaic_0001>

<bundles_post_ra>
// kernel: rnet_forward.1
= control target key start
LH: loop header
LB: loop body
LE: loop exit
PB: predicated region body
PF: predicated region fallthrough
CT: control target
= control target key end

     0   :  { %s10507_s0 = inlined_call_operand.hbm [shape: f32[2,3,24,24], index: 0, kind: input, shape index: {}]   ;;  %s10508_s1 = inlined_call_operand.hbm [shape: bf16[3,3,24,616], index: 1, kind: input, shape index: {}]   ;;  %s10509_s2 = inlined_call_operand.vmem [shape: f32[1,616], index: 2, kind: input, shape index: {}]   ;;  %s10510_s3 = inlined_call_operand.hbm [shape: f32[1,616], index: 3, kind: input, shape index: {}]   ;;  %s10511_s4 = inlined_call_operand.hbm [shape: bf16[3,308,432], index: 4, kind: input, shape index: {}]   ;;  %s10512_s5 = inlined_call_operand.vmem [shape: f32[1,432], index: 5, kind: input, shape index: {}]   ;;  %s10513_s6 = inlined_call_operand.hbm [shape: f32[1,432], index: 6, kind: input, shape index: {}]   ;;  %s10514_s7 = inlined_call_operand.hbm [shape: bf16[2,192,192], index: 7, kind: input, shape index: {}]   ;;  %s10515_s8 = inlined_call_operand.vmem [shape: f32[1,192], index: 8, kind: input, shape index: {}]   ;;  %s10516_s9 = inlined_call_operand.hbm [shape: f32[1,192], index: 9, kind: input, shape index: {}]   ;;  %s10517_s10 = inlined_call_operand.hbm [shape: bf16[3,192,128], index: 10, kind: input, shape index: {}]   ;;  %s10518_s11 = inlined_call_operand.vmem [shape: f32[1,128], index: 11, kind: input, shape index: {}]   ;;  %s10519_s12 = inlined_call_operand.hbm [shape: f32[1,128], index: 12, kind: input, shape index: {}]   ;;  %s10520_s13 = inlined_call_operand.hbm [shape: bf16[128,128], index: 13, kind: input, shape index: {}]   ;;  %s10521_s14 = inlined_call_operand.vmem [shape: f32[1,128], index: 14, kind: input, shape index: {}]   ;;  %s10522_s15 = inlined_call_operand.vmem [shape: f32[2,8,128], index: 15, kind: output, shape index: {}]  }
   0x1   :  { %10528 = sst [smem:[#allocation29_spill]] %s10509_s2 }
   0x2   :  { %10529 = sst [smem:[#allocation30_spill]] %s10512_s5 }
   0x3   :  { %10530 = sst [smem:[#allocation31_spill]] %s10515_s8 }
   0x4   :  { %10531 = sst [smem:[#allocation32_spill]] %s10518_s11 }
   0x5   :  { %10532 = sst [smem:[#allocation33_spill]] %s10521_s14 }
   0x6   :  { %10533 = sst [smem:[#allocation34_spill]] %s10522_s15 }
   0x7   :  { %20 = vsyncpa [#allocation7], 0 }
   0x8   :  { %22 = vsyncpa [#allocation7 + $0x1], 0 }
   0x9   :  { %23 = vsyncpa [#allocation9], 0 }
   0xa   :  { %24 = vsyncpa [#allocation12], 0 }
   0xb   :  { %25 = vsyncpa [#allocation15], 0 }
   0xc   :  { %26 = vsyncpa [#allocation18], 0 }
   0xd   :  { %27 = vsyncpa [#allocation21], 0  ;;  %s9318_s18 = smov 0   ;;  %s9320_s19 = smov 0  }
   0xe   :  { %s9322_s20 = smov 0   ;;  %s9324_s21 = smov 0  }
   0xf LB: > { %s9202_s22 = smov [#allocation8]   ;;  %s9339_s24 = sadd.s32 4294967295, %s9200_s21   ;;  %s9200_s21 = sphi %s9324_s21, %s10566_s21   ;;  %s9196_s20 = sphi %s9322_s20, %s10565_s20   ;;  %s9192_s19 = sphi %s9320_s19, %s10564_s19   ;;  %s9188_s18 = sphi %s9318_s18, %s10563_s18  }
  0x10   : > { %s396_s23 = sshll.u32 %s9202_s22, 4  ;;  %p7315_p0 = scmp.ge.s32.totalorder %s9200_s21, 1  ;;  %s9344_s23 = int_to_ptr.vmem [resolvable:$true] %s396_s23 }
  0x11   : > { %p10524_p1 = scmp.eq.s32.totalorder %s9339_s24, 0  ;;  %p384_p2 = scmp.lt.s32.totalorder %s9200_s21, 3 }
  0x12   : > { %s9203_s26 = smov [#allocation11]   ;;  %s9204_s29 = smov [#allocation14]  }
  0x13   : > { %p9346_p3 = pnand %p7315_p0, %p384_p2  ;;  %s423_s27 = sshll.u32 %s9203_s26, 4  ;;  %s9358_s27 = int_to_ptr.vmem [resolvable:$true] %s423_s27 }
  0x14   : > { %s9360_s30 = sshll.u32 %s9204_s29, 4  ;;  %s8864_s22 = scalar_lea.hbm %s10508_s1, 8640  ;;  %s451_s30 = int_to_ptr.vmem [resolvable:$true] %s9360_s30 }
  0x15   : > { %s10534_s25 = scalar_select %p9346_p3, 1, 0 }
  0x16   : > { %p8160_p4 = pneg %p9346_p3  ;;  %p8865_p6 = scmp.ne.s32.totalorder %s10508_s1, %s8864_s22 }
  0x17   : > { %10535 = sst [smem:[#allocation28_spill]] %s10534_s25  ;;  %p8871_p10 = scmp.lt.u32.totalorder %s8864_s22, %s10508_s1 }
  0x18   : > { %p9354_p5 = pnand %p8160_p4, %p10524_p1 }
  0x1a   : > { %p9370_p7 = pneg %p9354_p5 }
  0x1c   : > { %p8867_p8 = pnand %p9370_p7, %p8865_p6 }
  0x1e   : > { %p8868_p9 = pneg %p8867_p8 }
  0x20   : > { %p8873_p11 = pnand %p8871_p10, %p8868_p9 }
  0x22   : > { %8876 = shalt.err (!%p8873_p11)
}
  0x23   : > { %s8877_s14 = scalar_lea.vmem %s9344_s23, 8640  ;;  %p8885_p2 = scmp.lt.s32.totalorder %s9344_s23, %s9344_s23 }
  0x24   : > { %p8878_p12 = scmp.ne.s32.totalorder %s9344_s23, %s8877_s14  ;;  %p8886_p4 = scmp.lt.s32.totalorder %s8877_s14, %s8877_s14 }
  0x26   : > { %p8880_p13 = pnand %p8878_p12, %p9370_p7  ;;  %p8887_p6 = por %p8886_p4, %p8885_p2 }
  0x28   : > { %p8881_p0 = pneg %p8880_p13 }
  0x2a   : > { %p8888_p8 = pnand %p8887_p6, %p8881_p0 }
  0x2c   : > { %8891 = shalt.err (!%p8888_p8)
}
  0x2d   : > { %s9205_s15 = smov 320   ;;  %s9206_s11 = smov 20  }
  0x2e   : > { %8163 = dma.hbm_to_vmem [thread:$0]  (!%p9354_p5), %s10508_s1, 8640, %s9344_s23, [#allocation9], %s9205_s15, %s9205_s15, %s9206_s11  }
  0x2f   : > { %s8892_s8 = scalar_lea.hbm %s10511_s4, 29952 }
  0x30   : > { %p8893_p9 = scmp.ne.s32.totalorder %s10511_s4, %s8892_s8  ;;  %p8899_p12 = scmp.lt.u32.totalorder %s8892_s8, %s10511_s4 }
  0x32   : > { %p8895_p10 = pnand %p8893_p9, %p9370_p7 }
  0x34   : > { %p8896_p11 = pneg %p8895_p10 }
  0x36   : > { %p8901_p13 = pnand %p8899_p12, %p8896_p11 }
  0x38   : > { %8904 = shalt.err (!%p8901_p13)
}
  0x39   : > { %s8905_s23 = scalar_lea.vmem %s9358_s27, 29952  ;;  %p8913_p6 = scmp.lt.s32.totalorder %s9358_s27, %s9358_s27 }
  0x3a   : > { %p8906_p0 = scmp.ne.s32.totalorder %s9358_s27, %s8905_s23  ;;  %p8914_p8 = scmp.lt.s32.totalorder %s8905_s23, %s8905_s23 }
  0x3c   : > { %p8908_p2 = pnand %p8906_p0, %p9370_p7  ;;  %p8915_p9 = por %p8914_p8, %p8913_p6 }
  0x3e   : > { %p8909_p4 = pneg %p8908_p2 }
  0x40   : > { %p8916_p10 = pnand %p8915_p9, %p8909_p4 }
  0x42   : > { %8919 = shalt.err (!%p8916_p10)
}
  0x43   : > { %s9207_s2 = smov 256   ;;  %s9208_s5 = smov 16  }
  0x44   : > { %8169 = dma.hbm_to_vmem [thread:$0]  (!%p9354_p5), %s10511_s4, 29952, %s9358_s27, [#allocation12], %s9207_s2, %s9207_s2, %s9208_s5  }
  0x45   : > { %s8920_s16 = scalar_lea.hbm %s10514_s7, 6144 }
  0x46   : > { %p8921_p11 = scmp.ne.s32.totalorder %s10514_s7, %s8920_s16  ;;  %p8927_p0 = scmp.lt.u32.totalorder %s8920_s16, %s10514_s7 }
  0x48   : > { %p8923_p12 = pnand %p8921_p11, %p9370_p7 }
  0x4a   : > { %p8924_p13 = pneg %p8923_p12 }
  0x4c   : > { %p8929_p2 = pnand %p8927_p0, %p8924_p13 }
  0x4e   : > { %8932 = shalt.err (!%p8929_p2)
}
  0x4f   : > { %s8933_s23 = scalar_lea.vmem %s451_s30, 6144  ;;  %p8941_p9 = scmp.lt.s32.totalorder %s451_s30, %s451_s30 }
  0x50   : > { %p8934_p4 = scmp.ne.s32.totalorder %s451_s30, %s8933_s23  ;;  %p8942_p10 = scmp.lt.s32.totalorder %s8933_s23, %s8933_s23 }
  0x52   : > { %p8936_p6 = pnand %p8934_p4, %p9370_p7  ;;  %p8943_p1 = por %p8942_p10, %p8941_p9 }
  0x54   : > { %p8937_p8 = pneg %p8936_p6 }
  0x56   : > { %p8944_p3 = pnand %p8943_p1, %p8937_p8 }
  0x58   : > { %8947 = shalt.err (!%p8944_p3)
}
  0x59   : > { %s10526_s27 = smov 128   ;;  %s10527_s2 = smov 8  }
  0x5a   : > { %8175 = dma.hbm_to_vmem [thread:$0]  (!%p9354_p5), %s10514_s7, 6144, %s451_s30, [#allocation15], %s10526_s27, %s10526_s27, %s10527_s2  }
  0x5b   : > { %s9211_s25 = smov [#allocation17]   ;;  %s8948_s17 = scalar_lea.hbm %s10517_s10, 4608 }
  0x5c   : > { %s477_s15 = sshll.u32 %s9211_s25, 4  ;;  %p8949_p1 = scmp.ne.s32.totalorder %s10517_s10, %s8948_s17  ;;  %s478_s15 = int_to_ptr.vmem [resolvable:$true] %s477_s15 }
  0x5d   : > { %p8955_p12 = scmp.lt.u32.totalorder %s8948_s17, %s10517_s10 }
  0x5e   : > { %p8951_p3 = pnand %p8949_p1, %p9370_p7 }
  0x60   : > { %p8952_p11 = pneg %p8951_p3 }
  0x62   : > { %p8957_p13 = pnand %p8955_p12, %p8952_p11 }
  0x64   : > { %8960 = shalt.err (!%p8957_p13)
}
  0x65   : > { %s8961_s30 = scalar_lea.vmem %s478_s15, 4608  ;;  %p8969_p6 = scmp.lt.s32.totalorder %s478_s15, %s478_s15 }
  0x66   : > { %p8962_p0 = scmp.ne.s32.totalorder %s478_s15, %s8961_s30  ;;  %p8970_p8 = scmp.lt.s32.totalorder %s8961_s30, %s8961_s30 }
  0x68   : > { %p8964_p2 = pnand %p8962_p0, %p9370_p7  ;;  %p8971_p9 = por %p8970_p8, %p8969_p6 }
  0x6a   : > { %p8965_p4 = pneg %p8964_p2 }
  0x6c   : > { %p8972_p10 = pnand %p8971_p9, %p8965_p4 }
  0x6e   : > { %8975 = shalt.err (!%p8972_p10)
}
  0x6f   : > { %s9212_s5 = smov 64   ;;  %s9213_s8 = smov 4  }
  0x70   : > { %8181 = dma.hbm_to_vmem [thread:$0]  (!%p9354_p5), %s10517_s10, 4608, %s478_s15, [#allocation18], %s9212_s5, %s9212_s5, %s9213_s8  }
  0x71   : > { %s9214_s16 = smov [#allocation10]   ;;  %s9215_s22 = smov [#allocation13]  }
  0x72   : > { %s413_s17 = sshll.u32 %s9214_s16, 4  ;;  %s440_s29 = sshll.u32 %s9215_s22, 4  ;;  %s414_s17 = int_to_ptr.vmem [resolvable:$true] %s413_s17  ;;  %s9457_s29 = int_to_ptr.vmem [resolvable:$true] %s440_s29 }
  0x73   : > { %s8976_s30 = scalar_lea.hbm %s10510_s3, 80 }
  0x74   : > { %p8977_p1 = scmp.ne.s32.totalorder %s10510_s3, %s8976_s30  ;;  %p8983_p12 = scmp.lt.u32.totalorder %s8976_s30, %s10510_s3 }
  0x76   : > { %p8979_p3 = pnand %p8977_p1, %p9370_p7 }
  0x78   : > { %p8980_p11 = pneg %p8979_p3 }
  0x7a   : > { %p8985_p13 = pnand %p8983_p12, %p8980_p11 }
  0x7c   : > { %8988 = shalt.err (!%p8985_p13)
}
  0x7d   : > { %s8989_s11 = scalar_lea.vmem %s414_s17, 80  ;;  %s8996_s16 = scalar_lea.vmem %s414_s17, 96 }
  0x7e   : > { %p8990_p0 = scmp.ne.s32.totalorder %s414_s17, %s8989_s11  ;;  %p8997_p6 = scmp.lt.s32.totalorder %s414_s17, %s414_s17 }
  0x7f   : > { %p8998_p8 = scmp.lt.s32.totalorder %s8996_s16, %s8989_s11 }
  0x80   : > { %p8992_p2 = pnand %p8990_p0, %p9370_p7 }
  0x81   : > { %p8999_p9 = por %p8998_p8, %p8997_p6 }
  0x82   : > { %p8993_p4 = pneg %p8992_p2 }
  0x84   : > { %p9000_p10 = pnand %p8999_p9, %p8993_p4 }
  0x86   : > { %9003 = shalt.err (!%p9000_p10)
}
  0x87   : > { %8166 = dma.hbm_to_vmem [thread:$0]  (!%p9354_p5), %s10510_s3, 80, %s414_s17, [#allocation9]  }
  0x88   : > { %s9004_s23 = scalar_lea.hbm %s10513_s6, 64 }
  0x89   : > { %p9005_p1 = scmp.ne.s32.totalorder %s10513_s6, %s9004_s23  ;;  %p9011_p12 = scmp.lt.u32.totalorder %s9004_s23, %s10513_s6 }
  0x8b   : > { %p9007_p3 = pnand %p9005_p1, %p9370_p7 }
  0x8d   : > { %p9008_p11 = pneg %p9007_p3 }
  0x8f   : > { %p9013_p13 = pnand %p9011_p12, %p9008_p11 }
  0x91   : > { %9016 = shalt.err (!%p9013_p13)
}
  0x92   : > { %s9017_s17 = scalar_lea.vmem %s9457_s29, 64  ;;  %p9025_p6 = scmp.lt.s32.totalorder %s9457_s29, %s9457_s29 }
  0x93   : > { %p9018_p0 = scmp.ne.s32.totalorder %s9457_s29, %s9017_s17  ;;  %p9026_p8 = scmp.lt.s32.totalorder %s9017_s17, %s9017_s17 }
  0x95   : > { %p9020_p2 = pnand %p9018_p0, %p9370_p7  ;;  %p9027_p9 = por %p9026_p8, %p9025_p6 }
  0x97   : > { %p9021_p4 = pneg %p9020_p2 }
  0x99   : > { %p9028_p10 = pnand %p9027_p9, %p9021_p4 }
  0x9b   : > { %9031 = shalt.err (!%p9028_p10)
}
  0x9c   : > { %8172 = dma.hbm_to_vmem [thread:$0]  (!%p9354_p5), %s10513_s6, 64, %s9457_s29, [#allocation12]  }
  0x9d   : > { %s9216_s2 = smov [#allocation16]   ;;  %s9217_s14 = smov [#allocation19]  }
  0x9e   : > { %s467_s22 = sshll.u32 %s9216_s2, 4  ;;  %s494_s23 = sshll.u32 %s9217_s14, 4  ;;  %s468_s22 = int_to_ptr.vmem [resolvable:$true] %s467_s22  ;;  %s9500_s23 = int_to_ptr.vmem [resolvable:$true] %s494_s23 }
  0x9f   : > { %s9032_s15 = scalar_lea.hbm %s10516_s9, 32 }
  0xa0   : > { %p9033_p1 = scmp.ne.s32.totalorder %s10516_s9, %s9032_s15  ;;  %p9039_p12 = scmp.lt.u32.totalorder %s9032_s15, %s10516_s9 }
  0xa2   : > { %p9035_p3 = pnand %p9033_p1, %p9370_p7 }
  0xa4   : > { %p9036_p11 = pneg %p9035_p3 }
  0xa6   : > { %p9041_p13 = pnand %p9039_p12, %p9036_p11 }
  0xa8   : > { %9044 = shalt.err (!%p9041_p13)
}
  0xa9   : > { %s9045_s27 = scalar_lea.vmem %s468_s22, 32  ;;  %p9053_p6 = scmp.lt.s32.totalorder %s468_s22, %s468_s22 }
  0xaa   : > { %p9046_p0 = scmp.ne.s32.totalorder %s468_s22, %s9045_s27  ;;  %p9054_p8 = scmp.lt.s32.totalorder %s9045_s27, %s9045_s27 }
  0xac   : > { %p9048_p2 = pnand %p9046_p0, %p9370_p7  ;;  %p9055_p9 = por %p9054_p8, %p9053_p6 }
  0xae   : > { %p9049_p4 = pneg %p9048_p2 }
  0xb0   : > { %p9056_p10 = pnand %p9055_p9, %p9049_p4 }
  0xb2   : > { %9059 = shalt.err (!%p9056_p10)
}
  0xb3   : > { %8178 = dma.hbm_to_vmem [thread:$0]  (!%p9354_p5), %s10516_s9, 32, %s468_s22, [#allocation15]  }
  0xb4   : > { %s9060_s15 = scalar_lea.hbm %s10519_s12, 16 }
  0xb5   : > { %p9061_p1 = scmp.ne.s32.totalorder %s10519_s12, %s9060_s15  ;;  %p9067_p12 = scmp.lt.u32.totalorder %s9060_s15, %s10519_s12 }
  0xb7   : > { %p9063_p3 = pnand %p9061_p1, %p9370_p7 }
  0xb9   : > { %p9064_p11 = pneg %p9063_p3 }
  0xbb   : > { %p9069_p13 = pnand %p9067_p12, %p9064_p11 }
  0xbd   : > { %9072 = shalt.err (!%p9069_p13)
}
  0xbe   : > { %s9073_s22 = scalar_lea.vmem %s9500_s23, 16  ;;  %s9080_s27 = scalar_lea.vmem %s9500_s23, 32 }
  0xbf   : > { %p9074_p0 = scmp.ne.s32.totalorder %s9500_s23, %s9073_s22  ;;  %p9081_p6 = scmp.lt.s32.totalorder %s9500_s23, %s9500_s23 }
  0xc0   : > { %p9082_p8 = scmp.lt.s32.totalorder %s9080_s27, %s9073_s22 }
  0xc1   : > { %p9076_p2 = pnand %p9074_p0, %p9370_p7 }
  0xc2   : > { %p9083_p9 = por %p9082_p8, %p9081_p6 }
  0xc3   : > { %p9077_p4 = pneg %p9076_p2 }
  0xc5   : > { %p9084_p10 = pnand %p9083_p9, %p9077_p4 }
  0xc7   : > { %9087 = shalt.err (!%p9084_p10)
}
  0xc8   : > { %8184 = dma.hbm_to_vmem [thread:$0]  (!%p9354_p5), %s10519_s12, 16, %s9500_s23, [#allocation18]  }
  0xc9   : > { %s9218_s30 = smov [#allocation20]   ;;  %s9088_s17 = scalar_lea.hbm %s10520_s13, 1024 }
  0xca   : > { %s504_s25 = sshll.u32 %s9218_s30, 4  ;;  %p9089_p1 = scmp.ne.s32.totalorder %s10520_s13, %s9088_s17  ;;  %s505_s25 = int_to_ptr.vmem [resolvable:$true] %s504_s25 }
  0xcb   : > { %p9095_p12 = scmp.lt.u32.totalorder %s9088_s17, %s10520_s13 }
  0xcc   : > { %p9091_p3 = pnand %p9089_p1, %p9370_p7 }
  0xce   : > { %p9092_p11 = pneg %p9091_p3 }
  0xd0   : > { %p9097_p13 = pnand %p9095_p12, %p9092_p11 }
  0xd2   : > { %9100 = shalt.err (!%p9097_p13)
}
  0xd3   : > { %s9101_s23 = scalar_lea.vmem %s505_s25, 1024  ;;  %p9109_p6 = scmp.lt.s32.totalorder %s505_s25, %s505_s25 }
  0xd4   : > { %p9102_p0 = scmp.ne.s32.totalorder %s505_s25, %s9101_s23  ;;  %p9110_p8 = scmp.lt.s32.totalorder %s9101_s23, %s9101_s23 }
  0xd6   : > { %p9104_p2 = pnand %p9102_p0, %p9370_p7  ;;  %p9111_p9 = por %p9110_p8, %p9109_p6 }
  0xd8   : > { %p9105_p4 = pneg %p9104_p2 }
  0xda   : > { %p9112_p10 = pnand %p9111_p9, %p9105_p4 }
  0xdc   : > { %9115 = shalt.err (!%p9112_p10)
}
  0xdd   : > { %8187 = dma.hbm_to_vmem [thread:$0]  (!%p9354_p5), %s10520_s13, 1024, %s505_s25, [#allocation21], %s9212_s5, %s9212_s5, %s9213_s8  }
  0xde   : > { %s9566_s28 = sadd.s32 1, %s9200_s21   ;;  %s40_s30 = sadd.s32 1, %s9196_s20 }
  0xdf   : > { %s37_s26 = ssub.s32 %s9200_s21, %s9566_s28  ;;  %p47_p1 = scmp.ne.s32.totalorder %s9196_s20, %s9192_s19 }
  0xe0   : > { %p38_p7 = scmp.eq.s32.totalorder %s37_s26, 0  ;;  %p48_p3 = scmp.eq.s32.totalorder %s9200_s21, 0 }
  0xe1   : > { %p53_p11 = scmp.ne.s32.totalorder %s9192_s19, %s9188_s18  ;;  %p10538_p13 = scmp.eq.s32.totalorder %s9339_s24, 0 }
  0xe2   : > { %s9577_s15 = scalar_select %p38_p7, %s9196_s20, %s40_s30  }
  0xe3   : > { %p49_p12 = por %p48_p3, %p47_p1  ;;  %p9581_p0 = por %p10538_p13, %p53_p11 }
  0xe4   : > { %p8201_p2 = scmp.lt.s32.totalorder %s9200_s21, 2  ;;  %s521_s17 = sand.u32 1, %s9196_s20  }
  0xe5   : > { %s8119_s5 = smul.u32 72, %s521_s17  ;;  %s9121_s26 = scalar_lea.hbm %s10507_s0, 2304 }
  0xe6   : > { %s8120_s8 = smul.u32 1152, %s9200_s21  ;;  %p9588_p5 = pnand %p8201_p2, %p49_p12 }
  0xe7   : > { %s525_s22 = scalar_lea.vmem [#allocation6], %s8119_s5  ;;  %s9599_s21 = scalar_lea.sflag [#allocation7], %s521_s17 }
  0xe8   : > { %s9595_s18 = scalar_lea.hbm %s10507_s0, %s8120_s8  ;;  %s532_s27 = sshll.u32 %s525_s22, 4  ;;  %s9597_s27 = int_to_ptr.vmem [resolvable:$true] %s532_s27 }
  0xe9   : > { %s9116_s23 = scalar_lea.hbm %s9595_s18, 1152  ;;  %p9118_p6 = pneg %p9588_p5 }
  0xea   : > { %p9117_p4 = scmp.ne.s32.totalorder %s9595_s18, %s9116_s23  ;;  %p9122_p10 = scmp.lt.u32.totalorder %s9595_s18, %s10507_s0 }
  0xeb   : > { %p9123_p7 = scmp.lt.u32.totalorder %s9121_s26, %s9116_s23  ;;  %p9125_p3 = scmp.lt.u32.totalorder %s9116_s23, %s9595_s18 }
  0xec   : > { %p9119_p8 = pnand %p9118_p6, %p9117_p4 }
  0xed   : > { %p9124_p1 = por %p9123_p7, %p9122_p10 }
  0xee   : > { %p9120_p9 = pneg %p9119_p8 }
  0xef   : > { %p9126_p11 = por %p9125_p3, %p9124_p1 }
  0xf1   : > { %p9127_p12 = pnand %p9126_p11, %p9120_p9 }
  0xf3   : > { %9130 = shalt.err (!%p9127_p12)
}
  0xf4   : > { %s9131_s17 = scalar_lea.vmem %s9597_s27, 1152  ;;  %s9219_s5 = smov [#allocation6]  }
  0xf5   : > { %p9132_p13 = scmp.ne.s32.totalorder %s9597_s27, %s9131_s17  ;;  %s9136_s16 = sshll.u32 %s9219_s5, 4  ;;  %s9137_s16 = int_to_ptr.vmem [resolvable:$false] %s9136_s16 }
  0xf6   : > { %s9138_s29 = scalar_lea.vmem %s9137_s16, 2304  ;;  %p9139_p8 = scmp.lt.s32.totalorder %s9597_s27, %s9137_s16 }
  0xf7   : > { %p9134_p2 = pnand %p9132_p13, %p9118_p6  ;;  %p9140_p10 = scmp.lt.s32.totalorder %s9138_s29, %s9131_s17 }
  0xf9   : > { %p9135_p4 = pneg %p9134_p2  ;;  %p9141_p7 = por %p9140_p10, %p9139_p8 }
  0xfb   : > { %p9142_p1 = pnand %p9141_p7, %p9135_p4 }
  0xfd   : > { %9145 = shalt.err (!%p9142_p1)
}
  0xfe   : > { %s10541_s22 = smov 8   ;;  %s10542_s23 = smov 128  }
  0xff   : > { %8191 = dma.hbm_to_vmem [thread:$0]  (!%p9588_p5), %s9595_s18, 1152, %s9597_s27, %s9599_s21, %s10542_s23, %s10542_s23, %s10541_s22  }
 0x100   : > { %s10543_s2 = sld [smem:[#allocation28_spill]] }
 0x106   : > { %p10544_p6 = scmp.ne.s32.totalorder %s10543_s2, 0 }
 0x107   : > { %s546_s14 = sand.u32 (!%p10544_p6), 1, %s9192_s19  }
 0x108   : > { %544 = sbr.rel (%p10544_p6) target bundleno = 2983 (0xba7), region = 80  ;;  %s547_s30 = scalar_lea.sflag (!%p10544_p6), [#allocation7], %s546_s14 }
 0x109   : > { %s8121_s26 = smul.u32 (!%p10544_p6), 72, %s546_s14 }
 0x10b   : > { %s9633_s8 = scalar_lea.vmem (!%p10544_p6), [#allocation6], %s8121_s26 }
 0x10f   : > { %9163 = dma.done.wait (%p9581_p0), %s547_s30, 1152  }
 0x110   : > { %9165 = vsyncadd (%p9581_p0), %s547_s30, 4294966144  ;;  %p10545_p9 = scmp.eq.s32.totalorder %s9339_s24, 0 }
 0x112   : > { %9167 = dma.done.wait (%p10545_p9), [#allocation9], 8720   ;;  %p10546_p5 = pmov %p10545_p9 }
 0x114   : > { %9169 = vsyncadd (%p10546_p5), [#allocation9], 4294958576  ;;  %p10547_p3 = pmov %p10546_p5 }
 0x116   : > { %9171 = dma.done.wait (%p10547_p3), [#allocation12], 30016   ;;  %p10548_p11 = pmov %p10547_p3 }
 0x117   : > { %p10549_p12 = pmov %p10547_p3 }
 0x118   : > { %9173 = vsyncadd (%p10548_p11), [#allocation12], 4294937280 }
 0x119   : > { %9175 = dma.done.wait (%p10549_p12), [#allocation15], 6176   ;;  %p10550_p13 = pmov %p10547_p3 }
 0x11a   : > { %p10551_p0 = pmov %p10547_p3 }
 0x11b   : > { %9177 = vsyncadd (%p10550_p13), [#allocation15], 4294961120 }
 0x11c   : > { %9179 = dma.done.wait (%p10551_p0), [#allocation18], 4624   ;;  %p10552_p2 = pmov %p10551_p0 }
 0x11d   : > { %p10553_p4 = pmov %p10551_p0 }
 0x11e   : > { %9181 = vsyncadd (%p10552_p2), [#allocation18], 4294962672 }
 0x11f   : > { %9183 = dma.done.wait (%p10553_p4), [#allocation21], 1024   ;;  %p10554_p8 = pmov %p10551_p0 }
 0x120   : > { %v9220_v0 = vmov 0   ;;  %v8278_v1 = vld [vmem:[#allocation8 + $0x40] ss:$20 sps:$4 sm:$0xff]   ;;  %v8280_v2 = vld [vmem:[#allocation8 + $0x48] ss:$20 sps:$4 sm:$0xff]   ;;  %vm713_vm0 = vcmask 1043456  }
 0x121   : > { %9185 = vsyncadd (%p10554_p8), [#allocation21], 4294966272  ;;  %761 = vmatprep.mubr.bf16.mxu0 %v9220_v0  ;;  %812 = vmatprep.mubr.bf16.mxu1 %v9220_v0  ;;  %v8282_v3 = vld [vmem:[#allocation8 + $0x3c] ss:$20 sps:$4 sm:$0xff]   ;;  %v8283_v4 = vld [vmem:[#allocation8 + $0x44] ss:$20 sps:$4 sm:$0xff]  }
 0x122   : > { %729 = vmatprep.subr.bf16.mxu0 %v8278_v1  ;;  %v664_v5 = vld [vmem:[#allocation8 + $0x64] sm:$0xff]  ;;  %780 = vmatprep.subr.bf16.mxu1 %v8280_v2  ;;  %v665_v7 = vld [vmem:[#allocation8 + $0x6c] sm:$0xff]  ;;  %vm706_vm1 = vcmask 195584   ;;  %v8292_v20 = vld [vmem:[#allocation8 + $0x74] ss:$0 sps:$4 sm:$0xff]   ;;  %s10555_s18 = sld [smem:[#allocation29_spill]] }
 0x123   : > { %v7347_v6 = vcombine.high %v664_v5, %v664_v5  ;;  %v7346_v8 = vcombine.low %v664_v5, %v664_v5  ;;  %v7338_v9 = vld [vmem:[%s9633_s8 + $0x18] sm:$0xff]  ;;  %730 = vmatpush1.bf16.msra.mxu0 %v8282_v3  ;;  %781 = vmatpush1.bf16.msra.mxu1 %v8283_v4  ;;  %v7349_v10 = vcombine.high %v665_v7, %v665_v7  ;;  %v7339_v12 = vld [vmem:[%s9633_s8 + $0x20] sm:$0xff]  ;;  %v7340_v23 = vld [vmem:[%s9633_s8 + $0x28] sm:$0x3f]  ;;  %v727_v25 = vsel %vm713_vm0, %v8292_v20, 0  ;;  %s9222_s27 = smov 100  }
 0x124   : > { %v7348_v11 = vcombine.low %v665_v7, %v665_v7  ;;  %v8288_v14 = vld [vmem:[#allocation8 + $0x4c] ss:$20 sps:$4 sm:$0xff]   ;;  %v649_v17 = vld [vmem:[#allocation8 + $0x30] sm:$0xff]  ;;  %v655_v18 = vpack.c.bf16 %v7339_v12, %v7338_v9  ;;  %v8289_v19 = vld [vmem:[#allocation8 + $0x8] ss:$20 sps:$4 sm:$0xff]   ;;  %v656_v28 = vpack.c.bf16 %v7340_v23, %v7340_v23  ;;  %s9223_s21 = smov 72  }
 0x125   : > { %7351 = vmatprep.subr.msk.bf16.mxu0 %vm713_vm0, %v7347_v6  ;;  %v715_v13 = vsel %vm713_vm0, %v7346_v8, 0  ;;  %7354 = vmatprep.subr.msk.bf16.mxu1 %vm713_vm0, %v7349_v10  ;;  %v8291_v16 = vld [vmem:[#allocation8 + $0xc] ss:$20 sps:$4 sm:$0xff]   ;;  %v7366_v21 = vcombine.low %v649_v17, %v649_v17  ;;  %v7367_v22 = vcombine.high %v649_v17, %v649_v17  ;;  %v8297_v24 = vld [vmem:[#allocation8 + $0x4] ss:$20 sps:$4 sm:$0xff]   ;;  %s9224_s17 = smov 116  }
 0x126   : > { %v721_v15 = vsel %vm713_vm0, %v7348_v11, 0  ;;  %v8298_v27 = vld [vmem:[#allocation8 + $0x10] ss:$20 sps:$4 sm:$0xff]   ;;  %v648_v31 = vld [vmem:[#allocation8 + $0x28] sm:$0xff]  ;;  %v8295_v33 = vld [vmem:[#allocation8] ss:$20 sps:$4 sm:$0xff]  }
 0x127   : > { %732 = vmatpush1.bf16.msra.mxu0 %v715_v13  ;;  %783 = vmatpush1.bf16.msra.mxu1 %v721_v15  ;;  %v931_v26 = vsel %vm713_vm0, %v7366_v21, 0  ;;  %v637_v29 = vld [vmem:[%s9633_s8] sm:$0xff]  ;;  %v638_v30 = vld [vmem:[%s9633_s8 + $0x8] sm:$0xff]  ;;  %v7365_v34 = vcombine.high %v648_v31, %v648_v31  ;;  %v7364_v35 = vcombine.low %v648_v31, %v648_v31  ;;  %v639_v37 = vld [vmem:[%s9633_s8 + $0x10] sm:$0x3f]  ;;  %s9225_s5 = smov 60  }
 0x128   : > { %7914 = vmatprep.subr.bf16.mxu0 %v8288_v14  ;;  %990 = vmatprep.subr.bf16.mxu1 %v8291_v16  ;;  %v640_v32 = vpack.c.bf16 %v638_v30, %v637_v29  ;;  %v8304_v36 = vld [vmem:[#allocation8 + $0x38] ss:$0 sps:$4 sm:$0xff]   ;;  %v8303_v38 = vld [vmem:[#allocation8 + $0x7c] ss:$20 sps:$4 sm:$0xff]   ;;  %v1102_v42 = vld [vmem:[#allocation8 + $0xa0] sm:$0xff]  ;;  %v641_v43 = vpack.c.bf16 %v639_v37, %v639_v37  ;;  %s9226_s16 = smov 32  }
 0x129   : > { %v925_v39 = vsel %vm713_vm0, %v7364_v35, 0  ;;  %v937_v40 = vsel %vm713_vm0, %v8304_v36, 0  ;;  %v8308_v41 = vld [vmem:[#allocation8 + $0x84] ss:$20 sps:$4 sm:$0xff]   ;;  %v7386_v45 = vcombine.high %v1102_v42, %v1102_v42  ;;  %v7385_v46 = vcombine.low %v1102_v42, %v1102_v42  ;;  %v8312_v48 = vld [vmem:[#allocation8 + $0x88] ss:$20 sps:$4 sm:$0xff]  }
 0x12a   : > { %7352 = vmatmul.mubr.msk.bf16.vlgmr.msra.gmra.mrb[0].mxu0 %vm706_vm1, %v655_v18  ;;  %7355 = vmatmul.mubr.msk.bf16.vlgmr.msra.gmra.mrb[0].mxu1 %vm706_vm1, %v655_v18  ;;  %v8301_v44 = vld [vmem:[#allocation8 + $0x78] ss:$20 sps:$4 sm:$0xff]   ;;  %v8306_v50 = vld [vmem:[#allocation8 + $0x80] ss:$20 sps:$4 sm:$0xff]   ;;  %v1343_v57 = vld [vmem:[#allocation8 + $0xe4] sm:$0xff]  ;;  %s9227_s29 = smov 44  }
 0x12b   : > { %7915 = vmatpush3.bf16.msra.mxu0 %v8288_v14  ;;  %991 = vmatpush1.bf16.msra.mxu1 %v8289_v19  ;;  %v1151_v47 = vsel %vm713_vm0, %v7385_v46, 0  ;;  %v1103_v49 = vld [vmem:[#allocation8 + $0xa8] sm:$0xff]  ;;  %v8315_v56 = vld [vmem:[#allocation8 + $0xc0] ss:$20 sps:$4 sm:$0xff]   ;;  %v8313_v59 = vld [vmem:[#allocation8 + $0xbc] ss:$20 sps:$4 sm:$0xff]   ;;  %v7405_v61 = vcombine.low %v1343_v57, %v1343_v57  ;;  %v7406_v62 = vcombine.high %v1343_v57, %v1343_v57 }
 0x12c   : > { %771 = vmatprep.mubr.bf16.mxu0 %v9220_v0  ;;  %822 = vmatprep.mubr.bf16.mxu1 %v9220_v0  ;;  %v7388_v51 = vcombine.high %v1103_v49, %v1103_v49  ;;  %v7387_v52 = vcombine.low %v1103_v49, %v1103_v49  ;;  %v7377_v53 = vld [vmem:[%s9633_s8 + $0x30] sm:$0xff]  ;;  %v7378_v54 = vld [vmem:[%s9633_s8 + $0x38] sm:$0xff]  ;;  %v7379_v63 = vld [vmem:[%s9633_s8 + $0x40] sm:$0x3f]  ;;  %s9228_s22 = smov 16   ;;  %s9229_s23 = smov 88  }
 0x12d   : > { %8110 = vmatprep.subr.msk.bf16.mxu0 %vm713_vm0, %v8292_v20  ;;  %7372 = vmatprep.subr.msk.bf16.mxu1 %vm713_vm0, %v7367_v22  ;;  %v1093_v58 = vpack.c.bf16 %v7378_v54, %v7377_v53  ;;  %v8316_v60 = vld [vmem:[#allocation8 + $0xb0] ss:$0 sps:$4 sm:$0xff]   ;;  %v8321_v1 = vld [vmem:[#allocation8 + $0xb8] ss:$20 sps:$4 sm:$0xff]   ;;  %v1397_v3 = vsel %vm713_vm0, %v7405_v61, 0  ;;  %v1094_v5 = vpack.c.bf16 %v7379_v63, %v7379_v63  ;;  %v1342_v8 = vld [vmem:[#allocation8 + $0xdc] sm:$0xff] }
 0x12e   : > { %v1157_v55 = vsel %vm713_vm0, %v7387_v52, 0  ;;  %v1163_v2 = vsel %vm713_vm0, %v8316_v60, 0  ;;  %v8322_v4 = vld [vmem:[#allocation8 + $0xc4] ss:$20 sps:$4 sm:$0xff]   ;;  %v8319_v9 = vld [vmem:[#allocation8 + $0xb4] ss:$20 sps:$4 sm:$0xff]   ;;  %v7404_v12 = vcombine.high %v1342_v8, %v1342_v8  ;;  %v7403_v13 = vcombine.low %v1342_v8, %v1342_v8 }
 0x12f   : > { %7917 = vmatpush3.bf16.msra.mxu0 %v727_v25  ;;  %993 = vmatpush1.bf16.msra.mxu1 %v931_v26  ;;  %v1330_v6 = vld [vmem:[%s9633_s8 + $0x1] sm:$0xff]  ;;  %v1331_v7 = vld [vmem:[%s9633_s8 + $0x9] sm:$0xff]  ;;  %v8328_v11 = vld [vmem:[#allocation8 + $0xec] ss:$0 sps:$4 sm:$0xff]   ;;  %s9230_s2 = smov 4   ;;  %s9231_s14 = smov 104  }
 0x130   : > { %939 = vmatprep.subr.bf16.mxu0 %v8297_v24  ;;  %7922 = vmatprep.subr.bf16.mxu1 %v8298_v27  ;;  %v1333_v10 = vpack.c.bf16 %v1331_v7, %v1330_v6  ;;  %v1332_v14 = vld [vmem:[%s9633_s8 + $0x11] sm:$0x3f]  ;;  %v8332_v16 = vld [vmem:[#allocation8 + $0xfc] ss:$20 sps:$4 sm:$0xff]   ;;  %v1403_v19 = vsel %vm713_vm0, %v8328_v11, 0  ;;  %s9232_s11 = smov 80  }
 0x131   : > { %v8327_v15 = vld [vmem:[#allocation8 + $0xf4] ss:$20 sps:$4 sm:$0xff]   ;;  %v1582_v17 = vld [vmem:[#allocation8 + $0x118] sm:$0xff]  ;;  %v8325_v20 = vld [vmem:[#allocation8 + $0xf0] ss:$20 sps:$4 sm:$0xff]   ;;  %v1334_v21 = vpack.c.bf16 %v1332_v14, %v1332_v14  ;;  %s9233_s25 = smov 112  }
 0x132   : > { %7353 = vmatmul.mubr.msk.bf16.gmra.mrb[4].mxu0 %vm706_vm1, %v656_v28  ;;  %7356 = vmatmul.mubr.msk.bf16.gmra.mrb[4].mxu1 %vm706_vm1, %v656_v28  ;;  %v7425_v22 = vcombine.high %v1582_v17, %v1582_v17  ;;  %v7424_v23 = vcombine.low %v1582_v17, %v1582_v17  ;;  %v8336_v24 = vld [vmem:[#allocation8 + $0x100] ss:$20 sps:$4 sm:$0xff]   ;;  %v8340_v37 = vld [vmem:[#allocation8 + $0x128] ss:$0 sps:$4 sm:$0xff]   ;;  %v8346_v42 = vld [vmem:[#allocation8 + $0x13c] ss:$20 sps:$4 sm:$0xff]  }
 0x133   : > { %7918 = vmatprep.mubr.msk.bf16.mxu0 %vm706_vm1, %v655_v18  ;;  %1022 = vmatprep.mubr.bf16.mxu1 %v9220_v0  ;;  %v1391_v18 = vsel %vm713_vm0, %v7403_v13, 0  ;;  %v1583_v25 = vld [vmem:[#allocation8 + $0x120] sm:$0xff]  ;;  %v7416_v30 = vld [vmem:[%s9633_s8 + $0x19] sm:$0xff]  ;;  %v7439_v54 = vld [vmem:[%s9633_s8 + $0x41] sm:$0x3f]  ;;  %p632_p10 = scmp.lt.s32.totalorder %s9339_s24, 1 }
 0x134   : > { %v1631_v26 = vsel %vm713_vm0, %v7424_v23, 0  ;;  %v7426_v29 = vcombine.low %v1583_v25, %v1583_v25  ;;  %v7417_v31 = vld [vmem:[%s9633_s8 + $0x21] sm:$0xff]  ;;  %v7437_v46 = vld [vmem:[%s9633_s8 + $0x31] sm:$0xff]  ;;  %v1814_v61 = vpack.c.bf16 %v7439_v54, %v7439_v54 }
 0x135   : > { %v8337_v35 = vld [vmem:[#allocation8 + $0x134] ss:$20 sps:$4 sm:$0xff]   ;;  %v8343_v49 = vld [vmem:[#allocation8 + $0x12c] ss:$20 sps:$4 sm:$0xff]   ;;  %s10568_s24 = smov (!%p632_p10, %s9339_s24), 1 }
 0x136   : > { %v2062_v57 = vld [vmem:[#allocation8 + $0x190] sm:$0xff]  ;;  %v2051_v8 = vld [vmem:[%s9633_s8 + $0xa] sm:$0xff]  ;;  %s7337_s26 = sshll.u32 %s10568_s24, 3 }
 0x137   : > { %v7463_v63 = vcombine.low %v2062_v57, %v2062_v57  ;;  %v2050_v7 = vld [vmem:[%s9633_s8 + $0x2] sm:$0xff] }
 0x138   : > { %v2053_v13 = vpack.c.bf16 %v2051_v8, %v2050_v7  ;;  %v8364_v14 = vld [vmem:[#allocation8 + $0x1a0] ss:$0 sps:$4 sm:$0xff]   ;;  %v2302_v23 = vld [vmem:[#allocation8 + $0x1cc] sm:$0xff] }
 0x13a   : > { %7919 = vmatmul.mubr.msk.bf16.vlgmr.msra.gmra.mrb[8].mxu0 %vm706_vm1, %v656_v28  ;;  %7373 = vmatmul.mubr.msk.bf16.vlgmr.msra.gmra.mrb[0].mxu1 %vm706_vm1, %v640_v32  ;;  %v7427_v28 = vcombine.high %v1583_v25, %v1583_v25  ;;  %v2543_v25 = vld [vmem:[#allocation8 + $0x210] sm:$0xff] }
 0x13b   : > { %940 = vmatpush1.bf16.msra.mxu0 %v8295_v33  ;;  %7923 = vmatpush3.bf16.msra.mxu1 %v8298_v27  ;;  %v8330_v27 = vld [vmem:[#allocation8 + $0xf8] ss:$20 sps:$4 sm:$0xff]   ;;  %v1823_v33 = vld [vmem:[#allocation8 + $0x15c] sm:$0xff] }
 0x13c   : > { %7369 = vmatprep.subr.msk.bf16.mxu0 %vm713_vm0, %v7365_v34  ;;  %971 = vmatprep.mubr.bf16.mxu0 %v9220_v0  ;;  %v1637_v34 = vsel %vm713_vm0, %v7426_v29, 0  ;;  %v8385_v29 = vld [vmem:[#allocation8 + $0x218] ss:$0 sps:$4 sm:$0xff]  }
 0x13d   : > { %1032 = vmatprep.mubr.bf16.mxu1 %v9220_v0  ;;  %8111 = vmatprep.subr.msk.bf16.mxu1 %vm713_vm0, %v8304_v36  ;;  %v1573_v36 = vpack.c.bf16 %v7417_v31, %v7416_v30  ;;  %v7484_v30 = vcombine.low %v2302_v23, %v2302_v23 }
 0x13f   : > { %942 = vmatpush1.bf16.msra.mxu0 %v925_v39  ;;  %7925 = vmatpush3.bf16.msra.mxu1 %v937_v40  ;;  %v7418_v39 = vld [vmem:[%s9633_s8 + $0x29] sm:$0x3f]  ;;  %v7448_v40 = vcombine.high %v1823_v33, %v1823_v33 }
 0x140   : > { %1165 = vmatprep.subr.bf16.mxu0 %v8303_v38  ;;  %1216 = vmatprep.subr.bf16.mxu1 %v8308_v41  ;;  %v7447_v38 = vcombine.low %v1823_v33, %v1823_v33  ;;  %v8345_v41 = vld [vmem:[#allocation8 + $0x130] ss:$20 sps:$4 sm:$0xff]  }
 0x141   : > { %v8367_v33 = vld [vmem:[#allocation8 + $0x1a4] ss:$20 sps:$4 sm:$0xff]  }
 0x142   : > { %7370 = vmatmul.mubr.msk.bf16.vlgmr.msra.gmra.mrb[0].mxu0 %vm706_vm1, %v640_v32  ;;  %7374 = vmatmul.mubr.msk.bf16.gmra.mrb[8].mxu1 %vm706_vm1, %v641_v43 }
 0x143   : > { %1166 = vmatpush1.bf16.msra.mxu0 %v8301_v44  ;;  %981 = vmatprep.mubr.bf16.mxu0 %v9220_v0  ;;  %v1877_v44 = vsel %vm713_vm0, %v7447_v38, 0 }
 0x144   : > { %7926 = vmatprep.mubr.msk.bf16.mxu1 %vm706_vm1, %v640_v32  ;;  %7390 = vmatprep.subr.msk.bf16.mxu0 %vm713_vm0, %v7386_v45  ;;  %v8339_v32 = vld [vmem:[#allocation8 + $0x138] ss:$20 sps:$4 sm:$0xff]   ;;  %v1574_v45 = vpack.c.bf16 %v7418_v39, %v7418_v39 }
 0x147   : > { %1168 = vmatpush1.bf16.msra.mxu0 %v1151_v47  ;;  %v7438_v47 = vld [vmem:[%s9633_s8 + $0x39] sm:$0xff] }
 0x148   : > { %7930 = vmatprep.subr.bf16.mxu0 %v8312_v48 }
 0x14a   : > { %7371 = vmatmul.mubr.msk.bf16.gmra.mrb[12].mxu0 %vm706_vm1, %v641_v43  ;;  %7927 = vmatmul.mubr.msk.bf16.vlgmr.msra.gmra.mrb[12].mxu1 %vm706_vm1, %v641_v43  ;;  %v1643_v43 = vsel %vm713_vm0, %v8340_v37, 0 }
 0x14b   : > { %1217 = vmatpush1.bf16.msra.mxu1 %v8306_v50  ;;  %1197 = vmatprep.mubr.bf16.mxu0 %v9220_v0  ;;  %v1813_v50 = vpack.c.bf16 %v7438_v47, %v7437_v46  ;;  %v8384_v47 = vld [vmem:[#allocation8 + $0x1f0] ss:$20 sps:$4 sm:$0xff]  }
 0x14c   : > { %7393 = vmatprep.subr.msk.bf16.mxu1 %vm713_vm0, %v7388_v51  ;;  %1248 = vmatprep.mubr.bf16.mxu1 %v9220_v0  ;;  %v8352_v51 = vld [vmem:[#allocation8 + $0x164] ss:$0 sps:$4 sm:$0xff]  }
 0x14f   : > { %1219 = vmatpush1.bf16.msra.mxu1 %v1157_v55  ;;  %v8351_v55 = vld [vmem:[#allocation8 + $0x16c] ss:$20 sps:$4 sm:$0xff]  }
 0x150   : > { %1456 = vmatprep.subr.bf16.mxu1 %v8315_v56  ;;  %v8356_v56 = vld [vmem:[#allocation8 + $0x174] ss:$20 sps:$4 sm:$0xff]  }
 0x152   : > { %7391 = vmatmul.mubr.msk.bf16.vlgmr.msra.gmra.mrb[0].mxu0 %vm706_vm1, %v1093_v58  ;;  %7394 = vmatmul.mubr.msk.bf16.vlgmr.msra.gmra.mrb[0].mxu1 %vm706_vm1, %v1093_v58 }
 0x153   : > { %7931 = vmatpush3.bf16.msra.mxu0 %v8312_v48  ;;  %1457 = vmatpush1.bf16.msra.mxu1 %v8313_v59  ;;  %v1822_v48 = vld [vmem:[#allocation8 + $0x154] sm:$0xff]  ;;  %v1883_v59 = vsel %vm713_vm0, %v8352_v51, 0 }
 0x154   : > { %1207 = vmatprep.mubr.bf16.mxu0 %v9220_v0  ;;  %1258 = vmatprep.mubr.bf16.mxu1 %v9220_v0  ;;  %v7446_v52 = vcombine.high %v1822_v48, %v1822_v48  ;;  %v7445_v53 = vcombine.low %v1822_v48, %v1822_v48  ;;  %v8378_v48 = vld [vmem:[#allocation8 + $0x1e8] ss:$20 sps:$4 sm:$0xff]  }
 0x155   : > { %8112 = vmatprep.subr.msk.bf16.mxu0 %vm713_vm0, %v8316_v60  ;;  %7411 = vmatprep.subr.msk.bf16.mxu1 %vm713_vm0, %v7406_v62  ;;  %v8349_v60 = vld [vmem:[#allocation8 + $0x168] ss:$20 sps:$4 sm:$0xff]   ;;  %v7464_v62 = vcombine.high %v2062_v57, %v2062_v57 }
 0x157   : > { %7933 = vmatpush3.bf16.msra.mxu0 %v1163_v2  ;;  %1459 = vmatpush1.bf16.msra.mxu1 %v1397_v3  ;;  %v2063_v2 = vld [vmem:[#allocation8 + $0x198] sm:$0xff]  ;;  %v2111_v3 = vsel %vm713_vm0, %v7463_v63, 0 }
 0x158   : > { %1405 = vmatprep.subr.bf16.mxu0 %v8321_v1  ;;  %7938 = vmatprep.subr.bf16.mxu1 %v8322_v4  ;;  %v8360_v1 = vld [vmem:[#allocation8 + $0x178] ss:$20 sps:$4 sm:$0xff]   ;;  %v7465_v6 = vcombine.low %v2063_v2, %v2063_v2 }
 0x15a   : > { %7392 = vmatmul.mubr.msk.bf16.gmra.mrb[16].mxu0 %vm706_vm1, %v1094_v5  ;;  %7395 = vmatmul.mubr.msk.bf16.gmra.mrb[16].mxu1 %vm706_vm1, %v1094_v5 }
 0x15b   : > { %7934 = vmatprep.mubr.msk.bf16.mxu0 %vm706_vm1, %v1093_v58  ;;  %1488 = vmatprep.mubr.bf16.mxu1 %v9220_v0  ;;  %v1871_v58 = vsel %vm713_vm0, %v7445_v53, 0  ;;  %v7499_v53 = vld [vmem:[%s9633_s8 + $0x42] sm:$0x3f] }
 0x15c   : > { %v2534_v54 = vpack.c.bf16 %v7499_v53, %v7499_v53 }
 0x162   : > { %7935 = vmatmul.mubr.msk.bf16.vlgmr.msra.gmra.mrb[20].mxu0 %vm706_vm1, %v1094_v5  ;;  %7412 = vmatmul.mubr.msk.bf16.vlgmr.msra.gmra.mrb[0].mxu1 %vm706_vm1, %v1333_v10  ;;  %v7466_v5 = vcombine.high %v2063_v2, %v2063_v2 }
 0x163   : > { %1406 = vmatpush1.bf16.msra.mxu0 %v8319_v9  ;;  %7939 = vmatpush3.bf16.msra.mxu1 %v8322_v4  ;;  %v8354_v4 = vld [vmem:[#allocation8 + $0x170] ss:$20 sps:$4 sm:$0xff]  }
 0x164   : > { %7408 = vmatprep.subr.msk.bf16.mxu0 %vm713_vm0, %v7404_v12  ;;  %1437 = vmatprep.mubr.bf16.mxu0 %v9220_v0  ;;  %v8363_v9 = vld [vmem:[#allocation8 + $0x1b0] ss:$20 sps:$4 sm:$0xff]   ;;  %v8361_v12 = vld [vmem:[#allocation8 + $0x1ac] ss:$20 sps:$4 sm:$0xff]  }
 0x165   : > { %1498 = vmatprep.mubr.bf16.mxu1 %v9220_v0  ;;  %8113 = vmatprep.subr.msk.bf16.mxu1 %vm713_vm0, %v8328_v11  ;;  %v2117_v11 = vsel %vm713_vm0, %v7465_v6, 0 }
 0x167   : > { %1408 = vmatpush1.bf16.msra.mxu0 %v1391_v18  ;;  %7941 = vmatpush3.bf16.msra.mxu1 %v1403_v19  ;;  %v8369_v18 = vld [vmem:[#allocation8 + $0x1a8] ss:$20 sps:$4 sm:$0xff]  }
 0x168   : > { %1645 = vmatprep.subr.bf16.mxu0 %v8327_v15  ;;  %1696 = vmatprep.subr.bf16.mxu1 %v8332_v16  ;;  %v2052_v16 = vld [vmem:[%s9633_s8 + $0x12] sm:$0x3f] }
 0x169   : > { %v8370_v19 = vld [vmem:[#allocation8 + $0x1b4] ss:$20 sps:$4 sm:$0xff]  }
 0x16a   : > { %7409 = vmatmul.mubr.msk.bf16.vlgmr.msra.gmra.mrb[0].mxu0 %vm706_vm1, %v1333_v10  ;;  %7413 = vmatmul.mubr.msk.bf16.gmra.mrb[20].mxu1 %vm706_vm1, %v1334_v21 }
 0x16b   : > { %1646 = vmatpush1.bf16.msra.mxu0 %v8325_v20  ;;  %1447 = vmatprep.mubr.bf16.mxu0 %v9220_v0  ;;  %v2123_v20 = vsel %vm713_vm0, %v8364_v14, 0 }
 0x16c   : > { %7942 = vmatprep.mubr.msk.bf16.mxu1 %vm706_vm1, %v1333_v10  ;;  %7429 = vmatprep.subr.msk.bf16.mxu0 %vm713_vm0, %v7425_v22  ;;  %v2303_v10 = vld [vmem:[#allocation8 + $0x1d4] sm:$0xff]  ;;  %v2054_v22 = vpack.c.bf16 %v2052_v16, %v2052_v16 }
 0x16d   : > { %v7486_v15 = vcombine.low %v2303_v10, %v2303_v10  ;;  %v7487_v17 = vcombine.high %v2303_v10, %v2303_v10 }
 0x16f   : > { %1648 = vmatpush1.bf16.msra.mxu0 %v1631_v26  ;;  %v7476_v26 = vld [vmem:[%s9633_s8 + $0x1a] sm:$0xff] }
 0x170   : > { %7946 = vmatprep.subr.bf16.mxu0 %v8336_v24 }
 0x172   : > { %7410 = vmatmul.mubr.msk.bf16.gmra.mrb[24].mxu0 %vm706_vm1, %v1334_v21  ;;  %7943 = vmatmul.mubr.msk.bf16.vlgmr.msra.gmra.mrb[24].mxu1 %vm706_vm1, %v1334_v21  ;;  %v2357_v21 = vsel %vm713_vm0, %v7486_v15, 0 }
 0x173   : > { %1697 = vmatpush1.bf16.msra.mxu1 %v8330_v27  ;;  %1677 = vmatprep.mubr.bf16.mxu0 %v9220_v0  ;;  %v7477_v27 = vld [vmem:[%s9633_s8 + $0x22] sm:$0xff] }
 0x174   : > { %7432 = vmatprep.subr.msk.bf16.mxu1 %vm713_vm0, %v7427_v28  ;;  %1728 = vmatprep.mubr.bf16.mxu1 %v9220_v0  ;;  %v8376_v28 = vld [vmem:[#allocation8 + $0x1dc] ss:$0 sps:$4 sm:$0xff]  }
 0x177   : > { %1699 = vmatpush1.bf16.msra.mxu1 %v1637_v34  ;;  %v2293_v34 = vpack.c.bf16 %v7477_v27, %v7476_v26 }
 0x178   : > { %1936 = vmatprep.subr.bf16.mxu1 %v8339_v32  ;;  %v7507_v32 = vcombine.low %v2543_v25, %v2543_v25 }
 0x17a   : > { %7430 = vmatmul.mubr.msk.bf16.vlgmr.msra.gmra.mrb[0].mxu0 %vm706_vm1, %v1573_v36  ;;  %7433 = vmatmul.mubr.msk.bf16.vlgmr.msra.gmra.mrb[0].mxu1 %vm706_vm1, %v1573_v36  ;;  %v2597_v39 = vsel %vm713_vm0, %v7507_v32, 0 }
 0x17b   : > { %7947 = vmatpush3.bf16.msra.mxu0 %v8336_v24  ;;  %1937 = vmatpush1.bf16.msra.mxu1 %v8337_v35  ;;  %v2542_v24 = vld [vmem:[#allocation8 + $0x208] sm:$0xff]  ;;  %v2351_v35 = vsel %vm713_vm0, %v7484_v30, 0 }
 0x17c   : > { %1687 = vmatprep.mubr.bf16.mxu0 %v9220_v0  ;;  %1738 = vmatprep.mubr.bf16.mxu1 %v9220_v0  ;;  %v7505_v31 = vcombine.low %v2542_v24, %v2542_v24  ;;  %v7506_v46 = vcombine.high %v2542_v24, %v2542_v24 }
 0x17d   : > { %8114 = vmatprep.subr.msk.bf16.mxu0 %vm713_vm0, %v8340_v37  ;;  %7453 = vmatprep.subr.msk.bf16.mxu1 %vm713_vm0, %v7448_v40  ;;  %v7485_v37 = vcombine.high %v2302_v23, %v2302_v23  ;;  %v2603_v40 = vsel %vm713_vm0, %v8385_v29, 0 }
 0x17e   : > { %v2591_v38 = vsel %vm713_vm0, %v7505_v31, 0 }
 0x17f   : > { %7949 = vmatpush3.bf16.msra.mxu0 %v1643_v43  ;;  %1939 = vmatpush1.bf16.msra.mxu1 %v1877_v44  ;;  %v8380_v43 = vld [vmem:[#allocation8 + $0x1ec] ss:$20 sps:$4 sm:$0xff]  }
 0x180   : > { %1885 = vmatprep.subr.bf16.mxu0 %v8345_v41  ;;  %7954 = vmatprep.subr.bf16.mxu1 %v8346_v42  ;;  %v7478_v41 = vld [vmem:[%s9633_s8 + $0x2a] sm:$0x3f] }
 0x181   : > { %v8373_v44 = vld [vmem:[#allocation8 + $0x1e0] ss:$20 sps:$4 sm:$0xff]  }
 0x182   : > { %7431 = vmatmul.mubr.msk.bf16.gmra.mrb[28].mxu0 %vm706_vm1, %v1574_v45  ;;  %7434 = vmatmul.mubr.msk.bf16.gmra.mrb[28].mxu1 %vm706_vm1, %v1574_v45 }
 0x183   : > { %7950 = vmatprep.mubr.msk.bf16.mxu0 %vm706_vm1, %v1573_v36  ;;  %1968 = vmatprep.mubr.bf16.mxu1 %v9220_v0  ;;  %v2363_v36 = vsel %vm713_vm0, %v8376_v28, 0 }
 0x18a   : > { %7951 = vmatmul.mubr.msk.bf16.vlgmr.msra.gmra.mrb[32].mxu0 %vm706_vm1, %v1574_v45  ;;  %7454 = vmatmul.mubr.msk.bf16.vlgmr.msra.gmra.mrb[0].mxu1 %vm706_vm1, %v1813_v50  ;;  %v2294_v45 = vpack.c.bf16 %v7478_v41, %v7478_v41 }
 0x18b   : > { %1886 = vmatpush1.bf16.msra.mxu0 %v8343_v49  ;;  %7955 = vmatpush3.bf16.msra.mxu1 %v8346_v42  ;;  %v8375_v42 = vld [vmem:[#allocation8 + $0x1e4] ss:$20 sps:$4 sm:$0xff]   ;;  %v7508_v49 = vcombine.high %v2543_v25, %v2543_v25 }
 0x18c   : > { %7450 = vmatprep.subr.msk.bf16.mxu0 %vm713_vm0, %v7446_v52  ;;  %1917 = vmatprep.mubr.bf16.mxu0 %v9220_v0 }
 0x18d   : > { %1978 = vmatprep.mubr.bf16.mxu1 %v9220_v0  ;;  %8115 = vmatprep.subr.msk.bf16.mxu1 %vm713_vm0, %v8352_v51  ;;  %v7498_v51 = vld [vmem:[%s9633_s8 + $0x3a] sm:$0xff] }
 0x18f   : > { %1888 = vmatpush1.bf16.msra.mxu0 %v1871_v58  ;;  %7957 = vmatpush3.bf16.msra.mxu1 %v1883_v59 }
 0x190   : > { %2125 = vmatprep.subr.bf16.mxu0 %v8351_v55  ;;  %2176 = vmatprep.subr.bf16.mxu1 %v8356_v56 }
 0x192   : > { %7451 = vmatmul.mubr.msk.bf16.vlgmr.msra.gmra.mrb[0].mxu0 %vm706_vm1, %v1813_v50  ;;  %7455 = vmatmul.mubr.msk.bf16.gmra.mrb[32].mxu1 %vm706_vm1, %v1814_v61 }
 0x193   : > { %2126 = vmatpush1.bf16.msra.mxu0 %v8349_v60  ;;  %1927 = vmatprep.mubr.bf16.mxu0 %v9220_v0 }
 0x194   : > { %7958 = vmatprep.mubr.msk.bf16.mxu1 %vm706_vm1, %v1813_v50  ;;  %7468 = vmatprep.subr.msk.bf16.mxu0 %vm713_vm0, %v7464_v62  ;;  %v7497_v50 = vld [vmem:[%s9633_s8 + $0x32] sm:$0xff]  ;;  %s10558_s8 = sld [smem:[#allocation30_spill]] }
 0x195   : > { %v2533_v52 = vpack.c.bf16 %v7498_v51, %v7497_v50 }
 0x197   : > { %2128 = vmatpush1.bf16.msra.mxu0 %v2111_v3 }
 0x198   : > { %7962 = vmatprep.subr.bf16.mxu0 %v8360_v1 }
 0x19a   : > { %7452 = vmatmul.mubr.msk.bf16.gmra.mrb[36].mxu0 %vm706_vm1, %v1814_v61  ;;  %7959 = vmatmul.mubr.msk.bf16.vlgmr.msra.gmra.mrb[36].mxu1 %vm706_vm1, %v1814_v61 }
 0x19b   : > { %2177 = vmatpush1.bf16.msra.mxu1 %v8354_v4  ;;  %2157 = vmatprep.mubr.bf16.mxu0 %v9220_v0 }
 0x19c   : > { %7471 = vmatprep.subr.msk.bf16.mxu1 %vm713_vm0, %v7466_v5  ;;  %2208 = vmatprep.mubr.bf16.mxu1 %v9220_v0 }
 0x19f   : > { %2179 = vmatpush1.bf16.msra.mxu1 %v2117_v11 }
 0x1a0   : > { %2416 = vmatprep.subr.bf16.mxu1 %v8363_v9 }
 0x1a2   : > { %7469 = vmatmul.mubr.msk.bf16.vlgmr.msra.gmra.mrb[0].mxu0 %vm706_vm1, %v2053_v13  ;;  %7472 = vmatmul.mubr.msk.bf16.vlgmr.msra.gmra.mrb[0].mxu1 %vm706_vm1, %v2053_v13 }
 0x1a3   : > { %7963 = vmatpush3.bf16.msra.mxu0 %v8360_v1  ;;  %2417 = vmatpush1.bf16.msra.mxu1 %v8361_v12 }
 0x1a4   : > { %2167 = vmatprep.mubr.bf16.mxu0 %v9220_v0  ;;  %2218 = vmatprep.mubr.bf16.mxu1 %v9220_v0 }
 0x1a5   : > { %8116 = vmatprep.subr.msk.bf16.mxu0 %vm713_vm0, %v8364_v14  ;;  %7492 = vmatprep.subr.msk.bf16.mxu1 %vm713_vm0, %v7487_v17 }
 0x1a7   : > { %7965 = vmatpush3.bf16.msra.mxu0 %v2123_v20  ;;  %2419 = vmatpush1.bf16.msra.mxu1 %v2357_v21 }
 0x1a8   : > { %2365 = vmatprep.subr.bf16.mxu0 %v8369_v18  ;;  %7970 = vmatprep.subr.bf16.mxu1 %v8370_v19 }
 0x1aa   : > { %7470 = vmatmul.mubr.msk.bf16.gmra.mrb[40].mxu0 %vm706_vm1, %v2054_v22  ;;  %7473 = vmatmul.mubr.msk.bf16.gmra.mrb[40].mxu1 %vm706_vm1, %v2054_v22 }
 0x1ab   : > { %7966 = vmatprep.mubr.msk.bf16.mxu0 %vm706_vm1, %v2053_v13  ;;  %2448 = vmatprep.mubr.bf16.mxu1 %v9220_v0 }
 0x1b2   : > { %7967 = vmatmul.mubr.msk.bf16.vlgmr.msra.gmra.mrb[44].mxu0 %vm706_vm1, %v2054_v22  ;;  %7493 = vmatmul.mubr.msk.bf16.vlgmr.msra.gmra.mrb[0].mxu1 %vm706_vm1, %v2293_v34 }
 0x1b3   : > { %2366 = vmatpush1.bf16.msra.mxu0 %v8367_v33  ;;  %7971 = vmatpush3.bf16.msra.mxu1 %v8370_v19 }
 0x1b4   : > { %7489 = vmatprep.subr.msk.bf16.mxu0 %vm713_vm0, %v7485_v37  ;;  %2397 = vmatprep.mubr.bf16.mxu0 %v9220_v0 }
 0x1b5   : > { %2458 = vmatprep.mubr.bf16.mxu1 %v9220_v0  ;;  %8117 = vmatprep.subr.msk.bf16.mxu1 %vm713_vm0, %v8376_v28 }
 0x1b7   : > { %2368 = vmatpush1.bf16.msra.mxu0 %v2351_v35  ;;  %7973 = vmatpush3.bf16.msra.mxu1 %v2363_v36 }
 0x1b8   : > { %2605 = vmatprep.subr.bf16.mxu0 %v8375_v42  ;;  %2656 = vmatprep.subr.bf16.mxu1 %v8380_v43 }
 0x1ba   : > { %7490 = vmatmul.mubr.msk.bf16.vlgmr.msra.gmra.mrb[0].mxu0 %vm706_vm1, %v2293_v34  ;;  %7494 = vmatmul.mubr.msk.bf16.gmra.mrb[44].mxu1 %vm706_vm1, %v2294_v45 }
 0x1bb   : > { %2606 = vmatpush1.bf16.msra.mxu0 %v8373_v44  ;;  %2407 = vmatprep.mubr.bf16.mxu0 %v9220_v0 }
 0x1bc   : > { %7974 = vmatprep.mubr.msk.bf16.mxu1 %vm706_vm1, %v2293_v34  ;;  %7510 = vmatprep.subr.msk.bf16.mxu0 %vm713_vm0, %v7506_v46 }
 0x1bf   : > { %2608 = vmatpush1.bf16.msra.mxu0 %v2591_v38 }
 0x1c0   : > { %7978 = vmatprep.subr.bf16.mxu0 %v8384_v47 }
 0x1c2   : > { %7491 = vmatmul.mubr.msk.bf16.gmra.mrb[48].mxu0 %vm706_vm1, %v2294_v45  ;;  %7975 = vmatmul.mubr.msk.bf16.vlgmr.msra.gmra.mrb[48].mxu1 %vm706_vm1, %v2294_v45 }
 0x1c3   : > { %2657 = vmatpush1.bf16.msra.mxu1 %v8378_v48  ;;  %2637 = vmatprep.mubr.bf16.mxu0 %v9220_v0 }
 0x1c4   : > { %7513 = vmatprep.subr.msk.bf16.mxu1 %vm713_vm0, %v7508_v49  ;;  %2688 = vmatprep.mubr.bf16.mxu1 %v9220_v0 }
 0x1c7   : > { %2659 = vmatpush1.bf16.msra.mxu1 %v2597_v39 }
 0x1ca   : > { %7511 = vmatmul.mubr.msk.bf16.vlgmr.msra.gmra.mrb[0].mxu0 %vm706_vm1, %v2533_v52  ;;  %7514 = vmatmul.mubr.msk.bf16.vlgmr.msra.gmra.mrb[0].mxu1 %vm706_vm1, %v2533_v52 }
 0x1cb   : > { %7979 = vmatpush3.bf16.msra.mxu0 %v8384_v47  ;;  %2647 = vmatprep.mubr.bf16.mxu0 %v9220_v0 }
 0x1cc   : > { %2698 = vmatprep.mubr.bf16.mxu1 %v9220_v0  ;;  %8118 = vmatprep.subr.msk.bf16.mxu0 %vm713_vm0, %v8385_v29 }
 0x1cf   : > { %7981 = vmatpush3.bf16.msra.mxu0 %v2603_v40 }
 0x1d2   : > { %7512 = vmatmul.mubr.msk.bf16.gmra.mrb[52].mxu0 %vm706_vm1, %v2534_v54  ;;  %7515 = vmatmul.mubr.msk.bf16.gmra.mrb[52].mxu1 %vm706_vm1, %v2534_v54 }
 0x1d3   : > { %7982 = vmatprep.mubr.msk.bf16.mxu0 %vm706_vm1, %v2533_v52 }
 0x1da   : > { %7983 = vmatmul.mubr.msk.bf16.vlgmr.msra.gmra.mrb[56].mxu0 %vm706_vm1, %v2534_v54 }
 0x205   : > { %v773_v55 = vpop.f32.mrb[4].mxu0  ;;  %v824_v56 = vpop.f32.mrb[4].mxu1 }
 0x206   : > { %v775_v57 = vpop.f32.mrb[5].mxu0  ;;  %v826_v58 = vpop.f32.mrb[5].mxu1 }
 0x207   : > { %v777_v59 = vpop.f32.mrb[6].mxu0  ;;  %v828_v60 = vpop.f32.mrb[6].mxu1 }
 0x208   : > { %v778_v61 = vpop.f32.mrb[7].mxu0  ;;  %v829_v62 = vpop.f32.mrb[7].mxu1 }
 0x20d   : > { %v7920_v63 = vpop.f32.mrb[8].mxu0 }
 0x20e   : > { %v865_v1 = vpop.f32.mrb[9].mxu0 }
 0x20f   : > { %v7921_v2 = vpop.f32.mrb[10].mxu0 }
 0x210   : > { %v868_v3 = vpop.f32.mrb[11].mxu0 }
 0x215   : > { %v1034_v4 = vpop.f32.mrb[8].mxu1 }
 0x216   : > { %v1035_v5 = vadd.f32 %v1034_v4, %v824_v56  ;;  %v1036_v6 = vpop.f32.mrb[9].mxu1 }
 0x217   : > { %v1037_v7 = vadd.f32 %v1036_v6, %v826_v58  ;;  %v1038_v8 = vpop.f32.mrb[10].mxu1 }
 0x218   : > { %v1039_v9 = vpop.f32.mrb[11].mxu1 }
 0x21d   : > { %v983_v10 = vpop.f32.mrb[12].mxu0  ;;  %v7928_v11 = vpop.f32.mrb[12].mxu1 }
 0x21e   : > { %v984_v12 = vadd.f32 %v983_v10, %v773_v55  ;;  %v1084_v13 = vadd.f32 %v7928_v11, %v7920_v63  ;;  %v985_v14 = vpop.f32.mrb[13].mxu0  ;;  %v1075_v15 = vpop.f32.mrb[13].mxu1 }
 0x21f   : > { %v986_v16 = vadd.f32 %v985_v14, %v775_v57  ;;  %v1076_v17 = vadd.f32 %v1075_v15, %v865_v1  ;;  %v987_v18 = vpop.f32.mrb[14].mxu0  ;;  %v7929_v19 = vpop.f32.mrb[14].mxu1 }
 0x220   : > { %v988_v20 = vpop.f32.mrb[15].mxu0  ;;  %v1078_v21 = vpop.f32.mrb[15].mxu1 }
 0x221   : > { %v1079_v22 = vadd.f32 %v1078_v21, %v868_v3 }
 0x22d   : > { %v1209_v23 = vpop.f32.mrb[16].mxu0  ;;  %v1260_v24 = vpop.f32.mrb[16].mxu1 }
 0x22e   : > { %v1325_v25 = vadd.f32 %v1209_v23, %v984_v12  ;;  %v1327_v26 = vadd.f32 %v1260_v24, %v1035_v5  ;;  %v1211_v27 = vpop.f32.mrb[17].mxu0  ;;  %v1262_v28 = vpop.f32.mrb[17].mxu1 }
 0x22f   : > { %v1326_v29 = vadd.f32 %v1211_v27, %v986_v16  ;;  %v1328_v30 = vadd.f32 %v1262_v28, %v1037_v7  ;;  %v1213_v31 = vpop.f32.mrb[18].mxu0  ;;  %v1264_v32 = vpop.f32.mrb[18].mxu1 }
 0x230   : > { %v1214_v33 = vpop.f32.mrb[19].mxu0  ;;  %v1265_v34 = vpop.f32.mrb[19].mxu1 }
 0x235   : > { %v7936_v35 = vpop.f32.mrb[20].mxu0 }
 0x236   : > { %v1329_v36 = vadd.f32 %v7936_v35, %v1084_v13  ;;  %v1301_v37 = vpop.f32.mrb[21].mxu0 }
 0x237   : > { %v1319_v38 = vadd.f32 %v1301_v37, %v1076_v17  ;;  %v7937_v39 = vpop.f32.mrb[22].mxu0 }
 0x238   : > { %v1304_v40 = vpop.f32.mrb[23].mxu0 }
 0x239   : > { %v1324_v41 = vadd.f32 %v1304_v40, %v1079_v22 }
 0x23d   : > { %v1500_v42 = vpop.f32.mrb[20].mxu1 }
 0x23e   : > { %v1567_v43 = vadd.f32 %v1500_v42, %v1327_v26  ;;  %v1502_v44 = vpop.f32.mrb[21].mxu1 }
 0x23f   : > { %v1568_v45 = vadd.f32 %v1502_v44, %v1328_v30  ;;  %v1504_v46 = vpop.f32.mrb[22].mxu1 }
 0x240   : > { %v1505_v47 = vpop.f32.mrb[23].mxu1 }
 0x245   : > { %v1449_v48 = vpop.f32.mrb[24].mxu0  ;;  %v7944_v49 = vpop.f32.mrb[24].mxu1 }
 0x246   : > { %v1565_v50 = vadd.f32 %v1449_v48, %v1325_v25  ;;  %v1569_v51 = vadd.f32 %v7944_v49, %v1329_v36  ;;  %v1451_v52 = vpop.f32.mrb[25].mxu0  ;;  %v1541_v53 = vpop.f32.mrb[25].mxu1 }
 0x247   : > { %v1566_v54 = vadd.f32 %v1451_v52, %v1326_v29  ;;  %v1559_v55 = vadd.f32 %v1541_v53, %v1319_v38  ;;  %v1453_v56 = vpop.f32.mrb[26].mxu0  ;;  %v7945_v57 = vpop.f32.mrb[26].mxu1 }
 0x248   : > { %v1454_v58 = vpop.f32.mrb[27].mxu0  ;;  %v1544_v59 = vpop.f32.mrb[27].mxu1  ;;  %v2772_v56 = vlaneseq }
 0x249   : > { %v1564_v60 = vadd.f32 %v1544_v59, %v1324_v41 }
 0x255   : > { %v1689_v61 = vpop.f32.mrb[28].mxu0  ;;  %v1740_v62 = vpop.f32.mrb[28].mxu1 }
 0x256   : > { %v1805_v63 = vadd.f32 %v1689_v61, %v1565_v50  ;;  %v1807_v1 = vadd.f32 %v1740_v62, %v1567_v43  ;;  %v1691_v2 = vpop.f32.mrb[29].mxu0  ;;  %v1742_v3 = vpop.f32.mrb[29].mxu1  ;;  %v9835_v62 = vshrl.u32 %v2772_v56, 7 }
 0x257   : > { %v1806_v4 = vadd.f32 %v1691_v2, %v1566_v54  ;;  %v1808_v5 = vadd.f32 %v1742_v3, %v1568_v45  ;;  %v1693_v6 = vpop.f32.mrb[30].mxu0  ;;  %v1744_v7 = vpop.f32.mrb[30].mxu1 }
 0x258   : > { %v1694_v8 = vpop.f32.mrb[31].mxu0  ;;  %v1745_v9 = vpop.f32.mrb[31].mxu1  ;;  %v9838_v2 = vsub.s32 0, %v9835_v62  ;;  %v9845_v7 = vsub.s32 2, %v9835_v62 }
 0x259   : > { %v9848_v8 = vsub.s32 1, %v9835_v62 }
 0x25d   : > { %v7952_v10 = vpop.f32.mrb[32].mxu0 }
 0x25e   : > { %v1809_v11 = vadd.f32 %v7952_v10, %v1569_v51  ;;  %v1781_v12 = vpop.f32.mrb[33].mxu0 }
 0x25f   : > { %v1799_v13 = vadd.f32 %v1781_v12, %v1559_v55  ;;  %v7953_v14 = vpop.f32.mrb[34].mxu0 }
 0x260   : > { %v1784_v15 = vpop.f32.mrb[35].mxu0  ;;  %v9221_v14 = vmov 1966171168  }
 0x261   : > { %v1804_v16 = vadd.f32 %v1784_v15, %v1564_v60  ;;  %v2927_v15 = vunpack.c.l.s4 %v9221_v14 }
 0x265   : > { %v1980_v17 = vpop.f32.mrb[32].mxu1 }
 0x266   : > { %v2047_v18 = vadd.f32 %v1980_v17, %v1807_v1  ;;  %v1982_v19 = vpop.f32.mrb[33].mxu1 }
 0x267   : > { %v2048_v20 = vadd.f32 %v1982_v19, %v1808_v5  ;;  %v1984_v21 = vpop.f32.mrb[34].mxu1 }
 0x268   : > { %v1985_v22 = vpop.f32.mrb[35].mxu1 }
 0x26d   : > { %v1929_v23 = vpop.f32.mrb[36].mxu0  ;;  %v7960_v24 = vpop.f32.mrb[36].mxu1 }
 0x26e   : > { %v2045_v25 = vadd.f32 %v1929_v23, %v1805_v63  ;;  %v2049_v26 = vadd.f32 %v7960_v24, %v1809_v11  ;;  %v1931_v27 = vpop.f32.mrb[37].mxu0  ;;  %v2021_v28 = vpop.f32.mrb[37].mxu1  ;;  %v2928_v23 = vunpack.c.0.s8 %v2927_v15 }
 0x26f   : > { %v2046_v29 = vadd.f32 %v1931_v27, %v1806_v4  ;;  %v2039_v30 = vadd.f32 %v2021_v28, %v1799_v13  ;;  %v1933_v31 = vpop.f32.mrb[38].mxu0  ;;  %v7961_v32 = vpop.f32.mrb[38].mxu1  ;;  %v9857_v13 = vld [vmem:[%s10555_s18] sm:$0x1f] }
 0x270   : > { %v1934_v33 = vpop.f32.mrb[39].mxu0  ;;  %v2024_v34 = vpop.f32.mrb[39].mxu1  ;;  %v9868_v21 = vrot.slane %v9857_v13, %v9838_v2  ;;  %v9872_v22 = vrot.slane %v9857_v13, %v9845_v7  ;;  %v9876_v24 = vrot.slane %v9857_v13, %v9848_v8 }
 0x271   : > { %v2044_v35 = vadd.f32 %v2024_v34, %v1804_v16  ;;  %v9860_v16 = vsub.s32 3, %v9835_v62 }
 0x27d   : > { %v2169_v36 = vpop.f32.mrb[40].mxu0  ;;  %v2220_v37 = vpop.f32.mrb[40].mxu1 }
 0x27e   : > { %v2285_v38 = vadd.f32 %v2169_v36, %v2045_v25  ;;  %v2287_v39 = vadd.f32 %v2220_v37, %v2047_v18  ;;  %v2171_v40 = vpop.f32.mrb[41].mxu0  ;;  %v2222_v41 = vpop.f32.mrb[41].mxu1  ;;  %v9880_v25 = vrot.slane %v9857_v13, %v9860_v16  ;;  %v9901_v36 = vsub.s32 %v2928_v23, %v9835_v62 }
 0x27f   : > { %v2286_v42 = vadd.f32 %v2171_v40, %v2046_v29  ;;  %v2288_v43 = vadd.f32 %v2222_v41, %v2048_v20  ;;  %v2173_v44 = vpop.f32.mrb[42].mxu0  ;;  %v2224_v45 = vpop.f32.mrb[42].mxu1  ;;  %v9864_v20 = vld [vmem:[#allocation10] sm:$0x1f] }
 0x280   : > { %v2174_v46 = vpop.f32.mrb[43].mxu0  ;;  %v2225_v47 = vpop.f32.mrb[43].mxu1  ;;  %v9888_v27 = vrot.slane %v9864_v20, %v9845_v7  ;;  %v9896_v31 = vrot.slane %v9864_v20, %v9860_v16 }
 0x285   : > { %v7968_v48 = vpop.f32.mrb[44].mxu0 }
 0x286   : > { %v2289_v49 = vadd.f32 %v7968_v48, %v2049_v26  ;;  %v2261_v50 = vpop.f32.mrb[45].mxu0  ;;  %v9884_v26 = vrot.slane %v9864_v20, %v9838_v2 }
 0x287   : > { %v2279_v51 = vadd.f32 %v2261_v50, %v2039_v30  ;;  %v7969_v52 = vpop.f32.mrb[46].mxu0  ;;  %v9892_v30 = vrot.slane %v9864_v20, %v9848_v8 }
 0x288   : > { %v2264_v53 = vpop.f32.mrb[47].mxu0 }
 0x289   : > { %v2284_v54 = vadd.f32 %v2264_v53, %v2044_v35 }
 0x28d   : > { %v2460_v55 = vpop.f32.mrb[44].mxu1 }
 0x28e   : > { %v9830_v57 = vadd.f32 %v2460_v55, %v2287_v39  ;;  %v2462_v58 = vpop.f32.mrb[45].mxu1 }
 0x28f   : > { %v9832_v59 = vadd.f32 %v2462_v58, %v2288_v43  ;;  %v2464_v60 = vpop.f32.mrb[46].mxu1 }
 0x290   : > { %v2465_v61 = vpop.f32.mrb[47].mxu1 }
 0x295   : > { %v2409_v63 = vpop.f32.mrb[48].mxu0  ;;  %v7976_v1 = vpop.f32.mrb[48].mxu1 }
 0x296   : > { %v9840_v3 = vadd.f32 %v2409_v63, %v2285_v38  ;;  %v9842_v4 = vadd.f32 %v7976_v1, %v2289_v49  ;;  %v2411_v5 = vpop.f32.mrb[49].mxu0  ;;  %v2501_v6 = vpop.f32.mrb[49].mxu1 }
 0x297   : > { %v9850_v9 = vadd.f32 %v2411_v5, %v2286_v42  ;;  %v9852_v10 = vadd.f32 %v2501_v6, %v2279_v51  ;;  %v2413_v11 = vpop.f32.mrb[50].mxu0  ;;  %v7977_v12 = vpop.f32.mrb[50].mxu1 }
 0x298   : > { %v2414_v17 = vpop.f32.mrb[51].mxu0  ;;  %v2504_v18 = vpop.f32.mrb[51].mxu1 }
 0x299   : > { %v9862_v19 = vadd.f32 %v2504_v18, %v2284_v54 }
 0x29d   : > { %v2639_v28 = vpop.f32.mrb[0].mxu0  ;;  %v2690_v29 = vpop.f32.mrb[0].mxu1 }
 0x29e   : > { %v2797_v32 = vadd.f32 %v9868_v21, %v2639_v28  ;;  %v2799_v33 = vadd.f32 %v9872_v22, %v2690_v29  ;;  %v2641_v34 = vpop.f32.mrb[1].mxu0  ;;  %v2692_v35 = vpop.f32.mrb[1].mxu1 }
 0x29f   : > { %v2798_v37 = vadd.f32 %v9876_v24, %v2641_v34  ;;  %v2800_v38 = vadd.f32 %v9880_v25, %v2692_v35  ;;  %v2643_v39 = vpop.f32.mrb[2].mxu0  ;;  %v2694_v40 = vpop.f32.mrb[2].mxu1 }
 0x2a0   : > { %vm2812_vm2 = vcmp.ge.f32.partialorder %v2797_v32, 0.0  ;;  %v2854_v41 = vmul.f32 %v9884_v26, %v2797_v32  ;;  %vm2814_vm3 = vcmp.ge.f32.partialorder %v2799_v33, 0.0  ;;  %v2856_v42 = vmul.f32 %v9888_v27, %v2799_v33  ;;  %v2645_v43 = vpop.f32.mrb[3].mxu0  ;;  %v2696_v44 = vpop.f32.mrb[3].mxu1 }
 0x2a1   : > { %vm2813_vm4 = vcmp.ge.f32.partialorder %v2798_v37, 0.0  ;;  %v2855_v45 = vmul.f32 %v9892_v30, %v2798_v37  ;;  %vm2815_vm5 = vcmp.ge.f32.partialorder %v2800_v38, 0.0  ;;  %v2857_v46 = vmul.f32 %v9896_v31, %v2800_v38 }
 0x2a2   : > { %v2869_v47 = vsel %vm2812_vm2, %v2797_v32, %v2854_v41  ;;  %v2871_v48 = vsel %vm2814_vm3, %v2799_v33, %v2856_v42  ;;  %v2802_v49 = vadd.f32 %v9868_v21, %v2643_v39  ;;  %v2804_v50 = vadd.f32 %v9872_v22, %v2694_v40 }
 0x2a3   : > { %v2889_v51 = vrot.slane %v2869_v47, 1  ;;  %v2904_v52 = vrot.slane %v2869_v47, 2  ;;  %v2891_v53 = vrot.slane %v2871_v48, 1  ;;  %v2906_v54 = vrot.slane %v2871_v48, 2 }
 0x2a4   : > { %v2870_v55 = vsel %vm2813_vm4, %v2798_v37, %v2855_v45  ;;  %v2872_v58 = vsel %vm2815_vm5, %v2800_v38, %v2857_v46  ;;  %vm2817_vm6 = vcmp.ge.f32.partialorder %v2802_v49, 0.0  ;;  %v2859_v60 = vmul.f32 %v9884_v26, %v2802_v49 }
 0x2a5   : > { %v2899_v61 = vmax.f32 %v2869_v47, %v2889_v51  ;;  %v2901_v63 = vmax.f32 %v2871_v48, %v2891_v53  ;;  %v2890_v1 = vrot.slane %v2870_v55, 1  ;;  %v2905_v5 = vrot.slane %v2870_v55, 2  ;;  %v2649_v6 = vpop.f32.mrb[52].mxu0  ;;  %v2700_v11 = vpop.f32.mrb[52].mxu1 }
 0x2a6   : > { %v2892_v12 = vrot.slane %v2872_v58, 1  ;;  %v2907_v14 = vrot.slane %v2872_v58, 2  ;;  %v2874_v15 = vsel %vm2817_vm6, %v2802_v49, %v2859_v60  ;;  %vm2819_vm7 = vcmp.ge.f32.partialorder %v2804_v50, 0.0  ;;  %v2651_v17 = vpop.f32.mrb[53].mxu0  ;;  %v9912_v18 = vpop.f32.mrb[53].mxu1 }
 0x2a7   : > { %v2914_v23 = vmax.f32 %v2899_v61, %v2904_v52  ;;  %v2916_v28 = vmax.f32 %v2901_v63, %v2906_v54  ;;  %v2900_v29 = vmax.f32 %v2870_v55, %v2890_v1  ;;  %v3024_v32 = vrot.slane %v2874_v15, 2  ;;  %v2653_v33 = vpop.f32.mrb[54].mxu0  ;;  %v2704_v34 = vpop.f32.mrb[54].mxu1 }
 0x2a8   : > { %v2902_v35 = vmax.f32 %v2872_v58, %v2892_v12  ;;  %v3088_v37 = vrot.slane %v2874_v15, 1  ;;  %v2861_v38 = vmul.f32 %v9888_v27, %v2804_v50  ;;  %v2803_v39 = vadd.f32 %v9876_v24, %v2645_v43  ;;  %v2654_v40 = vpop.f32.mrb[55].mxu0  ;;  %v2705_v41 = vpop.f32.mrb[55].mxu1 }
 0x2a9   : > { %v2915_v42 = vmax.f32 %v2900_v29, %v2905_v5  ;;  %v3034_v45 = vmax.f32 %v2899_v61, %v3024_v32  ;;  %v2805_v46 = vadd.f32 %v9880_v25, %v2696_v44  ;;  %v2765_v47 = vadd.f32 %v2649_v6, %v9840_v3 }
 0x2aa   : > { %v2917_v48 = vmax.f32 %v2902_v35, %v2907_v14  ;;  %v3098_v49 = vmax.f32 %v2874_v15, %v3088_v37  ;;  %v2876_v51 = vsel %vm2819_vm7, %v2804_v50, %v2861_v38  ;;  %vm2818_vm8 = vcmp.ge.f32.partialorder %v2803_v39, 0.0 }
 0x2ab   : > { %v2924_v52 = vcombine.low %v2914_v23, %v2915_v42  ;;  %v2975_v53 = vcombine.high %v2914_v23, %v2915_v42  ;;  %v3026_v54 = vrot.slane %v2876_v51, 2  ;;  %v3090_v55 = vrot.slane %v2876_v51, 1 }
 0x2ac   : > { %v2925_v58 = vcombine.low %v2916_v28, %v2917_v48  ;;  %v2976_v60 = vcombine.high %v2916_v28, %v2917_v48  ;;  %v2860_v43 = vmul.f32 %v9892_v30, %v2803_v39  ;;  %vm2820_vm9 = vcmp.ge.f32.partialorder %v2805_v46, 0.0 }
 0x2ad   : > { %v9921_v1 = vrot.slane %v2924_v52, %v9901_v36  ;;  %v9924_v44 = vrot.slane %v2975_v53, %v9901_v36  ;;  %v3036_v3 = vmax.f32 %v2901_v63, %v3026_v54  ;;  %v3100_v61 = vmax.f32 %v2876_v51, %v3090_v55  ;;  %v9926_v5 = vpop.f32.mrb[56].mxu0 }
 0x2ae   : > { %v9929_v50 = vrot.slane %v2925_v58, %v9901_v36  ;;  %v9932_v6 = vrot.slane %v2976_v60, %v9901_v36  ;;  %v2875_v12 = vsel %vm2818_vm8, %v2803_v39, %v2860_v43  ;;  %v9934_v14 = vpop.f32.mrb[57].mxu0  ;;  %v3103_v15 = vmax.f32 %v3098_v49, %v3024_v32 }
 0x2af   : > { %v3025_v23 = vrot.slane %v2875_v12, 2  ;;  %v3089_v28 = vrot.slane %v2875_v12, 1  ;;  %v2862_v33 = vmul.f32 %v9896_v31, %v2805_v46  ;;  %v7985_v34 = vpop.f32.mrb[58].mxu0  ;;  %v2807_v38 = vadd.f32 %v9868_v21, %v2765_v47 }
 0x2b0   : > { %v2947_v63 = vcombine.low %v9921_v1, %v9929_v50  ;;  %v2999_v37 = vcombine.low %v9924_v44, %v9932_v6  ;;  %v2767_v40 = vadd.f32 %v2700_v11, %v9830_v57  ;;  %v2744_v39 = vpop.f32.mrb[59].mxu0  ;;  %v2766_v32 = vadd.f32 %v2651_v17, %v9850_v9 }
 0x2b1   : > { %v3035_v41 = vmax.f32 %v2900_v29, %v3025_v23  ;;  %v3099_v42 = vmax.f32 %v2875_v12, %v3089_v28  ;;  %v2877_v48 = vsel %vm2820_vm9, %v2805_v46, %v2862_v33  ;;  %v3105_v51 = vmax.f32 %v3100_v61, %v3026_v54 }
 0x2b2   : > { %v3027_v52 = vrot.slane %v2877_v48, 2  ;;  %v3091_v53 = vrot.slane %v2877_v48, 1  ;;  %v2790_v55 = vsub.s32 4, %v9835_v62  ;;  %vm2822_vm10 = vcmp.ge.f32.partialorder %v2807_v38, 0.0 }
 0x2b3   : > { %v3044_v58 = vcombine.high %v3034_v45, %v3035_v41  ;;  %v3104_v60 = vmax.f32 %v3099_v42, %v3025_v23  ;;  %v2864_v43 = vmul.f32 %v9884_v26, %v2807_v38  ;;  %v2809_v57 = vadd.f32 %v9872_v22, %v2767_v40 }
 0x2b4   : > { %v3037_v34 = vmax.f32 %v2902_v35, %v3027_v52  ;;  %v9946_v21 = vmax.f32 %v2877_v48, %v3091_v53  ;;  %v2808_v11 = vadd.f32 %v9876_v24, %v2766_v32  ;;  %v2791_v53 = vrot.slane %v9857_v13, %v2790_v55 }
 0x2b5   : > { %v9951_v29 = vrot.slane %v3044_v58, %v9901_v36  ;;  %v3113_v9 = vcombine.low %v3103_v15, %v3104_v60  ;;  %v3161_v17 = vcombine.high %v3103_v15, %v3104_v60  ;;  %v2879_v46 = vsel %vm2822_vm10, %v2807_v38, %v2864_v43 }
 0x2b6   : > { %v3045_v47 = vcombine.high %v3036_v3, %v3037_v34  ;;  %v3106_v62 = vmax.f32 %v9946_v21, %v3027_v52  ;;  %v3210_v45 = vrot.slane %v2879_v46, 2  ;;  %v3274_v54 = vrot.slane %v2879_v46, 1 }
 0x2b7   : > { %v9955_v26 = vrot.slane %v3113_v9, %v9901_v36  ;;  %v9958_v35 = vrot.slane %v3161_v17, %v9901_v36  ;;  %vm2824_vm11 = vcmp.ge.f32.partialorder %v2809_v57, 0.0  ;;  %v2866_v22 = vmul.f32 %v9888_v27, %v2809_v57 }
 0x2b8   : > { %v9962_v24 = vrot.slane %v3045_v47, %v9901_v36  ;;  %v3114_v12 = vcombine.low %v3105_v51, %v3106_v62  ;;  %v3162_v15 = vcombine.high %v3105_v51, %v3106_v62  ;;  %v3220_v23 = vmax.f32 %v3098_v49, %v3210_v45 }
 0x2b9   : > { %v2881_v3 = vsel %vm2824_vm11, %v2809_v57, %v2866_v22  ;;  %vm2823_vm12 = vcmp.ge.f32.partialorder %v2808_v11, 0.0  ;;  %v2865_v28 = vmul.f32 %v9892_v30, %v2808_v11  ;;  %v3284_v41 = vmax.f32 %v2879_v46, %v3274_v54 }
 0x2ba   : > { %v3068_v33 = vcombine.low %v9951_v29, %v9962_v24  ;;  %v9968_v38 = vrot.slane %v3114_v12, %v9901_v36  ;;  %v9971_v40 = vrot.slane %v3162_v15, %v9901_v36  ;;  %v3212_v27 = vrot.slane %v2881_v3, 2 }
 0x2bb   : > { %v3276_v48 = vrot.slane %v2881_v3, 1  ;;  %v2880_v32 = vsel %vm2823_vm12, %v2808_v11, %v2865_v28  ;;  %v2768_v49 = vadd.f32 %v9912_v18, %v9832_v59  ;;  %v2769_v57 = vadd.f32 %v9926_v5, %v9842_v4 }
 0x2bc   : > { %v3136_v51 = vcombine.low %v9955_v26, %v9968_v38  ;;  %v3185_v30 = vcombine.low %v9958_v35, %v9971_v40  ;;  %v3222_v52 = vmax.f32 %v3100_v61, %v3212_v27  ;;  %v3211_v58 = vrot.slane %v2880_v32, 2 }
 0x2bd   : > { %v3275_v60 = vrot.slane %v2880_v32, 1  ;;  %v2810_v43 = vadd.f32 %v9880_v25, %v2768_v49  ;;  %v3286_v34 = vmax.f32 %v2881_v3, %v3276_v48  ;;  %v2848_v11 = vrot.slane %v9864_v20, %v2790_v55 }
 0x2be   : > { %v2759_v59 = vadd.f32 %v9934_v14, %v9852_v10  ;;  %v3289_v18 = vmax.f32 %v3284_v41, %v3210_v45  ;;  %v3221_v9 = vmax.f32 %v3099_v42, %v3211_v58  ;;  %v2811_v13 = vadd.f32 %v2791_v53, %v2769_v57 }
 0x2bf   : > { %v3285_v17 = vmax.f32 %v2880_v32, %v3275_v60  ;;  %vm2825_vm13 = vcmp.ge.f32.partialorder %v2810_v43, 0.0  ;;  %v2867_v61 = vmul.f32 %v9896_v31, %v2810_v43  ;;  %v2764_v47 = vadd.f32 %v2744_v39, %v9862_v19 }
 0x2c0   : > { %v2801_v46 = vadd.f32 %v2791_v53, %v2759_v59  ;;  %v9992_v4 = vrot.slane %v2947_v63, %v9901_v36  ;;  %v3230_v20 = vcombine.high %v3220_v23, %v3221_v9  ;;  %v3291_v10 = vmax.f32 %v3286_v34, %v3212_v27 }
 0x2c1   : > { %v3290_v25 = vmax.f32 %v3285_v17, %v3211_v58  ;;  %v3352_v5 = vcombine.high %v3284_v41, %v3285_v17  ;;  %v2882_v14 = vsel %vm2825_vm13, %v2810_v43, %v2867_v61  ;;  %vm2826_vm14 = vcmp.ge.f32.partialorder %v2811_v13, 0.0 }
 0x2c2   : > { %v2868_v42 = vmul.f32 %v2848_v11, %v2811_v13  ;;  %v9995_v55 = vrot.slane %v3230_v20, %v9901_v36  ;;  %v3213_v62 = vrot.slane %v2882_v14, 2  ;;  %vm2816_vm15 = vcmp.ge.f32.partialorder %v2801_v46, 0.0 }
 0x2c3   : > { %v3299_v31 = vcombine.low %v3289_v18, %v3290_v25  ;;  %v3277_v19 = vrot.slane %v2882_v14, 1  ;;  %v2858_v45 = vmul.f32 %v2848_v11, %v2801_v46  ;;  %v2806_v54 = vadd.f32 %v2791_v53, %v2764_v47 }
 0x2c4   : > { %v2883_v39 = vsel %vm2826_vm14, %v2811_v13, %v2868_v42  ;;  %v3361_v50 = vrot.slane %v3352_v5, %v9901_v36  ;;  %v3223_v63 = vmax.f32 %v9946_v21, %v3213_v62  ;;  %vm10001_vm2 = vcmp.lt.s32.totalorder %v2772_v56, 616 }
 0x2c5   : > { %v3307_v1 = vrot.slane %v3299_v31, %v9901_v36  ;;  %v3278_v22 = vrot.slane %v2883_v39, 1  ;;  %v3287_v12 = vmax.f32 %v2882_v14, %v3277_v19  ;;  %v2873_v15 = vsel %vm2816_vm15, %v2801_v46, %v2858_v45 }
 0x2c6   : > { %vm2821_vm0 = vcmp.ge.f32.partialorder %v2806_v54, 0.0  ;;  %v2863_v23 = vmul.f32 %v2848_v11, %v2806_v54  ;;  %v3231_v28 = vcombine.high %v3222_v52, %v3223_v63  ;;  %v3214_v27 = vrot.slane %v2883_v39, 2 }
 0x2c7   : > { %v3288_v41 = vmax.f32 %v2883_v39, %v3278_v22  ;;  %v2893_v48 = vrot.slane %v2873_v15, 1  ;;  %v3292_v32 = vmax.f32 %v3287_v12, %v3213_v62  ;;  %v3353_v49 = vcombine.high %v3286_v34, %v3287_v12 }
 0x2c8   : > { %v2908_v53 = vrot.slane %v2873_v15, 2  ;;  %v2878_v58 = vsel %vm2821_vm0, %v2806_v54, %v2863_v23  ;;  %v10006_v21 = vrot.slane %v3231_v28, %v9901_v36  ;;  %v3006_v25 = vrot.slane %v2999_v37, %v9901_v36 }
 0x2c9   : > { %v3293_v60 = vmax.f32 %v3288_v41, %v3214_v27  ;;  %v3354_v43 = vcombine.high %v3288_v41, %v3288_v41  ;;  %v2903_v57 = vmax.f32 %v2873_v15, %v2893_v48  ;;  %v3300_v11 = vcombine.low %v3291_v10, %v3292_v32 }
 0x2ca   : > { %v3368_v59 = vrot.slane %v3353_v49, %v9901_v36  ;;  %v3028_v18 = vrot.slane %v2878_v58, 2  ;;  %v3092_v9 = vrot.slane %v2878_v58, 1  ;;  %v3254_v52 = vcombine.low %v9995_v55, %v10006_v21 }
 0x2cb   : > { %v3321_v17 = vrot.slane %v3293_v60, %v9901_v36  ;;  %v3375_v34 = vrot.slane %v3354_v43, %v9901_v36  ;;  %v2918_v61 = vmax.f32 %v2903_v57, %v2908_v53  ;;  %v3314_v13 = vrot.slane %v3300_v11, %v9901_v36 }
 0x2cc   : > { %v3376_v46 = vcombine.low %v3361_v50, %v3368_v59  ;;  %v3038_v47 = vmax.f32 %v2903_v57, %v3028_v18  ;;  %v3102_v20 = vmax.f32 %v2878_v58, %v3092_v9  ;;  %v3075_v19 = vrot.slane %v3068_v33, %v9901_v36 }
 0x2cd   : > { %v3336_v5 = vrot.slane %v3321_v17, %v9901_v36  ;;  %v3390_v10 = vrot.slane %v3375_v34, %v9901_v36  ;;  %v2946_v14 = vrot.slane %v2918_v61, %v9901_v36  ;;  %v3322_v42 = vcombine.low %v3307_v1, %v3314_v13 }
 0x2ce   : > { %v3383_v55 = vrot.slane %v3376_v46, %v9901_v36  ;;  %v2977_v31 = vcombine.high %v2918_v61, %v2918_v61  ;;  %v3046_v62 = vcombine.high %v3038_v47, %v3038_v47  ;;  %v3107_v44 = vmax.f32 %v3102_v20, %v3028_v18 }
 0x2cf   : > { %v2961_v39 = vrot.slane %v2946_v14, %v9901_v36  ;;  %v3224_v6 = vmax.f32 %v3102_v20, %v3214_v27  ;;  %v3329_v37 = vrot.slane %v3322_v42, %v9901_v36  ;;  %v3192_v26 = vrot.slane %v3185_v30, %v9901_v36 }
 0x2d0   : > { %v3391_v45 = vcombine.low %v3383_v55, %v3390_v10  ;;  %v2998_v54 = vrot.slane %v2977_v31, %v9901_v36  ;;  %v3067_v1 = vrot.slane %v3046_v62, %v9901_v36  ;;  %v3135_v22 = vrot.slane %v3107_v44, %v9901_v36 }
 0x2d1   : > { %v2962_v50 = vcombine.low %v9992_v4, %v2961_v39  ;;  %v2970_v63 = vcombine.high %v9992_v4, %v2961_v39  ;;  %v3163_v12 = vcombine.high %v3107_v44, %v3107_v44  ;;  %v3337_v29 = vcombine.low %v3329_v37, %v3336_v5 }
 0x2d2   : > { %v3342_v24 = vcombine.high %v3329_v37, %v3336_v5  ;;  %3394 = vst.msk [vmem:[#allocation2 + $0x2a] ss:$8 sm:$0xf] %vm10001_vm2, %v3391_v45  ;;  %3395 = vst.msk [vmem:[#allocation2 + $0x2a] ss:$8 sm:$0x10] %vm10001_vm2, %v3391_v45  ;;  %v3013_v33 = vrot.slane %v2998_v54, %v9901_v36  ;;  %v3082_v15 = vrot.slane %v3067_v1, %v9901_v36 }
 0x2d3   : > { %v3143_v4 = vrot.slane %v3136_v51, %v9901_v36  ;;  %2968 = vst.msk [vmem:[#allocation2] ss:$8 sm:$0xf] %vm10001_vm2, %v2962_v50  ;;  %2969 = vst.msk [vmem:[#allocation2] ss:$8 sm:$0x10] %vm10001_vm2, %v2962_v50  ;;  %v3150_v23 = vrot.slane %v3135_v22, %v9901_v36  ;;  %v3184_v28 = vrot.slane %v3163_v12, %v9901_v36 }
 0x2d4   : > { %2973 = vst.msk [vmem:[#allocation2 + $0x1] ss:$8 sm:$0xf] %vm10001_vm2, %v2970_v63  ;;  %2974 = vst.msk [vmem:[#allocation2 + $0x1] ss:$8 sm:$0x10] %vm10001_vm2, %v2970_v63  ;;  %v3232_v27 = vcombine.high %v3224_v6, %v3224_v6  ;;  %v3014_v38 = vcombine.low %v3006_v25, %v3013_v33  ;;  %v3083_v51 = vcombine.high %v3075_v19, %v3082_v15 }
 0x2d5   : > { %3340 = vst.msk [vmem:[#allocation2 + $0x28] ss:$8 sm:$0xf] %vm10001_vm2, %v3337_v29  ;;  %3341 = vst.msk [vmem:[#allocation2 + $0x28] ss:$8 sm:$0x10] %vm10001_vm2, %v3337_v29  ;;  %v3151_v41 = vcombine.low %v3143_v4, %v3150_v23  ;;  %v3156_v48 = vcombine.high %v3143_v4, %v3150_v23  ;;  %v3199_v32 = vrot.slane %v3184_v28, %v9901_v36 }
 0x2d6   : > { %3345 = vst.msk [vmem:[#allocation2 + $0x29] ss:$8 sm:$0xf] %vm10001_vm2, %v3342_v24  ;;  %3346 = vst.msk [vmem:[#allocation2 + $0x29] ss:$8 sm:$0x10] %vm10001_vm2, %v3342_v24  ;;  %v3253_v35 = vrot.slane %v3232_v27, %v9901_v36  ;;  %v3261_v40 = vrot.slane %v3254_v52, %v9901_v36 }
 0x2d7   : > { %3017 = vst.msk [vmem:[#allocation2 + $0x2] ss:$8 sm:$0xf] %vm10001_vm2, %v3014_v38  ;;  %3018 = vst.msk [vmem:[#allocation2 + $0x2] ss:$8 sm:$0x10] %vm10001_vm2, %v3014_v38  ;;  %v3200_v30 = vcombine.low %v3192_v26, %v3199_v32 }
 0x2d8   : > { %3086 = vst.msk [vmem:[#allocation2 + $0x3] ss:$8 sm:$0xf] %vm10001_vm2, %v3083_v51  ;;  %3087 = vst.msk [vmem:[#allocation2 + $0x3] ss:$8 sm:$0x10] %vm10001_vm2, %v3083_v51  ;;  %v3268_v49 = vrot.slane %v3253_v35, %v9901_v36 }
 0x2d9   : > { %3154 = vst.msk [vmem:[#allocation2 + $0x4] ss:$8 sm:$0xf] %vm10001_vm2, %v3151_v41  ;;  %3155 = vst.msk [vmem:[#allocation2 + $0x4] ss:$8 sm:$0x10] %vm10001_vm2, %v3151_v41 }
 0x2da   : > { %3159 = vst.msk [vmem:[#allocation2 + $0x5] ss:$8 sm:$0xf] %vm10001_vm2, %v3156_v48  ;;  %3160 = vst.msk [vmem:[#allocation2 + $0x5] ss:$8 sm:$0x10] %vm10001_vm2, %v3156_v48  ;;  %v3269_v53 = vcombine.high %v3261_v40, %v3268_v49 }
 0x2db   : > { %3203 = vst.msk [vmem:[#allocation2 + $0x6] ss:$8 sm:$0xf] %vm10001_vm2, %v3200_v30  ;;  %3204 = vst.msk [vmem:[#allocation2 + $0x6] ss:$8 sm:$0x10] %vm10001_vm2, %v3200_v30 }
 0x2dc   : > { %3272 = vst.msk [vmem:[#allocation2 + $0x7] ss:$8 sm:$0xf] %vm10001_vm2, %v3269_v53  ;;  %3273 = vst.msk [vmem:[#allocation2 + $0x7] ss:$8 sm:$0x10] %vm10001_vm2, %v3269_v53 }
 0x2dd   : > { %v10093_v58 = vld [vmem:[#allocation2 + $0x38] sm:$0x7]  ;;  %v10095_v21 = vld [vmem:[#allocation2 + $0x30] sm:$0x7]  ;;  %v10101_v43 = vld [vmem:[#allocation2 + $0x28] sm:$0x7] }
 0x2de   : > { %3632 = vrot.lane.b32.xlu0 %v10093_v58, %s9222_s27  ;;  %3553 = vrot.lane.b32.xlu1 %v10095_v21, %s9222_s27  ;;  %v3544_v60 = vld [vmem:[#allocation2 + $0x38] sm:$0x7]  ;;  %v10108_v57 = vld [vmem:[#allocation2 + $0x40] sm:$0x7]  ;;  %v10128_v9 = vld [vmem:[#allocation2 + $0x30] sm:$0x7] }
 0x2df   : > { %v10106_v3 = vld [vmem:[#allocation2 + $0x38] sm:$0x7]  ;;  %v3623_v11 = vld [vmem:[#allocation2 + $0x40] sm:$0x7]  ;;  %v3433_v34 = vld [vmem:[#allocation2 + $0x30] sm:$0x7] }
 0x2e0   : > { %v10138_v52 = vld [vmem:[#allocation2 + $0x40] sm:$0x7]  ;;  %v10162_v13 = vld [vmem:[#allocation2 + $0x30] sm:$0x7]  ;;  %v3707_v46 = vld [vmem:[#allocation2 + $0x48] sm:$0x7] }
 0x2e1   : > { %v10175_v47 = vld [vmem:[#allocation2 + $0x48] sm:$0x7]  ;;  %vm3557_vm3 = vcmask 818176   ;;  %vm3444_vm4 = vcmask 588800   ;;  %v8388_v30 = vld [vmem:[#allocation11 + $0x274] ss:$16 sps:$4 sm:$0xff]  }
 0x2e2   : > { %3555 = vrot.lane.b32.xlu1 %v3544_v60, %s9222_s27  ;;  %3440 = vrot.lane.b32.xlu0 %v10101_v43, %s9223_s21  ;;  %v10203_v25 = vld [vmem:[#allocation2 + $0x48] sm:$0x7]  ;;  %v8389_v49 = vld [vmem:[#allocation11 + $0x278] ss:$16 sps:$4 sm:$0xff]   ;;  %vm3418_vm5 = vcmask 223232   ;;  %vm3416_vm6 = vcmask 228352  }
 0x2e3   : > { %v10114_v59 = vld [vmem:[#allocation2 + $0x8] sm:$0xff]  ;;  %v10119_v18 = vld [vmem:[#allocation2 + $0x10] sm:$0xff]  ;;  %v10140_v17 = vld [vmem:[#allocation2] sm:$0xff]  ;;  %4417 = vmatprep.subr.bf16.mxu1 %v8388_v30  ;;  %vm3461_vm7 = vcmask 452832   ;;  %vm3507_vm8 = vcmask 682432   ;;  %vm3539_vm9 = vcmask 912032  }
 0x2e4   : > { %v10152_v61 = vld [vmem:[#allocation2 + $0x18] sm:$0xff]  ;;  %v10189_v20 = vld [vmem:[#allocation2 + $0x20] sm:$0xff]  ;;  %v10209_v5 = vld [vmem:[#allocation2 + $0x28] sm:$0x7]  ;;  %vm3584_vm10 = vcmask 1043328   ;;  %vm3586_vm11 = vcmask 92160  }
 0x2e5   : > { %v8386_v40 = vld [vmem:[#allocation11 + $0x270] ss:$16 sps:$4 sm:$0xff]   ;;  %vm3618_vm12 = vcmask 321632   ;;  %vm3660_vm13 = vcmask 551232   ;;  %vm3692_vm14 = vcmask 780832   ;;  %vm3459_vm15 = vcmask 457952  }
 0x2e6   : > { %3594 = vrot.lane.b32.xlu1 %v10106_v3, %s9222_s27  ;;  %3714 = vrot.lane.b32.xlu0 %v10108_v57, %s9223_s21  ;;  %v3465_v53 = vld [vmem:[#allocation2 + $0x28] sm:$0x7]  ;;  %vm3734_vm0 = vcmask 1010432   ;;  %vm3505_vm2 = vcmask 687552  }
 0x2e7   : > { %4418 = vmatpush1.bf16.msra.mxu1 %v8386_v40 }
 0x2ea   : > { %3634 = vrot.lane.b32.xlu1 %v3623_v11, %s9222_s27  ;;  %3549 = vrot.lane.b32.xlu0 %v10114_v59, %s9222_s27 }
 0x2ee   : > { %3566 = vrot.lane.b32.xlu1 %v3544_v60, %s9223_s21  ;;  %3551 = vrot.lane.b32.xlu0 %v10119_v18, %s9222_s27  ;;  %v8391_v60 = vld [vmem:[#allocation11 + $0x27c] ss:$16 sps:$4 sm:$0xff]  }
 0x2ef   : > { %4503 = vmatprep.subr.bf16.mxu0 %v8391_v60  ;;  %v8412_v60 = vld [vmem:[#allocation11 + $0x2f4] ss:$16 sps:$4 sm:$0xff]  }
 0x2f0   : > { %4504 = vmatpush1.bf16.msra.mxu0 %v8389_v49 }
 0x2f2   : > { %3426 = vrot.lane.b32.xlu1 %v10101_v43, %s9222_s27  ;;  %3592 = vrot.lane.b32.xlu0 %v10119_v18, %s9222_s27 }
 0x2f6   : > { %3471 = vrot.lane.b32.xlu1 %v10128_v9, %s9222_s27  ;;  %3628 = vrot.lane.b32.xlu0 %v10119_v18, %s9222_s27 }
 0x2fa   : > { %3602 = vrot.lane.b32.xlu1 %v10106_v3, %s9223_s21  ;;  %3564 = vrot.lane.b32.xlu0 %v10119_v18, %s9223_s21 }
 0x2fe   : > { %3668 = vrot.lane.b32.xlu1 %v10138_v52, %s9222_s27  ;;  %3424 = vrot.lane.b32.xlu0 %v10140_v17, %s9222_s27 }
 0x302   : > { %3442 = vrot.lane.b32.xlu1 %v3433_v34, %s9223_s21  ;;  %3469 = vrot.lane.b32.xlu0 %v10114_v59, %s9222_s27 }
 0x306   : > { %3644 = vrot.lane.b32.xlu1 %v3623_v11, %s9223_s21  ;;  %3600 = vrot.lane.b32.xlu0 %v10119_v18, %s9223_s21 }
 0x30a   : > { %3700 = vrot.lane.b32.xlu1 %v10108_v57, %s9222_s27  ;;  %3666 = vrot.lane.b32.xlu0 %v10152_v61, %s9222_s27 }
 0x30e   : > { %3481 = vrot.lane.b32.xlu1 %v10128_v9, %s9223_s21  ;;  %3436 = vrot.lane.b32.xlu0 %v10140_v17, %s9223_s21 }
 0x312   : > { %3515 = vrot.lane.b32.xlu1 %v10162_v13, %s9222_s27  ;;  %3642 = vrot.lane.b32.xlu0 %v10152_v61, %s9223_s21 }
 0x316   : > { %3676 = vrot.lane.b32.xlu1 %v10138_v52, %s9223_s21  ;;  %3698 = vrot.lane.b32.xlu0 %v10152_v61, %s9222_s27 }
 0x31a   : > { %3716 = vrot.lane.b32.xlu1 %v3707_v46, %s9223_s21  ;;  %3479 = vrot.lane.b32.xlu0 %v10114_v59, %s9223_s21 }
 0x31e   : > { %3744 = vrot.lane.b32.xlu1 %v10175_v47, %s9222_s27  ;;  %3513 = vrot.lane.b32.xlu0 %v10114_v59, %s9222_s27 }
 0x322   : > { %3523 = vrot.lane.b32.xlu1 %v10162_v13, %s9223_s21  ;;  %3674 = vrot.lane.b32.xlu0 %v10152_v61, %s9223_s21 }
 0x326   : > { %3630 = vrot.lane.b32.xlu1 %v10152_v61, %s9222_s27  ;;  %3710 = vrot.lane.b32.xlu0 %v10152_v61, %s9223_s21 }
 0x32a   : > { %3438 = vrot.lane.b32.xlu1 %v10114_v59, %s9223_s21  ;;  %3742 = vrot.lane.b32.xlu0 %v10189_v20, %s9222_s27 }
 0x32e   : > { %3712 = vrot.lane.b32.xlu1 %v10189_v20, %s9223_s21  ;;  %3521 = vrot.lane.b32.xlu0 %v10114_v59, %s9223_s21 }
 0x332   : > { %3754 = vrot.lane.b32.xlu1 %v10175_v47, %s9223_s21  ;;  %3752 = vrot.lane.b32.xlu0 %v10189_v20, %s9223_s21 }
 0x336   : > { %3794 = vrot.lane.b32.xlu1 %v10203_v25, %s9222_s27  ;;  %3792 = vrot.lane.b32.xlu0 %v10189_v20, %s9222_s27 }
 0x33a   : > { %3402 = vrot.lane.b32.xlu1 %v10209_v5, %s9222_s27  ;;  %3400 = vrot.lane.b32.xlu0 %v10140_v17, %s9222_s27 }
 0x33e   : > { %3410 = vrot.lane.b32.xlu1 %v10209_v5, %s9223_s21  ;;  %3408 = vrot.lane.b32.xlu0 %v10140_v17, %s9223_s21 }
 0x350   : > { %v10219_v10 = vpop.permute.xlu0 %3632  ;;  %v3554_v14 = vpop.permute.xlu1 %3553 }
 0x354   : > { %v3556_v42 = vpop.permute.xlu1 %3555  ;;  %v3441_v55 = vpop.permute.xlu0 %3440 }
 0x355   : > { %v10222_v31 = vsel %vm3557_vm3, %v3554_v14, %v3556_v42  ;;  %v8392_v42 = vld [vmem:[#allocation11 + $0x290] ss:$16 sps:$4 sm:$0xff]  }
 0x358   : > { %v3595_v62 = vpop.permute.xlu1 %3594  ;;  %v10224_v19 = vpop.permute.xlu0 %3714 }
 0x359   : > { %v3599_v22 = vmax.f32 %v10106_v3, %v3595_v62  ;;  %v8395_v62 = vld [vmem:[#allocation11 + $0x298] ss:$16 sps:$4 sm:$0xff]  }
 0x35c   : > { %v10226_v39 = vpop.permute.xlu1 %3634  ;;  %v3550_v44 = vpop.permute.xlu0 %3549 }
 0x360   : > { %v10228_v6 = vpop.permute.xlu1 %3566  ;;  %v3552_v37 = vpop.permute.xlu0 %3551 }
 0x361   : > { %v3558_v45 = vsel %vm3557_vm3, %v3550_v44, %v3552_v37  ;;  %v8397_v37 = vld [vmem:[#allocation11 + $0x29c] ss:$16 sps:$4 sm:$0xff]  }
 0x362   : > { %v3562_v12 = vmax.f32 %v10114_v59, %v3558_v45  ;;  %4505 = vmatprep.subr.bf16.mxu0 %v8397_v37  ;;  %v3563_v37 = vmax.f32 %v10095_v21, %v10222_v31  ;;  %v8433_v31 = vld [vmem:[#allocation11 + $0x35c] ss:$16 sps:$4 sm:$0xff]  }
 0x363   : > { %4506 = vmatpush1.bf16.msra.mxu0 %v8395_v62  ;;  %v8421_v62 = vld [vmem:[#allocation11 + $0x31c] ss:$16 sps:$4 sm:$0xff]  }
 0x364   : > { %v3427_v54 = vpop.permute.xlu1 %3426  ;;  %v3593_v1 = vpop.permute.xlu0 %3592 }
 0x365   : > { %v3431_v28 = vmax.f32 %v10101_v43, %v3427_v54  ;;  %v3598_v44 = vmax.f32 %v10119_v18, %v3593_v1 }
 0x368   : > { %v3472_v50 = vpop.permute.xlu1 %3471  ;;  %v10231_v63 = vpop.permute.xlu0 %3628 }
 0x369   : > { %v3477_v43 = vmax.f32 %v3465_v53, %v3472_v50  ;;  %v3478_v3 = vmax.f32 %v10128_v9, %v3472_v50  ;;  %v8400_v9 = vld [vmem:[#allocation11 + $0x2b4] ss:$16 sps:$4 sm:$0xff]   ;;  %v8403_v50 = vld [vmem:[#allocation11 + $0x2bc] ss:$16 sps:$4 sm:$0xff]   ;;  %v8410_v53 = vld [vmem:[#allocation11 + $0x2f0] ss:$16 sps:$4 sm:$0xff]  }
 0x36a   : > { %4507 = vmatprep.subr.bf16.mxu0 %v8403_v50  ;;  %v8422_v50 = vld [vmem:[#allocation11 + $0x330] ss:$16 sps:$4 sm:$0xff]  }
 0x36c   : > { %v3603_v29 = vpop.permute.xlu1 %3602  ;;  %v3565_v24 = vpop.permute.xlu0 %3564 }
 0x36d   : > { %v3607_v33 = vmax.f32 %v3599_v22, %v3603_v29  ;;  %v10235_v15 = vmax.f32 %v3562_v12, %v3565_v24  ;;  %v8398_v12 = vld [vmem:[#allocation11 + $0x2b0] ss:$16 sps:$4 sm:$0xff]   ;;  %v8401_v29 = vld [vmem:[#allocation11 + $0x2b8] ss:$16 sps:$4 sm:$0xff]  }
 0x36e   : > { %4508 = vmatpush1.bf16.msra.mxu0 %v8401_v29  ;;  %v3571_v29 = vmax.f32 %v3563_v37, %v10228_v6 }
 0x36f   : > { %3612 = vrot.lane.b32.xlu1 %v3607_v33, %s9224_s17 }
 0x370   : > { %v3669_v4 = vpop.permute.xlu1 %3668  ;;  %v10238_v23 = vpop.permute.xlu0 %3424 }
 0x371   : > { %v3673_v1 = vmax.f32 %v10138_v52, %v3669_v4 }
 0x374   : > { %v3443_v27 = vpop.permute.xlu1 %3442  ;;  %v10241_v26 = vpop.permute.xlu0 %3469 }
 0x375   : > { %v3446_v38 = vsel %vm3444_vm4, %v3441_v55, %v3443_v27  ;;  %v8394_v55 = vld [vmem:[#allocation11 + $0x294] ss:$16 sps:$4 sm:$0xff]   ;;  %v8404_v27 = vld [vmem:[#allocation11 + $0x2d0] ss:$16 sps:$4 sm:$0xff]  }
 0x376   : > { %v3450_v51 = vmax.f32 %v3431_v28, %v3446_v38  ;;  %4419 = vmatprep.subr.bf16.mxu1 %v8394_v55  ;;  %v8406_v38 = vld [vmem:[#allocation11 + $0x2d4] ss:$16 sps:$4 sm:$0xff]   ;;  %v8419_v55 = vld [vmem:[#allocation11 + $0x318] ss:$16 sps:$4 sm:$0xff]  }
 0x377   : > { %4420 = vmatpush1.bf16.msra.mxu1 %v8392_v42 }
 0x378   : > { %v10244_v41 = vpop.permute.xlu1 %3644  ;;  %3455 = vrot.lane.b32.xlu1 %v3450_v51, %s9222_s27  ;;  %v3601_v48 = vpop.permute.xlu0 %3600  ;;  %4421 = vmatprep.subr.bf16.mxu1 %v8400_v9  ;;  %v8407_v51 = vld [vmem:[#allocation11 + $0x2d8] ss:$16 sps:$4 sm:$0xff]  }
 0x379   : > { %v3606_v22 = vmax.f32 %v3598_v44, %v3601_v48  ;;  %v8409_v48 = vld [vmem:[#allocation11 + $0x2dc] ss:$16 sps:$4 sm:$0xff]  }
 0x37a   : > { %4509 = vmatprep.subr.bf16.mxu0 %v8409_v48  ;;  %v3476_v48 = vmax.f32 %v10114_v59, %v10241_v26 }
 0x37b   : > { %4422 = vmatpush1.bf16.msra.mxu1 %v8398_v12  ;;  %4510 = vmatpush1.bf16.msra.mxu0 %v8407_v51  ;;  %v8425_v12 = vld [vmem:[#allocation11 + $0x338] ss:$16 sps:$4 sm:$0xff]  }
 0x37c   : > { %v3701_v32 = vpop.permute.xlu1 %3700  ;;  %v10247_v35 = vpop.permute.xlu0 %3666  ;;  %4423 = vmatprep.subr.bf16.mxu1 %v8406_v38 }
 0x37d   : > { %v3705_v40 = vmax.f32 %v10108_v57, %v3701_v32  ;;  %v8415_v32 = vld [vmem:[#allocation11 + $0x2fc] ss:$16 sps:$4 sm:$0xff]  }
 0x37e   : > { %4511 = vmatprep.subr.bf16.mxu0 %v8415_v32 }
 0x37f   : > { %4424 = vmatpush1.bf16.msra.mxu1 %v8404_v27  ;;  %v8428_v27 = vld [vmem:[#allocation11 + $0x350] ss:$16 sps:$4 sm:$0xff]  }
 0x380   : > { %v3482_v11 = vpop.permute.xlu1 %3481  ;;  %v10250_v34 = vpop.permute.xlu0 %3436  ;;  %4425 = vmatprep.subr.bf16.mxu1 %v8412_v60 }
 0x381   : > { %v3487_v46 = vmax.f32 %v3477_v43, %v3482_v11  ;;  %v3488_v14 = vmax.f32 %v3478_v3, %v3482_v11  ;;  %v8413_v43 = vld [vmem:[#allocation11 + $0x2f8] ss:$16 sps:$4 sm:$0xff]   ;;  %v8416_v11 = vld [vmem:[#allocation11 + $0x310] ss:$16 sps:$4 sm:$0xff]  }
 0x382   : > { %4512 = vmatpush1.bf16.msra.mxu0 %v8413_v43  ;;  %v3738_v43 = vld [vmem:[#allocation2 + $0x40] sm:$0x7] }
 0x383   : > { %3499 = vrot.lane.b32.xlu1 %v3488_v14, %s9223_s21  ;;  %3497 = vrot.lane.b32.xlu0 %v3487_v46, %s9223_s21  ;;  %v8418_v46 = vld [vmem:[#allocation11 + $0x314] ss:$16 sps:$4 sm:$0xff]  }
 0x384   : > { %v3516_v45 = vpop.permute.xlu1 %3515  ;;  %v10255_v54 = vpop.permute.xlu0 %3642  ;;  %4426 = vmatpush1.bf16.msra.mxu1 %v8410_v53  ;;  %4513 = vmatprep.subr.bf16.mxu0 %v8421_v62  ;;  %v8437_v53 = vld [vmem:[#allocation11 + $0x378] ss:$16 sps:$4 sm:$0xff]  }
 0x385   : > { %4427 = vmatprep.subr.bf16.mxu1 %v8418_v46 }
 0x386   : > { %4514 = vmatpush1.bf16.msra.mxu0 %v8419_v55  ;;  %v8445_v55 = vld [vmem:[#allocation11 + $0x39c] ss:$16 sps:$4 sm:$0xff]  }
 0x387   : > { %3610 = vrot.lane.b32.xlu0 %v3606_v22, %s9224_s17  ;;  %v8424_v22 = vld [vmem:[#allocation11 + $0x334] ss:$16 sps:$4 sm:$0xff]  }
 0x388   : > { %v3677_v24 = vpop.permute.xlu1 %3676  ;;  %v10259_v33 = vpop.permute.xlu0 %3698  ;;  %4428 = vmatpush1.bf16.msra.mxu1 %v8416_v11 }
 0x389   : > { %v3681_v28 = vmax.f32 %v3673_v1, %v3677_v24  ;;  %v8427_v1 = vld [vmem:[#allocation11 + $0x33c] ss:$16 sps:$4 sm:$0xff]   ;;  %4429 = vmatprep.subr.bf16.mxu1 %v8424_v22  ;;  %v8430_v24 = vld [vmem:[#allocation11 + $0x354] ss:$16 sps:$4 sm:$0xff]  }
 0x38a   : > { %4515 = vmatprep.subr.bf16.mxu0 %v8427_v1  ;;  %v8449_v1 = vld [vmem:[#allocation11 + $0x3b8] ss:$16 sps:$4 sm:$0xff]  }
 0x38b   : > { %3686 = vrot.lane.b32.xlu1 %v3681_v28, %s9225_s5  ;;  %4516 = vmatpush1.bf16.msra.mxu0 %v8425_v12  ;;  %v8448_v12 = vld [vmem:[#allocation11 + $0x3b4] ss:$16 sps:$4 sm:$0xff]  }
 0x38c   : > { %v3717_v30 = vpop.permute.xlu1 %3716  ;;  %v10263_v52 = vpop.permute.xlu0 %3479  ;;  %4430 = vmatpush1.bf16.msra.mxu1 %v8422_v50  ;;  %4517 = vmatprep.subr.bf16.mxu0 %v8433_v31  ;;  %v8454_v31 = vld [vmem:[#allocation11 + $0x3d4] ss:$16 sps:$4 sm:$0xff]  }
 0x38d   : > { %v3719_v4 = vsel %vm3444_vm4, %v10224_v19, %v3717_v30  ;;  %v3520_v19 = vmax.f32 %v10162_v13, %v3516_v45  ;;  %v3637_v13 = vsel %vm3557_vm3, %v10219_v10, %v10226_v39  ;;  %v3430_v10 = vmax.f32 %v10140_v17, %v10238_v23  ;;  %4431 = vmatprep.subr.bf16.mxu1 %v8430_v24  ;;  %v8436_v23 = vld [vmem:[#allocation11 + $0x374] ss:$16 sps:$4 sm:$0xff]  }
 0x38e   : > { %v3723_v49 = vmax.f32 %v3705_v40, %v3719_v4  ;;  %v3641_v21 = vmax.f32 %v10093_v58, %v3637_v13  ;;  %v8431_v58 = vld [vmem:[#allocation11 + $0x358] ss:$16 sps:$4 sm:$0xff]   ;;  %v3475_v40 = vmax.f32 %v10140_v17, %v10241_v26  ;;  %v8442_v26 = vld [vmem:[#allocation11 + $0x394] ss:$16 sps:$4 sm:$0xff]   ;;  %v3704_v13 = vmax.f32 %v10152_v61, %v10259_v33 }
 0x38f   : > { %4518 = vmatpush1.bf16.msra.mxu0 %v8431_v58  ;;  %v8460_v58 = vld [vmem:[#allocation11 + $0x3f4] ss:$16 sps:$4 sm:$0xff]  }
 0x390   : > { %v10267_v3 = vpop.permute.xlu1 %3744  ;;  %3728 = vrot.lane.b32.xlu1 %v3723_v49, %s9226_s16  ;;  %v10270_v57 = vpop.permute.xlu0 %3513  ;;  %v3649_v6 = vmax.f32 %v3641_v21, %v10244_v41  ;;  %4432 = vmatpush1.bf16.msra.mxu1 %v8428_v27  ;;  %v8434_v41 = vld [vmem:[#allocation11 + $0x370] ss:$16 sps:$4 sm:$0xff]   ;;  %v3486_v49 = vmax.f32 %v3476_v48, %v10263_v52  ;;  %v3485_v60 = vmax.f32 %v3475_v40, %v10263_v52  ;;  %v8443_v52 = vld [vmem:[#allocation11 + $0x398] ss:$16 sps:$4 sm:$0xff]   ;;  %v8457_v27 = vld [vmem:[#allocation11 + $0x3dc] ss:$16 sps:$4 sm:$0xff]  }
 0x391   : > { %4433 = vmatprep.subr.bf16.mxu1 %v8436_v23  ;;  %v3750_v32 = vmax.f32 %v3738_v43, %v10267_v3  ;;  %v3751_v37 = vmax.f32 %v10175_v47, %v10267_v3  ;;  %v8451_v47 = vld [vmem:[#allocation11 + $0x3bc] ss:$16 sps:$4 sm:$0xff]   ;;  %v3519_v33 = vmax.f32 %v10114_v59, %v10270_v57  ;;  %v8452_v21 = vld [vmem:[#allocation11 + $0x3d0] ss:$16 sps:$4 sm:$0xff]   ;;  %v8478_v43 = vld [vmem:[#allocation11 + $0x454] ss:$16 sps:$4 sm:$0xff]  }
 0x392   : > { %v8458_v48 = vld [vmem:[#allocation11 + $0x3f0] ss:$16 sps:$4 sm:$0xff]   ;;  %v8463_v23 = vld [vmem:[#allocation11 + $0x3fc] ss:$16 sps:$4 sm:$0xff]  }
 0x394   : > { %v3524_v14 = vpop.permute.xlu1 %3523  ;;  %v10273_v42 = vpop.permute.xlu0 %3674  ;;  %4434 = vmatpush1.bf16.msra.mxu1 %v8434_v41  ;;  %v8469_v41 = vld [vmem:[#allocation11 + $0x41c] ss:$16 sps:$4 sm:$0xff]  }
 0x395   : > { %v3528_v44 = vmax.f32 %v3520_v19, %v3524_v14  ;;  %v3672_v19 = vmax.f32 %v10152_v61, %v10247_v35  ;;  %v8440_v14 = vld [vmem:[#allocation11 + $0x390] ss:$16 sps:$4 sm:$0xff]   ;;  %4435 = vmatprep.subr.bf16.mxu1 %v8442_v26  ;;  %v8481_v26 = vld [vmem:[#allocation11 + $0x45c] ss:$16 sps:$4 sm:$0xff]  }
 0x397   : > { %3533 = vrot.lane.b32.xlu1 %v3528_v44, %s9227_s29  ;;  %v3680_v44 = vmax.f32 %v3672_v19, %v10273_v42  ;;  %v8446_v42 = vld [vmem:[#allocation11 + $0x3b0] ss:$16 sps:$4 sm:$0xff]   ;;  %v8479_v19 = vld [vmem:[#allocation11 + $0x458] ss:$16 sps:$4 sm:$0xff]  }
 0x398   : > { %v10281_v9 = vpop.permute.xlu1 %3630  ;;  %v3711_v45 = vpop.permute.xlu0 %3710  ;;  %4436 = vmatpush1.bf16.msra.mxu1 %v8440_v14  ;;  %v8484_v14 = vld [vmem:[#allocation11 + $0x474] ss:$16 sps:$4 sm:$0xff]  }
 0x399   : > { %4437 = vmatprep.subr.bf16.mxu1 %v8448_v12 }
 0x39b   : > { %3576 = vrot.lane.b32.xlu1 %v3571_v29, %s9228_s22 }
 0x39c   : > { %v3439_v39 = vpop.permute.xlu1 %3438  ;;  %v10288_v28 = vpop.permute.xlu0 %3742  ;;  %4438 = vmatpush1.bf16.msra.mxu1 %v8446_v42 }
 0x39d   : > { %v3445_v38 = vsel %vm3444_vm4, %v10250_v34, %v3439_v39  ;;  %v8439_v34 = vld [vmem:[#allocation11 + $0x37c] ss:$16 sps:$4 sm:$0xff]   ;;  %v8455_v39 = vld [vmem:[#allocation11 + $0x3d8] ss:$16 sps:$4 sm:$0xff]   ;;  %4439 = vmatprep.subr.bf16.mxu1 %v8454_v31 }
 0x39e   : > { %v3449_v51 = vmax.f32 %v3430_v10, %v3445_v38  ;;  %4519 = vmatprep.subr.bf16.mxu0 %v8439_v34  ;;  %v3636_v38 = vsel %vm3557_vm3, %v10231_v63, %v10281_v9  ;;  %v8464_v9 = vld [vmem:[#allocation11 + $0x410] ss:$16 sps:$4 sm:$0xff]   ;;  %vm3784_vm3 = vcmask 1043424  }
 0x39f   : > { %3654 = vrot.lane.b32.xlu1 %v3649_v6, %s9229_s23  ;;  %4520 = vmatpush1.bf16.msra.mxu0 %v8437_v53  ;;  %v8470_v53 = vld [vmem:[#allocation11 + $0x430] ss:$16 sps:$4 sm:$0xff]  }
 0x3a0   : > { %v3713_v30 = vpop.permute.xlu1 %3712  ;;  %v3522_v4 = vpop.permute.xlu0 %3521  ;;  %3453 = vrot.lane.b32.xlu0 %v3449_v51, %s9222_s27  ;;  %4521 = vmatprep.subr.bf16.mxu0 %v8445_v55  ;;  %v8487_v55 = vld [vmem:[#allocation11 + $0x47c] ss:$16 sps:$4 sm:$0xff]  }
 0x3a1   : > { %v3718_v35 = vsel %vm3444_vm4, %v3711_v45, %v3713_v30  ;;  %v3527_v6 = vmax.f32 %v3519_v33, %v3522_v4  ;;  %4440 = vmatpush1.bf16.msra.mxu1 %v8452_v21  ;;  %v8466_v30 = vld [vmem:[#allocation11 + $0x414] ss:$16 sps:$4 sm:$0xff]   ;;  %v8467_v4 = vld [vmem:[#allocation11 + $0x418] ss:$16 sps:$4 sm:$0xff]  }
 0x3a2   : > { %v3722_v3 = vmax.f32 %v3704_v13, %v3718_v35  ;;  %4441 = vmatprep.subr.bf16.mxu1 %v8460_v58 }
 0x3a3   : > { %3495 = vrot.lane.b32.xlu1 %v3486_v49, %s9223_s21  ;;  %4522 = vmatpush1.bf16.msra.mxu0 %v8443_v52  ;;  %v8472_v49 = vld [vmem:[#allocation11 + $0x434] ss:$16 sps:$4 sm:$0xff]  }
 0x3a4   : > { %v3755_v11 = vpop.permute.xlu1 %3754  ;;  %v10305_v46 = vpop.permute.xlu0 %3752  ;;  %3493 = vrot.lane.b32.xlu0 %v3485_v60, %s9223_s21  ;;  %4523 = vmatprep.subr.bf16.mxu0 %v8451_v47  ;;  %v8475_v60 = vld [vmem:[#allocation11 + $0x43c] ss:$16 sps:$4 sm:$0xff]   ;;  %s10559_s21 = sld [smem:[#allocation31_spill]] }
 0x3a5   : > { %v3760_v62 = vmax.f32 %v3750_v32, %v3755_v11  ;;  %v3761_v29 = vmax.f32 %v3751_v37, %v3755_v11  ;;  %4442 = vmatpush1.bf16.msra.mxu1 %v8458_v48 }
 0x3a6   : > { %4443 = vmatprep.subr.bf16.mxu1 %v8466_v30 }
 0x3a7   : > { %3770 = vrot.lane.b32.xlu1 %v3760_v62, %s9230_s2  ;;  %4524 = vmatpush1.bf16.msra.mxu0 %v8449_v1 }
 0x3a8   : > { %v3795_v50 = vpop.permute.xlu1 %3794  ;;  %v10315_v22 = vpop.permute.xlu0 %3792  ;;  %3684 = vrot.lane.b32.xlu0 %v3680_v44, %s9225_s5  ;;  %4525 = vmatprep.subr.bf16.mxu0 %v8457_v27 }
 0x3a9   : > { %v3799_v10 = vmax.f32 %v10203_v25, %v3795_v50  ;;  %4444 = vmatpush1.bf16.msra.mxu1 %v8464_v9 }
 0x3aa   : > { %4445 = vmatprep.subr.bf16.mxu1 %v8472_v49  ;;  %v8485_v49 = vld [vmem:[#allocation11 + $0x478] ss:$16 sps:$4 sm:$0xff]  }
 0x3ab   : > { %3772 = vrot.lane.b32.xlu1 %v3761_v29, %s9230_s2  ;;  %4526 = vmatpush1.bf16.msra.mxu0 %v8455_v39 }
 0x3ac   : > { %v3403_v45 = vpop.permute.xlu1 %3402  ;;  %3726 = vrot.lane.b32.xlu0 %v3722_v3, %s9226_s16  ;;  %v3401_v24 = vpop.permute.xlu0 %3400  ;;  %4527 = vmatprep.subr.bf16.mxu0 %v8463_v23 }
 0x3ad   : > { %v3407_v59 = vmax.f32 %v10209_v5, %v3403_v45  ;;  %v3406_v57 = vmax.f32 %v10140_v17, %v3401_v24  ;;  %v8461_v5 = vld [vmem:[#allocation11 + $0x3f8] ss:$16 sps:$4 sm:$0xff]   ;;  %v3640_v17 = vmax.f32 %v10119_v18, %v3636_v38  ;;  %v3748_v18 = vmax.f32 %v10152_v61, %v10288_v28  ;;  %4446 = vmatpush1.bf16.msra.mxu1 %v8470_v53  ;;  %v8476_v61 = vld [vmem:[#allocation11 + $0x450] ss:$16 sps:$4 sm:$0xff]   ;;  %v8490_v53 = vld [vmem:[#allocation11 + $0x494] ss:$16 sps:$4 sm:$0xff]  }
 0x3ae   : > { %4447 = vmatprep.subr.bf16.mxu1 %v8478_v43  ;;  %v8488_v43 = vld [vmem:[#allocation11 + $0x490] ss:$16 sps:$4 sm:$0xff]  }
 0x3af   : > { %3804 = vrot.lane.b32.xlu1 %v3799_v10, %s9231_s14  ;;  %4528 = vmatpush1.bf16.msra.mxu0 %v8461_v5  ;;  %v3648_v34 = vmax.f32 %v3640_v17, %v10255_v54  ;;  %v3758_v32 = vmax.f32 %v3748_v18, %v10305_v46  ;;  %v3749_v54 = vmax.f32 %v10189_v20, %v10288_v28 }
 0x3b0   : > { %v3411_v25 = vpop.permute.xlu1 %3410  ;;  %3531 = vrot.lane.b32.xlu0 %v3527_v6, %s9227_s29  ;;  %v3409_v51 = vpop.permute.xlu0 %3408  ;;  %4529 = vmatprep.subr.bf16.mxu0 %v8469_v41  ;;  %v3798_v28 = vmax.f32 %v10189_v20, %v10315_v22 }
 0x3b1   : > { %v3415_v40 = vmax.f32 %v3407_v59, %v3411_v25  ;;  %v3414_v63 = vmax.f32 %v3406_v57, %v3409_v51  ;;  %v3759_v11 = vmax.f32 %v3749_v54, %v10305_v46  ;;  %4448 = vmatpush1.bf16.msra.mxu1 %v8476_v61  ;;  %v8496_v54 = vld [vmem:[#allocation11 + $0x4b4] ss:$16 sps:$4 sm:$0xff]   ;;  %v8499_v61 = vld [vmem:[#allocation11 + $0x4bc] ss:$16 sps:$4 sm:$0xff]  }
 0x3b2   : > { %4460 = vmatprep.subr.bf16.mxu1 %v8484_v14  ;;  %v3986_v14 = vld [vmem:[#allocation11 + $0x4d8] sm:$0x33] }
 0x3b3   : > { %3419 = vst.msk [vmem:[#allocation3 + $0x18] sm:$0x7] %vm3418_vm5, %v3415_v40  ;;  %4530 = vmatpush1.bf16.msra.mxu0 %v8467_v4  ;;  %vm3774_vm5 = vcmask 31744  }
 0x3b4   : > { %3417 = vst.msk [vmem:[#allocation3] sm:$0xff] %vm3416_vm6, %v3414_v63  ;;  %3574 = vrot.lane.b32.xlu0 %v10235_v15, %s9228_s22  ;;  %v8473_v15 = vld [vmem:[#allocation11 + $0x438] ss:$16 sps:$4 sm:$0xff]   ;;  %4531 = vmatprep.subr.bf16.mxu0 %v8475_v60  ;;  %vm3786_vm6 = vcmask 190464   ;;  %v8493_v60 = vld [vmem:[#allocation11 + $0x49c] ss:$16 sps:$4 sm:$0xff]  }
 0x3b7   : > { %4532 = vmatpush1.bf16.msra.mxu0 %v8473_v15 }
 0x3b8   : > { %3652 = vrot.lane.b32.xlu0 %v3648_v34, %s9229_s23  ;;  %4533 = vmatprep.subr.bf16.mxu0 %v8481_v26  ;;  %v8482_v34 = vld [vmem:[#allocation11 + $0x470] ss:$16 sps:$4 sm:$0xff]   ;;  %s10561_s23 = sld [smem:[#allocation33_spill]] }
 0x3bb   : > { %4534 = vmatpush1.bf16.msra.mxu0 %v8479_v19  ;;  %v3985_v19 = vld [vmem:[#allocation11 + $0x4d0] sm:$0x33] }
 0x3bc   : > { %3766 = vrot.lane.b32.xlu0 %v3758_v32, %s9230_s2  ;;  %4546 = vmatprep.subr.bf16.mxu0 %v8487_v55  ;;  %v8491_v32 = vld [vmem:[#allocation11 + $0x498] ss:$16 sps:$4 sm:$0xff]   ;;  %v8494_v55 = vld [vmem:[#allocation11 + $0x4b0] ss:$16 sps:$4 sm:$0xff]  }
 0x3c0   : > { %3768 = vrot.lane.b32.xlu0 %v3759_v11, %s9230_s2  ;;  %s9236_s2 = smov 127  }
 0x3c4   : > { %3802 = vrot.lane.b32.xlu0 %v3798_v28, %s9231_s14  ;;  %v8497_v28 = vld [vmem:[#allocation11 + $0x4b8] ss:$16 sps:$4 sm:$0xff]   ;;  %s9237_s14 = smov 1  }
 0x3e1   : > { %v3613_v62 = vpop.permute.xlu1 %3612 }
 0x3ea   : > { %v3456_v52 = vpop.permute.xlu1 %3455 }
 0x3eb   : > { %3462 = vst.msk [vmem:[#allocation3 + $0x18] sm:$0x7] %vm3461_vm7, %v3456_v52  ;;  %vm3810_vm7 = vcmask 420032   ;;  %v7595_v52 = vcombine.high %v3985_v19, %v3985_v19 }
 0x3f5   : > { %v3500_v46 = vpop.permute.xlu1 %3499  ;;  %v3498_v44 = vpop.permute.xlu0 %3497 }
 0x3f6   : > { %v3502_v37 = vsel %vm3444_vm4, %v3498_v44, %v3500_v46  ;;  %v7597_v46 = vcombine.high %v3986_v14, %v3986_v14  ;;  %v7596_v44 = vcombine.low %v3986_v14, %v3986_v14  ;;  %v8569_v14 = vld [vmem:[#allocation11 + $0x14c] ss:$16 sps:$4 sm:$0xff]  }
 0x3f7   : > { %3508 = vst.msk [vmem:[#allocation3 + $0x18] sm:$0x7] %vm3507_vm8, %v3502_v37  ;;  %vm3537_vm8 = vcmask 917152  }
 0x3f9   : > { %v3611_v22 = vpop.permute.xlu0 %3610 }
 0x3fd   : > { %v3687_v35 = vpop.permute.xlu1 %3686 }
 0x402   : > { %v3729_v13 = vpop.permute.xlu1 %3728 }
 0x409   : > { %v3534_v50 = vpop.permute.xlu1 %3533 }
 0x40a   : > { %3540 = vst.msk [vmem:[#allocation3 + $0x18] sm:$0x7] %vm3539_vm9, %v3534_v50  ;;  %vm3580_vm9 = vcmask 1048448  }
 0x40d   : > { %v3577_v20 = vpop.permute.xlu1 %3576 }
 0x40e   : > { %3585 = vst.msk [vmem:[#allocation3 + $0x18] sm:$0x7] %vm3584_vm10, %v3577_v20  ;;  %vm3616_vm10 = vcmask 326752  }
 0x40f   : > { %3587 = vst.msk [vmem:[#allocation3 + $0x20] sm:$0x7] %vm3586_vm11, %v3577_v20  ;;  %vm3658_vm11 = vcmask 556352   ;;  %v8506_v20 = vld [vmem:[#allocation11 + $0x4] ss:$16 sps:$4 sm:$0xff]  }
 0x410   : > { %3619 = vst.msk [vmem:[#allocation3 + $0x20] sm:$0x7] %vm3618_vm12, %v3613_v62  ;;  %vm3690_vm12 = vcmask 785952   ;;  %v7594_v62 = vcombine.low %v3985_v19, %v3985_v19  ;;  %v8561_v19 = vld [vmem:[#allocation11 + $0x128] ss:$16 sps:$4 sm:$0xff]  }
 0x411   : > { %v3655_v42 = vpop.permute.xlu1 %3654 }
 0x412   : > { %3661 = vst.msk [vmem:[#allocation3 + $0x20] sm:$0x7] %vm3660_vm13, %v3655_v42  ;;  %v3454_v12 = vpop.permute.xlu0 %3453  ;;  %vm3732_vm13 = vcmask 1015552  }
 0x413   : > { %3693 = vst.msk [vmem:[#allocation3 + $0x20] sm:$0x7] %vm3692_vm14, %v3687_v35  ;;  %vm3781_vm14 = vcmask 1048544  }
 0x414   : > { %3460 = vst.msk [vmem:[#allocation3] sm:$0xff] %vm3459_vm15, %v3454_v12  ;;  %vm3808_vm15 = vcmask 425152  }
 0x415   : > { %3735 = vst.msk [vmem:[#allocation3 + $0x20] sm:$0x7] %vm3734_vm0, %v3729_v13  ;;  %v3496_v29 = vpop.permute.xlu1 %3495  ;;  %v3902_v59 = vld [vmem:[#allocation3 + $0x18] sm:$0x3]  ;;  %vm4400_vm0 = vcmask 424960  }
 0x416   : > { %v3494_v1 = vpop.permute.xlu0 %3493 }
 0x417   : > { %v3501_v47 = vsel %vm3444_vm4, %v3494_v1, %v3496_v29  ;;  %vm3582_vm4 = vcmask 97280   ;;  %v8504_v29 = vld [vmem:[#allocation11] ss:$16 sps:$4 sm:$0xff]  }
 0x418   : > { %3506 = vst.msk [vmem:[#allocation3] sm:$0xff] %vm3505_vm2, %v3501_v47  ;;  %v8507_v47 = vld [vmem:[#allocation11 + $0x8] ss:$16 sps:$4 sm:$0xff]  }
 0x419   : > { %v3771_v3 = vpop.permute.xlu1 %3770 }
 0x41a   : > { %3785 = vst.msk [vmem:[#allocation3 + $0x20] sm:$0x7] %vm3784_vm3, %v3771_v3  ;;  %v3685_v33 = vpop.permute.xlu0 %3684 }
 0x41d   : > { %v3773_v45 = vpop.permute.xlu1 %3772 }
 0x41e   : > { %v3776_v24 = vsel %vm3774_vm5, %v3771_v3, %v3773_v45  ;;  %v3727_v21 = vpop.permute.xlu0 %3726  ;;  %v8512_v45 = vld [vmem:[#allocation11 + $0x24] ss:$16 sps:$4 sm:$0xff]  }
 0x41f   : > { %3787 = vst.msk [vmem:[#allocation3 + $0x28] sm:$0x7] %vm3786_vm6, %v3776_v24  ;;  %v8515_v24 = vld [vmem:[#allocation11 + $0x2c] ss:$16 sps:$4 sm:$0xff]  }
 0x421   : > { %v3805_v31 = vpop.permute.xlu1 %3804  ;;  %v3903_v23 = vld [vmem:[#allocation3 + $0x20] sm:$0x3] }
 0x422   : > { %3811 = vst.msk [vmem:[#allocation3 + $0x28] sm:$0x7] %vm3810_vm7, %v3805_v31  ;;  %v3532_v10 = vpop.permute.xlu0 %3531  ;;  %v3816_v3 = vld [vmem:[#allocation3 + $0x20] sm:$0x1]  ;;  %v8513_v31 = vld [vmem:[#allocation11 + $0x28] ss:$16 sps:$4 sm:$0xff]  }
 0x423   : > { %3538 = vst.msk [vmem:[#allocation3] sm:$0xff] %vm3537_vm8, %v3532_v10  ;;  %v8518_v10 = vld [vmem:[#allocation11 + $0x44] ss:$16 sps:$4 sm:$0xff]  }
 0x426   : > { %v3575_v39 = vpop.permute.xlu0 %3574 }
 0x427   : > { %3581 = vst.msk [vmem:[#allocation3] sm:$0xff] %vm3580_vm9, %v3575_v39 }
 0x428   : > { %3583 = vst.msk [vmem:[#allocation3 + $0x8] sm:$0xff] %vm3582_vm4, %v3575_v39  ;;  %v8521_v39 = vld [vmem:[#allocation11 + $0x4c] ss:$16 sps:$4 sm:$0xff]  }
 0x429   : > { %3617 = vst.msk [vmem:[#allocation3 + $0x8] sm:$0xff] %vm3616_vm10, %v3611_v22  ;;  %v3904_v26 = vld [vmem:[#allocation3 + $0x28] sm:$0x3]  ;;  %vm5980_vm10 = vcmp.lt.s32.totalorder %v2772_v56, 432 }
 0x42a   : > { %v3653_v27 = vpop.permute.xlu0 %3652  ;;  %v8509_v22 = vld [vmem:[#allocation11 + $0xc] ss:$16 sps:$4 sm:$0xff]  }
 0x42b   : > { %3659 = vst.msk [vmem:[#allocation3 + $0x8] sm:$0xff] %vm3658_vm11, %v3653_v27  ;;  %v8516_v27 = vld [vmem:[#allocation11 + $0x40] ss:$16 sps:$4 sm:$0xff]   ;;  %vm6085_vm11 = vcmask 654336  }
 0x42c   : > { %3691 = vst.msk [vmem:[#allocation3 + $0x8] sm:$0xff] %vm3690_vm12, %v3685_v33  ;;  %vm6073_vm12 = vcmask 261120  }
 0x42d   : > { %3733 = vst.msk [vmem:[#allocation3 + $0x8] sm:$0xff] %vm3732_vm13, %v3727_v21  ;;  %v8510_v21 = vld [vmem:[#allocation11 + $0x20] ss:$16 sps:$4 sm:$0xff]   ;;  %vm6077_vm13 = vcmask 388096  }
 0x42e   : > { %v3767_v6 = vpop.permute.xlu0 %3766  ;;  %v3899_v38 = vld [vmem:[#allocation3] sm:$0xfe] }
 0x42f   : > { %3782 = vst.msk [vmem:[#allocation3 + $0x8] sm:$0xff] %vm3781_vm14, %v3767_v6  ;;  %v3905_v58 = vpack.c.bf16 %v3902_v59, %v3899_v38  ;;  %v8524_v38 = vld [vmem:[#allocation11 + $0x64] ss:$16 sps:$4 sm:$0xff]   ;;  %v8527_v59 = vld [vmem:[#allocation11 + $0x6c] ss:$16 sps:$4 sm:$0xff]   ;;  %vm6124_vm14 = vcmask 1044224  }
 0x431   : > { %v3990_v40 = vshll.u32 %v3905_v58, 16  ;;  %v3988_v4 = vshrl.u32 %v3905_v58, 16  ;;  %v8525_v58 = vld [vmem:[#allocation11 + $0x68] ss:$16 sps:$4 sm:$0xff]  }
 0x432   : > { %v3769_v57 = vpop.permute.xlu0 %3768 }
 0x433   : > { %v3775_v25 = vsel %vm3774_vm5, %v3767_v6, %v3769_v57  ;;  %v3992_v17 = vrot.slane %v3990_v40, 1  ;;  %v8519_v6 = vld [vmem:[#allocation11 + $0x48] ss:$16 sps:$4 sm:$0xff]   ;;  %v8522_v57 = vld [vmem:[#allocation11 + $0x60] ss:$16 sps:$4 sm:$0xff]  }
 0x434   : > { %3783 = vst.msk [vmem:[#allocation3 + $0x10] sm:$0xff] %vm706_vm1, %v3775_v25  ;;  %vm4404_vm1 = vcmask 1041408   ;;  %v8530_v25 = vld [vmem:[#allocation11 + $0x84] ss:$16 sps:$4 sm:$0xff]  }
 0x435   : > { %v3993_v18 = vor.u32 %v3992_v17, %v3988_v4  ;;  %v4406_v35 = vsel %vm4404_vm1, %v7594_v62, 0  ;;  %v4412_v13 = vsel %vm4404_vm1, %v7596_v44, 0  ;;  %v8536_v40 = vld [vmem:[#allocation11 + $0xa4] ss:$16 sps:$4 sm:$0xff]   ;;  %v8537_v17 = vld [vmem:[#allocation11 + $0xa8] ss:$16 sps:$4 sm:$0xff]  }
 0x436   : > { %v3803_v51 = vpop.permute.xlu0 %3802  ;;  %v3900_v48 = vld [vmem:[#allocation3 + $0x8] sm:$0xfe]  ;;  %v8573_v44 = vld [vmem:[#allocation11 + $0x168] ss:$16 sps:$4 sm:$0xff]  }
 0x437   : > { %3809 = vst.msk [vmem:[#allocation3 + $0x10] sm:$0xff] %vm3808_vm15, %v3803_v51  ;;  %v3906_v63 = vpack.c.bf16 %v3903_v23, %v3900_v48  ;;  %v3813_v12 = vld [vmem:[#allocation3 + $0x8] sm:$0xff]  ;;  %v8531_v23 = vld [vmem:[#allocation11 + $0x88] ss:$16 sps:$4 sm:$0xff]   ;;  %vm6125_vm15 = vcmask 130052  }
 0x438   : > { %v3819_v33 = vpack.c.bf16 %v3816_v3, %v3813_v12  ;;  %v8533_v51 = vld [vmem:[#allocation11 + $0x8c] ss:$16 sps:$4 sm:$0xff]   ;;  %v8528_v48 = vld [vmem:[#allocation11 + $0x80] ss:$16 sps:$4 sm:$0xff]   ;;  %v8572_v62 = vld [vmem:[#allocation11 + $0x164] ss:$16 sps:$4 sm:$0xff]  }
 0x439   : > { %v3997_v5 = vshll.u32 %v3906_v63, 16  ;;  %v3995_v9 = vshrl.u32 %v3906_v63, 16  ;;  %v8539_v63 = vld [vmem:[#allocation11 + $0xac] ss:$16 sps:$4 sm:$0xff]   ;;  %v8540_v4 = vld [vmem:[#allocation11 + $0xc0] ss:$16 sps:$4 sm:$0xff]  }
 0x43a   : > { %v8585_v12 = vld [vmem:[#allocation11 + $0x1a8] ss:$16 sps:$4 sm:$0xff]  }
 0x43b   : > { %v3999_v30 = vrot.slane %v3997_v5, 1  ;;  %v8534_v5 = vld [vmem:[#allocation11 + $0xa0] ss:$16 sps:$4 sm:$0xff]   ;;  %v8591_v3 = vld [vmem:[#allocation11 + $0x1c8] ss:$16 sps:$4 sm:$0xff]  }
 0x43d   : > { %v4000_v41 = vor.u32 %v3999_v30, %v3995_v9  ;;  %v8542_v9 = vld [vmem:[#allocation11 + $0xc4] ss:$16 sps:$4 sm:$0xff]   ;;  %v8545_v30 = vld [vmem:[#allocation11 + $0xcc] ss:$16 sps:$4 sm:$0xff]  }
 0x43e   : > { %v3901_v15 = vld [vmem:[#allocation3 + $0x10] sm:$0xfe] }
 0x43f   : > { %4449 = vmatprep.mubr.bf16.mxu1 %v4000_v41  ;;  %4535 = vmatprep.mubr.bf16.mxu0 %v4000_v41  ;;  %v3907_v11 = vpack.c.bf16 %v3904_v26, %v3901_v15  ;;  %v8543_v41 = vld [vmem:[#allocation11 + $0xc8] ss:$16 sps:$4 sm:$0xff]   ;;  %v8557_v15 = vld [vmem:[#allocation11 + $0x10c] ss:$16 sps:$4 sm:$0xff]   ;;  %v8560_v26 = vld [vmem:[#allocation11 + $0x124] ss:$16 sps:$4 sm:$0xff]  }
 0x440   : > { %4450 = vmatmul.mubr.bf16.vlgmr.msra.gmra.mrb[56].mxu1 %v3993_v18  ;;  %4536 = vmatmul.mubr.bf16.vlgmr.msra.gmra.mrb[60].mxu0 %v3993_v18  ;;  %v8546_v18 = vld [vmem:[#allocation11 + $0xe0] ss:$16 sps:$4 sm:$0xff]  }
 0x441   : > { %4461 = vmatpush1.bf16.msra.mxu1 %v8482_v34  ;;  %4547 = vmatpush1.bf16.msra.mxu0 %v8485_v49  ;;  %v4004_v37 = vshll.u32 %v3907_v11, 16  ;;  %v4002_v42 = vshrl.u32 %v3907_v11, 16  ;;  %v8548_v34 = vld [vmem:[#allocation11 + $0xe4] ss:$16 sps:$4 sm:$0xff]   ;;  %v8551_v49 = vld [vmem:[#allocation11 + $0xec] ss:$16 sps:$4 sm:$0xff]  }
 0x442   : > { %4462 = vmatprep.subr.bf16.mxu1 %v8490_v53  ;;  %4548 = vmatprep.subr.bf16.mxu0 %v8493_v60  ;;  %v8549_v53 = vld [vmem:[#allocation11 + $0xe8] ss:$16 sps:$4 sm:$0xff]   ;;  %v8554_v60 = vld [vmem:[#allocation11 + $0x104] ss:$16 sps:$4 sm:$0xff]  }
 0x443   : > { %4492 = vmatprep.mubr.bf16.mxu1 %v9220_v0  ;;  %4578 = vmatprep.mubr.bf16.mxu0 %v9220_v0  ;;  %v4006_v50 = vrot.slane %v4004_v37, 1  ;;  %v8566_v11 = vld [vmem:[#allocation11 + $0x144] ss:$16 sps:$4 sm:$0xff]  }
 0x444   : > { %v8578_v37 = vld [vmem:[#allocation11 + $0x184] ss:$16 sps:$4 sm:$0xff]  }
 0x445   : > { %4463 = vmatpush1.bf16.msra.mxu1 %v8488_v43  ;;  %4549 = vmatpush1.bf16.msra.mxu0 %v8491_v32  ;;  %v4007_v1 = vor.u32 %v4006_v50, %v4002_v42  ;;  %v8552_v43 = vld [vmem:[#allocation11 + $0x100] ss:$16 sps:$4 sm:$0xff]   ;;  %v8555_v32 = vld [vmem:[#allocation11 + $0x108] ss:$16 sps:$4 sm:$0xff]  }
 0x446   : > { %4464 = vmatprep.subr.bf16.mxu1 %v8496_v54  ;;  %4550 = vmatprep.subr.bf16.mxu0 %v8499_v61  ;;  %v8563_v54 = vld [vmem:[#allocation11 + $0x12c] ss:$16 sps:$4 sm:$0xff]   ;;  %v8558_v61 = vld [vmem:[#allocation11 + $0x120] ss:$16 sps:$4 sm:$0xff]   ;;  %v8579_v50 = vld [vmem:[#allocation11 + $0x188] ss:$16 sps:$4 sm:$0xff]  }
 0x447   : > { %v8582_v42 = vld [vmem:[#allocation11 + $0x1a0] ss:$16 sps:$4 sm:$0xff]  }
 0x449   : > { %4465 = vmatpush1.bf16.msra.mxu1 %v8494_v55  ;;  %4551 = vmatpush1.bf16.msra.mxu0 %v8497_v28  ;;  %v8564_v55 = vld [vmem:[#allocation11 + $0x140] ss:$16 sps:$4 sm:$0xff]   ;;  %v8567_v28 = vld [vmem:[#allocation11 + $0x148] ss:$16 sps:$4 sm:$0xff]  }
 0x44a   : > { %7598 = vmatprep.subr.msk.bf16.mxu1 %vm4404_vm1, %v7595_v52  ;;  %7600 = vmatprep.subr.msk.bf16.mxu0 %vm4404_vm1, %v7597_v46  ;;  %v8575_v52 = vld [vmem:[#allocation11 + $0x16c] ss:$16 sps:$4 sm:$0xff]   ;;  %v8570_v46 = vld [vmem:[#allocation11 + $0x160] ss:$16 sps:$4 sm:$0xff]  }
 0x44d   : > { %4467 = vmatpush1.bf16.msra.mxu1 %v4406_v35  ;;  %4553 = vmatpush1.bf16.msra.mxu0 %v4412_v13  ;;  %v8581_v35 = vld [vmem:[#allocation11 + $0x18c] ss:$16 sps:$4 sm:$0xff]   ;;  %v8576_v13 = vld [vmem:[#allocation11 + $0x180] ss:$16 sps:$4 sm:$0xff]  }
 0x44e   : > { %4994 = vmatprep.subr.bf16.mxu1 %v8506_v20  ;;  %5080 = vmatprep.subr.bf16.mxu0 %v8509_v22  ;;  %v8584_v20 = vld [vmem:[#allocation11 + $0x1a4] ss:$16 sps:$4 sm:$0xff]   ;;  %v8587_v22 = vld [vmem:[#allocation11 + $0x1ac] ss:$16 sps:$4 sm:$0xff]  }
 0x450   : > { %7599 = vmatmul.mubr.msk.bf16.vlgmr.msra.gmra.mrb[56].mxu1 %vm4400_vm0, %v4007_v1  ;;  %7601 = vmatmul.mubr.msk.bf16.vlgmr.msra.gmra.mrb[60].mxu0 %vm4400_vm0, %v4007_v1  ;;  %v8593_v1 = vld [vmem:[#allocation11 + $0x1cc] ss:$16 sps:$4 sm:$0xff]  }
 0x451   : > { %4995 = vmatpush1.bf16.msra.mxu1 %v8504_v29  ;;  %5026 = vmatprep.mubr.bf16.mxu1 %v3819_v33  ;;  %v8590_v29 = vld [vmem:[#allocation11 + $0x1c4] ss:$16 sps:$4 sm:$0xff]  }
 0x452   : > { %5081 = vmatpush1.bf16.msra.mxu0 %v8507_v47  ;;  %5112 = vmatprep.mubr.bf16.mxu0 %v3819_v33  ;;  %v8588_v47 = vld [vmem:[#allocation11 + $0x1c0] ss:$16 sps:$4 sm:$0xff]   ;;  %v8596_v33 = vld [vmem:[#allocation11 + $0x1e4] ss:$16 sps:$4 sm:$0xff]  }
 0x453   : > { %4996 = vmatprep.subr.bf16.mxu1 %v8512_v45  ;;  %5082 = vmatprep.subr.bf16.mxu0 %v8515_v24  ;;  %v8599_v45 = vld [vmem:[#allocation11 + $0x1ec] ss:$16 sps:$4 sm:$0xff]   ;;  %v8594_v24 = vld [vmem:[#allocation11 + $0x1e0] ss:$16 sps:$4 sm:$0xff]  }
 0x455   : > { %4997 = vmatpush1.bf16.msra.mxu1 %v8510_v21  ;;  %v8597_v21 = vld [vmem:[#allocation11 + $0x1e8] ss:$16 sps:$4 sm:$0xff]  }
 0x456   : > { %5083 = vmatpush1.bf16.msra.mxu0 %v8513_v31  ;;  %4998 = vmatprep.subr.bf16.mxu1 %v8518_v10  ;;  %v8602_v31 = vld [vmem:[#allocation11 + $0x204] ss:$16 sps:$4 sm:$0xff]  }
 0x457   : > { %5084 = vmatprep.subr.bf16.mxu0 %v8521_v39  ;;  %v3812_v10 = vld [vmem:[#allocation3] sm:$0xff] }
 0x458   : > { %v8605_v39 = vld [vmem:[#allocation11 + $0x20c] ss:$16 sps:$4 sm:$0xff]  }
 0x459   : > { %4999 = vmatpush1.bf16.msra.mxu1 %v8516_v27  ;;  %v3815_v27 = vld [vmem:[#allocation3 + $0x18] sm:$0x1] }
 0x45a   : > { %5085 = vmatpush1.bf16.msra.mxu0 %v8519_v6  ;;  %5000 = vmatprep.subr.bf16.mxu1 %v8524_v38  ;;  %v8600_v6 = vld [vmem:[#allocation11 + $0x200] ss:$16 sps:$4 sm:$0xff]   ;;  %v3818_v38 = vpack.c.bf16 %v3815_v27, %v3812_v10  ;;  %v8666_v10 = vld [vmem:[#allocation11 + $0x5c4] ss:$16 sps:$4 sm:$0xff]  }
 0x45b   : > { %5086 = vmatprep.subr.bf16.mxu0 %v8527_v59  ;;  %v8603_v59 = vld [vmem:[#allocation11 + $0x208] ss:$16 sps:$4 sm:$0xff]   ;;  %v8664_v27 = vld [vmem:[#allocation11 + $0x5c0] ss:$16 sps:$4 sm:$0xff]  }
 0x45d   : > { %5001 = vmatpush1.bf16.msra.mxu1 %v8522_v57  ;;  %v8608_v57 = vld [vmem:[#allocation11 + $0x224] ss:$16 sps:$4 sm:$0xff]  }
 0x45e   : > { %5087 = vmatpush1.bf16.msra.mxu0 %v8525_v58  ;;  %5002 = vmatprep.subr.bf16.mxu1 %v8530_v25  ;;  %v8611_v58 = vld [vmem:[#allocation11 + $0x22c] ss:$16 sps:$4 sm:$0xff]   ;;  %v8606_v25 = vld [vmem:[#allocation11 + $0x220] ss:$16 sps:$4 sm:$0xff]  }
 0x45f   : > { %5088 = vmatprep.subr.bf16.mxu0 %v8533_v51  ;;  %v8609_v51 = vld [vmem:[#allocation11 + $0x228] ss:$16 sps:$4 sm:$0xff]  }
 0x461   : > { %5003 = vmatpush1.bf16.msra.mxu1 %v8528_v48  ;;  %v8614_v48 = vld [vmem:[#allocation11 + $0x244] ss:$16 sps:$4 sm:$0xff]  }
 0x462   : > { %5089 = vmatpush1.bf16.msra.mxu0 %v8531_v23  ;;  %5004 = vmatprep.subr.bf16.mxu1 %v8536_v40  ;;  %v8617_v23 = vld [vmem:[#allocation11 + $0x24c] ss:$16 sps:$4 sm:$0xff]   ;;  %v3897_v40 = vld [vmem:[#allocation11 + $0x260] sm:$0x33] }
 0x463   : > { %5090 = vmatprep.subr.bf16.mxu0 %v8539_v63  ;;  %v3898_v63 = vld [vmem:[#allocation11 + $0x268] sm:$0x33] }
 0x465   : > { %5005 = vmatpush1.bf16.msra.mxu1 %v8534_v5  ;;  %v8612_v5 = vld [vmem:[#allocation11 + $0x240] ss:$16 sps:$4 sm:$0xff]  }
 0x466   : > { %5091 = vmatpush1.bf16.msra.mxu0 %v8537_v17  ;;  %5006 = vmatprep.subr.bf16.mxu1 %v8542_v9  ;;  %v8615_v17 = vld [vmem:[#allocation11 + $0x248] ss:$16 sps:$4 sm:$0xff]   ;;  %v7679_v9 = vcombine.high %v3897_v40, %v3897_v40 }
 0x467   : > { %5092 = vmatprep.subr.bf16.mxu0 %v8545_v30  ;;  %v7678_v30 = vcombine.low %v3897_v40, %v3897_v40  ;;  %v8684_v40 = vld [vmem:[#allocation11 + $0x624] ss:$16 sps:$4 sm:$0xff]  }
 0x469   : > { %5007 = vmatpush1.bf16.msra.mxu1 %v8540_v4  ;;  %v7681_v4 = vcombine.high %v3898_v63, %v3898_v63 }
 0x46a   : > { %5093 = vmatpush1.bf16.msra.mxu0 %v8543_v41  ;;  %5008 = vmatprep.subr.bf16.mxu1 %v8548_v34  ;;  %v7680_v41 = vcombine.low %v3898_v63, %v3898_v63  ;;  %v5167_v34 = vld [vmem:[#allocation3 + $0x8] sm:$0xfc]  ;;  %v8687_v63 = vld [vmem:[#allocation11 + $0x62c] ss:$16 sps:$4 sm:$0xff]  }
 0x46b   : > { %5094 = vmatprep.subr.bf16.mxu0 %v8551_v49  ;;  %v4983_v49 = vsel %vm4404_vm1, %v7678_v30, 0  ;;  %v8693_v30 = vld [vmem:[#allocation11 + $0x64c] ss:$16 sps:$4 sm:$0xff]  }
 0x46d   : > { %5009 = vmatpush1.bf16.msra.mxu1 %v8546_v18  ;;  %v8624_v18 = vld [vmem:[#allocation11 + $0x4e4] ss:$16 sps:$4 sm:$0xff]  }
 0x46e   : > { %5095 = vmatpush1.bf16.msra.mxu0 %v8549_v53  ;;  %5010 = vmatprep.subr.bf16.mxu1 %v8554_v60  ;;  %v4989_v53 = vsel %vm4404_vm1, %v7680_v41, 0  ;;  %v3814_v60 = vld [vmem:[#allocation3 + $0x10] sm:$0xff] }
 0x46f   : > { %5096 = vmatprep.subr.bf16.mxu0 %v8557_v15  ;;  %v8627_v15 = vld [vmem:[#allocation11 + $0x4ec] ss:$16 sps:$4 sm:$0xff]   ;;  %v8691_v41 = vld [vmem:[#allocation11 + $0x648] ss:$16 sps:$4 sm:$0xff]  }
 0x471   : > { %5011 = vmatpush1.bf16.msra.mxu1 %v8552_v43  ;;  %v5170_v43 = vld [vmem:[#allocation3 + $0x20] sm:$0x7] }
 0x472   : > { %5097 = vmatpush1.bf16.msra.mxu0 %v8555_v32  ;;  %5012 = vmatprep.subr.bf16.mxu1 %v8560_v26  ;;  %v5173_v32 = vpack.c.bf16 %v5170_v43, %v5167_v34  ;;  %v3817_v26 = vld [vmem:[#allocation3 + $0x28] sm:$0x1]  ;;  %v8696_v34 = vld [vmem:[#allocation11 + $0x664] ss:$16 sps:$4 sm:$0xff]   ;;  %v8700_v43 = vld [vmem:[#allocation11 + $0x680] ss:$16 sps:$4 sm:$0xff]  }
 0x473   : > { %5098 = vmatprep.subr.bf16.mxu0 %v8563_v54  ;;  %v8622_v54 = vld [vmem:[#allocation11 + $0x4e0] ss:$16 sps:$4 sm:$0xff]  }
 0x475   : > { %5013 = vmatpush1.bf16.msra.mxu1 %v8558_v61  ;;  %v3820_v61 = vpack.c.bf16 %v3817_v26, %v3814_v60  ;;  %v8702_v60 = vld [vmem:[#allocation11 + $0x684] ss:$16 sps:$4 sm:$0xff]  }
 0x476   : > { %5099 = vmatpush1.bf16.msra.mxu0 %v8561_v19  ;;  %5014 = vmatprep.subr.bf16.mxu1 %v8566_v11  ;;  %v8625_v19 = vld [vmem:[#allocation11 + $0x4e8] ss:$16 sps:$4 sm:$0xff]   ;;  %v8630_v11 = vld [vmem:[#allocation11 + $0x504] ss:$16 sps:$4 sm:$0xff]  }
 0x477   : > { %5100 = vmatprep.subr.bf16.mxu0 %v8569_v14  ;;  %v5258_v14 = vrot.slane %v5173_v32, 1  ;;  %v8703_v32 = vld [vmem:[#allocation11 + $0x688] ss:$16 sps:$4 sm:$0xff]   ;;  %v8708_v26 = vld [vmem:[#allocation11 + $0x6a4] ss:$16 sps:$4 sm:$0xff]  }
 0x479   : > { %5015 = vmatpush1.bf16.msra.mxu1 %v8564_v55  ;;  %v8633_v55 = vld [vmem:[#allocation11 + $0x50c] ss:$16 sps:$4 sm:$0xff]  }
 0x47a   : > { %5101 = vmatpush1.bf16.msra.mxu0 %v8567_v28  ;;  %5016 = vmatprep.subr.bf16.mxu1 %v8572_v62  ;;  %v8628_v28 = vld [vmem:[#allocation11 + $0x500] ss:$16 sps:$4 sm:$0xff]   ;;  %v8631_v62 = vld [vmem:[#allocation11 + $0x508] ss:$16 sps:$4 sm:$0xff]  }
 0x47b   : > { %5102 = vmatprep.subr.bf16.mxu0 %v8575_v52  ;;  %v8636_v52 = vld [vmem:[#allocation11 + $0x524] ss:$16 sps:$4 sm:$0xff]  }
 0x47d   : > { %5017 = vmatpush1.bf16.msra.mxu1 %v8570_v46  ;;  %v8639_v46 = vld [vmem:[#allocation11 + $0x52c] ss:$16 sps:$4 sm:$0xff]  }
 0x47e   : > { %5103 = vmatpush1.bf16.msra.mxu0 %v8573_v44  ;;  %5018 = vmatprep.subr.bf16.mxu1 %v8578_v37  ;;  %v8634_v44 = vld [vmem:[#allocation11 + $0x520] ss:$16 sps:$4 sm:$0xff]   ;;  %v8637_v37 = vld [vmem:[#allocation11 + $0x528] ss:$16 sps:$4 sm:$0xff]  }
 0x47f   : > { %5104 = vmatprep.subr.bf16.mxu0 %v8581_v35  ;;  %v8642_v35 = vld [vmem:[#allocation11 + $0x544] ss:$16 sps:$4 sm:$0xff]  }
 0x481   : > { %5019 = vmatpush1.bf16.msra.mxu1 %v8576_v13  ;;  %v8645_v13 = vld [vmem:[#allocation11 + $0x54c] ss:$16 sps:$4 sm:$0xff]  }
 0x482   : > { %5105 = vmatpush1.bf16.msra.mxu0 %v8579_v50  ;;  %5020 = vmatprep.subr.bf16.mxu1 %v8584_v20  ;;  %v8640_v50 = vld [vmem:[#allocation11 + $0x540] ss:$16 sps:$4 sm:$0xff]   ;;  %v8643_v20 = vld [vmem:[#allocation11 + $0x548] ss:$16 sps:$4 sm:$0xff]  }
 0x483   : > { %5106 = vmatprep.subr.bf16.mxu0 %v8587_v22  ;;  %v8648_v22 = vld [vmem:[#allocation11 + $0x564] ss:$16 sps:$4 sm:$0xff]  }
 0x485   : > { %5021 = vmatpush1.bf16.msra.mxu1 %v8582_v42  ;;  %v8651_v42 = vld [vmem:[#allocation11 + $0x56c] ss:$16 sps:$4 sm:$0xff]  }
 0x486   : > { %5107 = vmatpush1.bf16.msra.mxu0 %v8585_v12  ;;  %5022 = vmatprep.subr.bf16.mxu1 %v8590_v29  ;;  %v8646_v12 = vld [vmem:[#allocation11 + $0x560] ss:$16 sps:$4 sm:$0xff]   ;;  %v8649_v29 = vld [vmem:[#allocation11 + $0x568] ss:$16 sps:$4 sm:$0xff]  }
 0x487   : > { %5108 = vmatprep.subr.bf16.mxu0 %v8593_v1  ;;  %v8654_v1 = vld [vmem:[#allocation11 + $0x584] ss:$16 sps:$4 sm:$0xff]  }
 0x489   : > { %5023 = vmatpush1.bf16.msra.mxu1 %v8588_v47  ;;  %v8657_v47 = vld [vmem:[#allocation11 + $0x58c] ss:$16 sps:$4 sm:$0xff]  }
 0x48a   : > { %5109 = vmatpush1.bf16.msra.mxu0 %v8591_v3  ;;  %5024 = vmatprep.subr.bf16.mxu1 %v8596_v33  ;;  %v8652_v3 = vld [vmem:[#allocation11 + $0x580] ss:$16 sps:$4 sm:$0xff]   ;;  %v8655_v33 = vld [vmem:[#allocation11 + $0x588] ss:$16 sps:$4 sm:$0xff]  }
 0x48b   : > { %5110 = vmatprep.subr.bf16.mxu0 %v8599_v45  ;;  %v8660_v45 = vld [vmem:[#allocation11 + $0x5a4] ss:$16 sps:$4 sm:$0xff]  }
 0x48d   : > { %5025 = vmatpush1.bf16.msra.mxu1 %v8594_v24  ;;  %v8663_v24 = vld [vmem:[#allocation11 + $0x5ac] ss:$16 sps:$4 sm:$0xff]  }
 0x48e   : > { %5111 = vmatpush1.bf16.msra.mxu0 %v8597_v21  ;;  %5037 = vmatprep.subr.bf16.mxu1 %v8602_v31  ;;  %v8658_v21 = vld [vmem:[#allocation11 + $0x5a0] ss:$16 sps:$4 sm:$0xff]   ;;  %v8661_v31 = vld [vmem:[#allocation11 + $0x5a8] ss:$16 sps:$4 sm:$0xff]  }
 0x48f   : > { %5123 = vmatprep.subr.bf16.mxu0 %v8605_v39  ;;  %v8669_v39 = vld [vmem:[#allocation11 + $0x5cc] ss:$16 sps:$4 sm:$0xff]  }
 0x490   : > { %5027 = vmatmul.mubr.bf16.vlgmr.msra.gmra.mrb[56].mxu1 %v3818_v38 }
 0x491   : > { %5113 = vmatmul.mubr.bf16.vlgmr.msra.gmra.mrb[60].mxu0 %v3818_v38  ;;  %5038 = vmatpush1.bf16.msra.mxu1 %v8600_v6  ;;  %v8667_v6 = vld [vmem:[#allocation11 + $0x5c8] ss:$16 sps:$4 sm:$0xff]   ;;  %v8672_v38 = vld [vmem:[#allocation11 + $0x5e4] ss:$16 sps:$4 sm:$0xff]  }
 0x492   : > { %5124 = vmatpush1.bf16.msra.mxu0 %v8603_v59  ;;  %5039 = vmatprep.subr.bf16.mxu1 %v8608_v57  ;;  %v8675_v59 = vld [vmem:[#allocation11 + $0x5ec] ss:$16 sps:$4 sm:$0xff]   ;;  %v8670_v57 = vld [vmem:[#allocation11 + $0x5e0] ss:$16 sps:$4 sm:$0xff]  }
 0x493   : > { %5125 = vmatprep.subr.bf16.mxu0 %v8611_v58  ;;  %5069 = vmatprep.mubr.bf16.mxu1 %v9220_v0  ;;  %v8673_v58 = vld [vmem:[#allocation11 + $0x5e8] ss:$16 sps:$4 sm:$0xff]  }
 0x494   : > { %5155 = vmatprep.mubr.bf16.mxu0 %v9220_v0 }
 0x495   : > { %5040 = vmatpush1.bf16.msra.mxu1 %v8606_v25  ;;  %v8678_v25 = vld [vmem:[#allocation11 + $0x604] ss:$16 sps:$4 sm:$0xff]  }
 0x496   : > { %5126 = vmatpush1.bf16.msra.mxu0 %v8609_v51  ;;  %5041 = vmatprep.subr.bf16.mxu1 %v8614_v48  ;;  %v8681_v51 = vld [vmem:[#allocation11 + $0x60c] ss:$16 sps:$4 sm:$0xff]   ;;  %v8676_v48 = vld [vmem:[#allocation11 + $0x600] ss:$16 sps:$4 sm:$0xff]  }
 0x497   : > { %5127 = vmatprep.subr.bf16.mxu0 %v8617_v23  ;;  %v8679_v23 = vld [vmem:[#allocation11 + $0x608] ss:$16 sps:$4 sm:$0xff]  }
 0x499   : > { %5042 = vmatpush1.bf16.msra.mxu1 %v8612_v5  ;;  %v8682_v5 = vld [vmem:[#allocation11 + $0x620] ss:$16 sps:$4 sm:$0xff]  }
 0x49a   : > { %5128 = vmatpush1.bf16.msra.mxu0 %v8615_v17  ;;  %7682 = vmatprep.subr.msk.bf16.mxu1 %vm4404_vm1, %v7679_v9  ;;  %v8685_v17 = vld [vmem:[#allocation11 + $0x628] ss:$16 sps:$4 sm:$0xff]   ;;  %v8690_v9 = vld [vmem:[#allocation11 + $0x644] ss:$16 sps:$4 sm:$0xff]  }
 0x49b   : > { %7684 = vmatprep.subr.msk.bf16.mxu0 %vm4404_vm1, %v7681_v4  ;;  %v8688_v4 = vld [vmem:[#allocation11 + $0x640] ss:$16 sps:$4 sm:$0xff]  }
 0x49d   : > { %5044 = vmatpush1.bf16.msra.mxu1 %v4983_v49  ;;  %v8699_v49 = vld [vmem:[#allocation11 + $0x66c] ss:$16 sps:$4 sm:$0xff]  }
 0x49e   : > { %5130 = vmatpush1.bf16.msra.mxu0 %v4989_v53  ;;  %5667 = vmatprep.subr.bf16.mxu1 %v8624_v18  ;;  %v8694_v18 = vld [vmem:[#allocation11 + $0x660] ss:$16 sps:$4 sm:$0xff]   ;;  %v8697_v53 = vld [vmem:[#allocation11 + $0x668] ss:$16 sps:$4 sm:$0xff]  }
 0x49f   : > { %5753 = vmatprep.subr.bf16.mxu0 %v8627_v15  ;;  %v8705_v15 = vld [vmem:[#allocation11 + $0x68c] ss:$16 sps:$4 sm:$0xff]  }
 0x4a0   : > { %7683 = vmatmul.mubr.msk.bf16.vlgmr.msra.gmra.mrb[56].mxu1 %vm4400_vm0, %v3820_v61 }
 0x4a1   : > { %7685 = vmatmul.mubr.msk.bf16.vlgmr.msra.gmra.mrb[60].mxu0 %vm4400_vm0, %v3820_v61  ;;  %5668 = vmatpush1.bf16.msra.mxu1 %v8622_v54  ;;  %v8711_v54 = vld [vmem:[#allocation11 + $0x6ac] ss:$16 sps:$4 sm:$0xff]   ;;  %v8706_v61 = vld [vmem:[#allocation11 + $0x6a0] ss:$16 sps:$4 sm:$0xff]  }
 0x4a2   : > { %5699 = vmatprep.mubr.bf16.mxu1 %v5258_v14  ;;  %5754 = vmatpush1.bf16.msra.mxu0 %v8625_v19  ;;  %v8709_v19 = vld [vmem:[#allocation11 + $0x6a8] ss:$16 sps:$4 sm:$0xff]  }
 0x4a3   : > { %5785 = vmatprep.mubr.bf16.mxu0 %v5258_v14  ;;  %5669 = vmatprep.subr.bf16.mxu1 %v8630_v11  ;;  %v8714_v11 = vld [vmem:[#allocation11 + $0x6c4] ss:$16 sps:$4 sm:$0xff]   ;;  %v8717_v14 = vld [vmem:[#allocation11 + $0x6cc] ss:$16 sps:$4 sm:$0xff]  }
 0x4a4   : > { %5755 = vmatprep.subr.bf16.mxu0 %v8633_v55  ;;  %v5166_v55 = vld [vmem:[#allocation3] sm:$0xfc] }
 0x4a5   : > { %5670 = vmatpush1.bf16.msra.mxu1 %v8628_v28  ;;  %v8712_v28 = vld [vmem:[#allocation11 + $0x6c0] ss:$16 sps:$4 sm:$0xff]  }
 0x4a6   : > { %5756 = vmatpush1.bf16.msra.mxu0 %v8631_v62  ;;  %5671 = vmatprep.subr.bf16.mxu1 %v8636_v52  ;;  %v5169_v62 = vld [vmem:[#allocation3 + $0x18] sm:$0x7]  ;;  %v8715_v52 = vld [vmem:[#allocation11 + $0x6c8] ss:$16 sps:$4 sm:$0xff]  }
 0x4a7   : > { %5757 = vmatprep.subr.bf16.mxu0 %v8639_v46  ;;  %v5172_v46 = vpack.c.bf16 %v5169_v62, %v5166_v55 }
 0x4a9   : > { %5672 = vmatpush1.bf16.msra.mxu1 %v8634_v44  ;;  %v8720_v44 = vld [vmem:[#allocation11 + $0x6e4] ss:$16 sps:$4 sm:$0xff]  }
 0x4aa   : > { %5758 = vmatpush1.bf16.msra.mxu0 %v8637_v37  ;;  %5673 = vmatprep.subr.bf16.mxu1 %v8642_v35  ;;  %v8723_v37 = vld [vmem:[#allocation11 + $0x6ec] ss:$16 sps:$4 sm:$0xff]   ;;  %v8718_v35 = vld [vmem:[#allocation11 + $0x6e0] ss:$16 sps:$4 sm:$0xff]  }
 0x4ab   : > { %5759 = vmatprep.subr.bf16.mxu0 %v8645_v13  ;;  %v5257_v13 = vrot.slane %v5172_v46, 1 }
 0x4ad   : > { %5674 = vmatpush1.bf16.msra.mxu1 %v8640_v50  ;;  %v8721_v50 = vld [vmem:[#allocation11 + $0x6e8] ss:$16 sps:$4 sm:$0xff]  }
 0x4ae   : > { %5760 = vmatpush1.bf16.msra.mxu0 %v8643_v20  ;;  %5675 = vmatprep.subr.bf16.mxu1 %v8648_v22  ;;  %v8726_v20 = vld [vmem:[#allocation11 + $0x704] ss:$16 sps:$4 sm:$0xff]   ;;  %v8729_v22 = vld [vmem:[#allocation11 + $0x70c] ss:$16 sps:$4 sm:$0xff]  }
 0x4af   : > { %5761 = vmatprep.subr.bf16.mxu0 %v8651_v42  ;;  %v8724_v42 = vld [vmem:[#allocation11 + $0x700] ss:$16 sps:$4 sm:$0xff]  }
 0x4b1   : > { %5676 = vmatpush1.bf16.msra.mxu1 %v8646_v12  ;;  %v8727_v12 = vld [vmem:[#allocation11 + $0x708] ss:$16 sps:$4 sm:$0xff]  }
 0x4b2   : > { %5762 = vmatpush1.bf16.msra.mxu0 %v8649_v29  ;;  %5677 = vmatprep.subr.bf16.mxu1 %v8654_v1  ;;  %v8732_v29 = vld [vmem:[#allocation11 + $0x724] ss:$16 sps:$4 sm:$0xff]   ;;  %v8735_v1 = vld [vmem:[#allocation11 + $0x72c] ss:$16 sps:$4 sm:$0xff]  }
 0x4b3   : > { %5763 = vmatprep.subr.bf16.mxu0 %v8657_v47  ;;  %v5252_v47 = vld [vmem:[#allocation11 + $0x740] sm:$0x33] }
 0x4b5   : > { %5678 = vmatpush1.bf16.msra.mxu1 %v8652_v3  ;;  %v5253_v3 = vld [vmem:[#allocation11 + $0x748] sm:$0x33] }
 0x4b6   : > { %5764 = vmatpush1.bf16.msra.mxu0 %v8655_v33  ;;  %5679 = vmatprep.subr.bf16.mxu1 %v8660_v45  ;;  %v8730_v33 = vld [vmem:[#allocation11 + $0x720] ss:$16 sps:$4 sm:$0xff]   ;;  %v8733_v45 = vld [vmem:[#allocation11 + $0x728] ss:$16 sps:$4 sm:$0xff]  }
 0x4b7   : > { %5765 = vmatprep.subr.bf16.mxu0 %v8663_v24  ;;  %v7763_v24 = vcombine.high %v5252_v47, %v5252_v47 }
 0x4b9   : > { %5680 = vmatpush1.bf16.msra.mxu1 %v8658_v21  ;;  %v7762_v21 = vcombine.low %v5252_v47, %v5252_v47 }
 0x4ba   : > { %5766 = vmatpush1.bf16.msra.mxu0 %v8661_v31  ;;  %5681 = vmatprep.subr.bf16.mxu1 %v8666_v10  ;;  %v7765_v31 = vcombine.high %v5253_v3, %v5253_v3  ;;  %v7764_v10 = vcombine.low %v5253_v3, %v5253_v3 }
 0x4bb   : > { %5767 = vmatprep.subr.bf16.mxu0 %v8669_v39  ;;  %v5168_v39 = vld [vmem:[#allocation3 + $0x10] sm:$0xfc] }
 0x4bd   : > { %5682 = vmatpush1.bf16.msra.mxu1 %v8664_v27  ;;  %v5171_v27 = vld [vmem:[#allocation3 + $0x28] sm:$0x7] }
 0x4be   : > { %5768 = vmatpush1.bf16.msra.mxu0 %v8667_v6  ;;  %5683 = vmatprep.subr.bf16.mxu1 %v8672_v38  ;;  %v5656_v6 = vsel %vm4404_vm1, %v7762_v21, 0  ;;  %v5174_v38 = vpack.c.bf16 %v5171_v27, %v5168_v39 }
 0x4bf   : > { %5769 = vmatprep.subr.bf16.mxu0 %v8675_v59  ;;  %v5662_v59 = vsel %vm4404_vm1, %v7764_v10, 0 }
 0x4c1   : > { %5684 = vmatpush1.bf16.msra.mxu1 %v8670_v57  ;;  %v5259_v57 = vrot.slane %v5174_v38, 1 }
 0x4c2   : > { %5770 = vmatpush1.bf16.msra.mxu0 %v8673_v58  ;;  %5685 = vmatprep.subr.bf16.mxu1 %v8678_v25  ;;  %v5847_v58 = vld [vmem:[%s10558_s8] sm:$0xf]  ;;  %v5885_v25 = vld [vmem:[#allocation13] sm:$0xf] }
 0x4c3   : > { %5771 = vmatprep.subr.bf16.mxu0 %v8681_v51  ;;  %v5852_v51 = vrot.slane %v5847_v58, %v9838_v2 }
 0x4c5   : > { %5686 = vmatpush1.bf16.msra.mxu1 %v8676_v48  ;;  %v5860_v48 = vrot.slane %v5847_v58, %v9845_v7 }
 0x4c6   : > { %5772 = vmatpush1.bf16.msra.mxu0 %v8679_v23  ;;  %5687 = vmatprep.subr.bf16.mxu1 %v8684_v40  ;;  %v5856_v23 = vrot.slane %v5847_v58, %v9848_v8  ;;  %v5890_v40 = vrot.slane %v5885_v25, %v9838_v2 }
 0x4c7   : > { %5773 = vmatprep.subr.bf16.mxu0 %v8687_v63  ;;  %v5864_v63 = vrot.slane %v5847_v58, %v9860_v16 }
 0x4c9   : > { %5688 = vmatpush1.bf16.msra.mxu1 %v8682_v5 }
 0x4ca   : > { %5774 = vmatpush1.bf16.msra.mxu0 %v8685_v17  ;;  %5689 = vmatprep.subr.bf16.mxu1 %v8690_v9  ;;  %v5898_v17 = vrot.slane %v5885_v25, %v9845_v7  ;;  %v5894_v9 = vrot.slane %v5885_v25, %v9848_v8 }
 0x4cb   : > { %5775 = vmatprep.subr.bf16.mxu0 %v8693_v30 }
 0x4cd   : > { %5690 = vmatpush1.bf16.msra.mxu1 %v8688_v4 }
 0x4ce   : > { %5776 = vmatpush1.bf16.msra.mxu0 %v8691_v41  ;;  %5691 = vmatprep.subr.bf16.mxu1 %v8696_v34  ;;  %v5902_v34 = vrot.slane %v5885_v25, %v9860_v16 }
 0x4cf   : > { %5777 = vmatprep.subr.bf16.mxu0 %v8699_v49 }
 0x4d1   : > { %5692 = vmatpush1.bf16.msra.mxu1 %v8694_v18 }
 0x4d2   : > { %5778 = vmatpush1.bf16.msra.mxu0 %v8697_v53  ;;  %5693 = vmatprep.subr.bf16.mxu1 %v8702_v60 }
 0x4d3   : > { %5779 = vmatprep.subr.bf16.mxu0 %v8705_v15 }
 0x4d5   : > { %5694 = vmatpush1.bf16.msra.mxu1 %v8700_v43 }
 0x4d6   : > { %5780 = vmatpush1.bf16.msra.mxu0 %v8703_v32  ;;  %5695 = vmatprep.subr.bf16.mxu1 %v8708_v26 }
 0x4d7   : > { %5781 = vmatprep.subr.bf16.mxu0 %v8711_v54 }
 0x4d9   : > { %5696 = vmatpush1.bf16.msra.mxu1 %v8706_v61 }
 0x4da   : > { %5782 = vmatpush1.bf16.msra.mxu0 %v8709_v19  ;;  %5697 = vmatprep.subr.bf16.mxu1 %v8714_v11 }
 0x4db   : > { %5783 = vmatprep.subr.bf16.mxu0 %v8717_v14 }
 0x4dd   : > { %5698 = vmatpush1.bf16.msra.mxu1 %v8712_v28 }
 0x4de   : > { %5784 = vmatpush1.bf16.msra.mxu0 %v8715_v52  ;;  %5710 = vmatprep.subr.bf16.mxu1 %v8720_v44 }
 0x4df   : > { %5796 = vmatprep.subr.bf16.mxu0 %v8723_v37 }
 0x4e0   : > { %5700 = vmatmul.mubr.bf16.vlgmr.msra.gmra.mrb[56].mxu1 %v5257_v13 }
 0x4e1   : > { %5786 = vmatmul.mubr.bf16.vlgmr.msra.gmra.mrb[60].mxu0 %v5257_v13  ;;  %5711 = vmatpush1.bf16.msra.mxu1 %v8718_v35 }
 0x4e2   : > { %5797 = vmatpush1.bf16.msra.mxu0 %v8721_v50  ;;  %5712 = vmatprep.subr.bf16.mxu1 %v8726_v20 }
 0x4e3   : > { %5798 = vmatprep.subr.bf16.mxu0 %v8729_v22  ;;  %5742 = vmatprep.mubr.bf16.mxu1 %v9220_v0 }
 0x4e4   : > { %5828 = vmatprep.mubr.bf16.mxu0 %v9220_v0 }
 0x4e5   : > { %5713 = vmatpush1.bf16.msra.mxu1 %v8724_v42 }
 0x4e6   : > { %5799 = vmatpush1.bf16.msra.mxu0 %v8727_v12  ;;  %5714 = vmatprep.subr.bf16.mxu1 %v8732_v29 }
 0x4e7   : > { %5800 = vmatprep.subr.bf16.mxu0 %v8735_v1 }
 0x4e9   : > { %5715 = vmatpush1.bf16.msra.mxu1 %v8730_v33 }
 0x4ea   : > { %5801 = vmatpush1.bf16.msra.mxu0 %v8733_v45  ;;  %7766 = vmatprep.subr.msk.bf16.mxu1 %vm4404_vm1, %v7763_v24 }
 0x4eb   : > { %7768 = vmatprep.subr.msk.bf16.mxu0 %vm4404_vm1, %v7765_v31  ;;  %vm6101_vm1 = vcmask 781696  }
 0x4ed   : > { %5717 = vmatpush1.bf16.msra.mxu1 %v5656_v6 }
 0x4ee   : > { %5803 = vmatpush1.bf16.msra.mxu0 %v5662_v59 }
 0x4f0   : > { %7767 = vmatmul.mubr.msk.bf16.vlgmr.msra.gmra.mrb[56].mxu1 %vm4400_vm0, %v5259_v57 }
 0x4f1   : > { %7769 = vmatmul.mubr.msk.bf16.vlgmr.msra.gmra.mrb[60].mxu0 %vm4400_vm0, %v5259_v57  ;;  %vm6126_vm0 = vmor %vm6125_vm15, %vm6124_vm14 }
 0x5c3   : > { %v5744_v5 = vpop.f32.mrb[56].mxu1 }
 0x5c4   : > { %v5869_v30 = vadd.f32 %v5852_v51, %v5744_v5  ;;  %v5830_v4 = vpop.f32.mrb[60].mxu0  ;;  %v5746_v41 = vpop.f32.mrb[57].mxu1 }
 0x5c5   : > { %v5871_v49 = vadd.f32 %v5860_v48, %v5830_v4  ;;  %v5870_v18 = vadd.f32 %v5856_v23, %v5746_v41  ;;  %v5832_v53 = vpop.f32.mrb[61].mxu0  ;;  %v5748_v60 = vpop.f32.mrb[58].mxu1 }
 0x5c6   : > { %vm5877_vm2 = vcmp.ge.f32.partialorder %v5869_v30, 0.0  ;;  %v5907_v15 = vmul.f32 %v5890_v40, %v5869_v30  ;;  %v5872_v43 = vadd.f32 %v5864_v63, %v5832_v53  ;;  %v5873_v32 = vadd.f32 %v5852_v51, %v5748_v60  ;;  %v5834_v26 = vpop.f32.mrb[62].mxu0  ;;  %v5750_v54 = vpop.f32.mrb[59].mxu1 }
 0x5c7   : > { %vm5879_vm3 = vcmp.ge.f32.partialorder %v5871_v49, 0.0  ;;  %v5909_v61 = vmul.f32 %v5898_v17, %v5871_v49  ;;  %vm5878_vm5 = vcmp.ge.f32.partialorder %v5870_v18, 0.0  ;;  %v5908_v7 = vmul.f32 %v5894_v9, %v5870_v18  ;;  %v5836_v19 = vpop.f32.mrb[63].mxu0 }
 0x5c8   : > { %v5915_v11 = vsel %vm5877_vm2, %v5869_v30, %v5907_v15  ;;  %vm5880_vm6 = vcmp.ge.f32.partialorder %v5872_v43, 0.0  ;;  %v5910_v14 = vmul.f32 %v5902_v34, %v5872_v43  ;;  %vm5881_vm7 = vcmp.ge.f32.partialorder %v5873_v32, 0.0 }
 0x5c9   : > { %v5927_v16 = vrot.slane %v5915_v11, 1  ;;  %v5939_v55 = vrot.slane %v5915_v11, 2  ;;  %v5917_v28 = vsel %vm5879_vm3, %v5871_v49, %v5909_v61  ;;  %v5916_v62 = vsel %vm5878_vm5, %v5870_v18, %v5908_v7 }
 0x5ca   : > { %v5929_v52 = vrot.slane %v5917_v28, 1  ;;  %v5941_v46 = vrot.slane %v5917_v28, 2  ;;  %v5928_v44 = vrot.slane %v5916_v62, 1  ;;  %v5940_v37 = vrot.slane %v5916_v62, 2 }
 0x5cb   : > { %v5935_v35 = vmax.f32 %v5915_v11, %v5927_v16  ;;  %v5918_v13 = vsel %vm5880_vm6, %v5872_v43, %v5910_v14  ;;  %v5911_v50 = vmul.f32 %v5890_v40, %v5873_v32  ;;  %v5875_v20 = vadd.f32 %v5860_v48, %v5834_v26 }
 0x5cc   : > { %v5937_v22 = vmax.f32 %v5917_v28, %v5929_v52  ;;  %v5936_v42 = vmax.f32 %v5916_v62, %v5928_v44  ;;  %v5930_v12 = vrot.slane %v5918_v13, 1  ;;  %v5942_v29 = vrot.slane %v5918_v13, 2  ;;  %v8742_v28 = vld [vmem:[#allocation14 + $0x4] ss:$8 sps:$4 sm:$0xff]   ;;  %v8745_v62 = vld [vmem:[#allocation14 + $0x14] ss:$8 sps:$4 sm:$0xff]  }
 0x5cd   : > { %v5947_v1 = vmax.f32 %v5935_v35, %v5939_v55  ;;  %v5919_v47 = vsel %vm5881_vm7, %v5873_v32, %v5911_v50  ;;  %vm5883_vm8 = vcmp.ge.f32.partialorder %v5875_v20, 0.0  ;;  %v5913_v3 = vmul.f32 %v5898_v17, %v5875_v20  ;;  %v8740_v55 = vld [vmem:[#allocation14] ss:$8 sps:$4 sm:$0xff]   ;;  %6510 = vmatprep.subr.bf16.mxu0 %v8742_v28  ;;  %v8752_v50 = vld [vmem:[#allocation14 + $0xd0] ss:$8 sps:$4 sm:$0xff]  }
 0x5ce   : > { %v5949_v33 = vmax.f32 %v5937_v22, %v5941_v46  ;;  %v5948_v45 = vmax.f32 %v5936_v42, %v5940_v37  ;;  %v5938_v24 = vmax.f32 %v5918_v13, %v5930_v12  ;;  %v6018_v21 = vrot.slane %v5919_v47, 2  ;;  %v8746_v52 = vld [vmem:[#allocation14 + $0xc0] ss:$8 sps:$4 sm:$0xff]   ;;  %v8748_v46 = vld [vmem:[#allocation14 + $0xc4] ss:$8 sps:$4 sm:$0xff]   ;;  %6511 = vmatpush1.bf16.msra.mxu0 %v8740_v55 }
 0x5cf   : > { %v5921_v31 = vsel %vm5883_vm8, %v5875_v20, %v5913_v3  ;;  %v5874_v10 = vadd.f32 %v5856_v23, %v5750_v54  ;;  %v5876_v39 = vadd.f32 %v5864_v63, %v5836_v19  ;;  %v8743_v37 = vld [vmem:[#allocation14 + $0x10] ss:$8 sps:$4 sm:$0xff]   ;;  %6346 = vmatprep.subr.bf16.mxu1 %v8748_v46  ;;  %6512 = vmatprep.subr.bf16.mxu0 %v8745_v62  ;;  %v8751_v13 = vld [vmem:[#allocation14 + $0x24] ss:$8 sps:$4 sm:$0xff]   ;;  %v8749_v12 = vld [vmem:[#allocation14 + $0x20] ss:$8 sps:$4 sm:$0xff]  }
 0x5d0   : > { %v5955_v27 = vcombine.low %v5947_v1, %v5948_v45  ;;  %v5987_v6 = vcombine.high %v5947_v1, %v5948_v45  ;;  %v5950_v38 = vmax.f32 %v5938_v24, %v5942_v29  ;;  %v6026_v59 = vmax.f32 %v5935_v35, %v6018_v21  ;;  %v8754_v35 = vld [vmem:[#allocation14 + $0xd4] ss:$8 sps:$4 sm:$0xff]   ;;  %6347 = vmatpush1.bf16.msra.mxu1 %v8746_v52  ;;  %v8760_v20 = vld [vmem:[#allocation14 + $0xe4] ss:$8 sps:$4 sm:$0xff]   ;;  %v8758_v1 = vld [vmem:[#allocation14 + $0xe0] ss:$8 sps:$4 sm:$0xff]  }
 0x5d1   : > { %v6020_v57 = vrot.slane %v5921_v31, 2  ;;  %vm5882_vm9 = vcmp.ge.f32.partialorder %v5874_v10, 0.0  ;;  %v5912_v58 = vmul.f32 %v5894_v9, %v5874_v10  ;;  %vm5884_vm4 = vcmp.ge.f32.partialorder %v5876_v39, 0.0  ;;  %6348 = vmatprep.subr.bf16.mxu1 %v8754_v35  ;;  %v8757_v29 = vld [vmem:[#allocation14 + $0x34] ss:$8 sps:$4 sm:$0xff]  }
 0x5d2   : > { %v5963_v25 = vrot.slane %v5955_v27, %v9901_v36  ;;  %v5995_v51 = vrot.slane %v5987_v6, %v9901_v36  ;;  %v5956_v48 = vcombine.low %v5949_v33, %v5950_v38  ;;  %v5988_v40 = vcombine.high %v5949_v33, %v5950_v38  ;;  %6513 = vmatpush1.bf16.msra.mxu0 %v8743_v37  ;;  %v8766_v47 = vld [vmem:[#allocation14 + $0xf4] ss:$8 sps:$4 sm:$0xff]   ;;  %v8755_v3 = vld [vmem:[#allocation14 + $0x30] ss:$8 sps:$4 sm:$0xff]   ;;  %v8763_v33 = vld [vmem:[#allocation14 + $0x44] ss:$8 sps:$4 sm:$0xff]  }
 0x5d3   : > { %v6028_v5 = vmax.f32 %v5937_v22, %v6020_v57  ;;  %v5920_v17 = vsel %vm5882_vm9, %v5874_v10, %v5912_v58  ;;  %v5914_v30 = vmul.f32 %v5902_v34, %v5876_v39  ;;  %6514 = vmatprep.subr.bf16.mxu0 %v8751_v13  ;;  %v8764_v45 = vld [vmem:[#allocation14 + $0xf0] ss:$8 sps:$4 sm:$0xff]   ;;  %v8761_v21 = vld [vmem:[#allocation14 + $0x40] ss:$8 sps:$4 sm:$0xff]   ;;  %v8769_v31 = vld [vmem:[#allocation14 + $0x54] ss:$8 sps:$4 sm:$0xff]  }
 0x5d4   : > { %v5970_v23 = vrot.slane %v5956_v48, %v9901_v36  ;;  %v6002_v63 = vrot.slane %v5988_v40, %v9901_v36  ;;  %v6019_v4 = vrot.slane %v5920_v17, 2  ;;  %6349 = vmatpush1.bf16.msra.mxu1 %v8752_v50  ;;  %v8770_v10 = vld [vmem:[#allocation14 + $0x100] ss:$8 sps:$4 sm:$0xff]   ;;  %v8767_v27 = vld [vmem:[#allocation14 + $0x50] ss:$8 sps:$4 sm:$0xff]   ;;  %vm6144_vm2 = vcmask 519296  }
 0x5d5   : > { %v5922_v41 = vsel %vm5884_vm4, %v5876_v39, %v5914_v30  ;;  %6350 = vmatprep.subr.bf16.mxu1 %v8760_v20  ;;  %v8778_v39 = vld [vmem:[#allocation14 + $0x114] ss:$8 sps:$4 sm:$0xff]   ;;  %v8775_v6 = vld [vmem:[#allocation14 + $0x64] ss:$8 sps:$4 sm:$0xff]   ;;  %v8776_v38 = vld [vmem:[#allocation14 + $0x110] ss:$8 sps:$4 sm:$0xff]  }
 0x5d6   : > { %v5971_v49 = vcombine.low %v5963_v25, %v5970_v23  ;;  %v6003_v18 = vcombine.low %v5995_v51, %v6002_v63  ;;  %v6027_v53 = vmax.f32 %v5936_v42, %v6019_v4  ;;  %v6021_v9 = vrot.slane %v5922_v41, 2  ;;  %6515 = vmatpush1.bf16.msra.mxu0 %v8749_v12  ;;  %v8781_v57 = vld [vmem:[#allocation14 + $0x74] ss:$8 sps:$4 sm:$0xff]   ;;  %v8779_v58 = vld [vmem:[#allocation14 + $0x70] ss:$8 sps:$4 sm:$0xff]  }
 0x5d7   : > { %6516 = vmatprep.subr.bf16.mxu0 %v8757_v29  ;;  %v8784_v25 = vld [vmem:[#allocation14 + $0x124] ss:$8 sps:$4 sm:$0xff]   ;;  %v8782_v51 = vld [vmem:[#allocation14 + $0x120] ss:$8 sps:$4 sm:$0xff]   ;;  %v8790_v63 = vld [vmem:[#allocation14 + $0x134] ss:$8 sps:$4 sm:$0xff]  }
 0x5d8   : > { %v5978_v60 = vrot.slane %v5971_v49, %v9901_v36  ;;  %v6010_v15 = vrot.slane %v6003_v18, %v9901_v36  ;;  %v6034_v43 = vcombine.high %v6026_v59, %v6027_v53  ;;  %v6029_v32 = vmax.f32 %v5938_v24, %v6021_v9  ;;  %6351 = vmatpush1.bf16.msra.mxu1 %v8758_v1  ;;  %v8772_v24 = vld [vmem:[#allocation14 + $0x104] ss:$8 sps:$4 sm:$0xff]   ;;  %v8773_v59 = vld [vmem:[#allocation14 + $0x60] ss:$8 sps:$4 sm:$0xff]   ;;  %v8788_v4 = vld [vmem:[#allocation14 + $0x130] ss:$8 sps:$4 sm:$0xff]  }
 0x5d9   : > { %6352 = vmatprep.subr.bf16.mxu1 %v8766_v47  ;;  %v8787_v48 = vld [vmem:[#allocation14 + $0x84] ss:$8 sps:$4 sm:$0xff]   ;;  %v8785_v17 = vld [vmem:[#allocation14 + $0x80] ss:$8 sps:$4 sm:$0xff]   ;;  %v8791_v41 = vld [vmem:[#allocation14 + $0x90] ss:$8 sps:$4 sm:$0xff]  }
 0x5da   : > { %5982 = vst.msk [vmem:[#allocation4] ss:$4 sm:$0xf] %vm5980_vm10, %v5978_v60  ;;  %v5983_v34 = vcombine.high %v5978_v60, %v5978_v60  ;;  %6013 = vst.msk [vmem:[#allocation4 + $0x2] ss:$4 sm:$0xf] %vm5980_vm10, %v6010_v15  ;;  %v6042_v26 = vrot.slane %v6034_v43, %v9901_v36  ;;  %v6035_v54 = vcombine.high %v6028_v5, %v6029_v32  ;;  %6517 = vmatpush1.bf16.msra.mxu0 %v8755_v3 }
 0x5db   : > { %6518 = vmatprep.subr.bf16.mxu0 %v8763_v33  ;;  %v8793_v49 = vld [vmem:[#allocation14 + $0x94] ss:$8 sps:$4 sm:$0xff]   ;;  %v8796_v60 = vld [vmem:[#allocation14 + $0x144] ss:$8 sps:$4 sm:$0xff]   ;;  %v8800_v62 = vld [vmem:[#allocation14 + $0x150] ss:$8 sps:$4 sm:$0xff]  }
 0x5dc   : > { %5986 = vst.msk [vmem:[#allocation4 + $0x1] ss:$4 sm:$0xf] %vm5980_vm10, %v5983_v34  ;;  %v6049_v61 = vrot.slane %v6035_v54, %v9901_v36  ;;  %6353 = vmatpush1.bf16.msra.mxu1 %v8764_v45  ;;  %v8794_v34 = vld [vmem:[#allocation14 + $0x140] ss:$8 sps:$4 sm:$0xff]   ;;  %vm6342_vm3 = vcmask 523264  }
 0x5dd   : > { %6354 = vmatprep.subr.bf16.mxu1 %v8772_v24  ;;  %v8808_v46 = vld [vmem:[#allocation14 + $0x164] ss:$8 sps:$4 sm:$0xff]   ;;  %v8806_v50 = vld [vmem:[#allocation14 + $0x160] ss:$8 sps:$4 sm:$0xff]   ;;  %v8812_v12 = vld [vmem:[#allocation14 + $0x174] ss:$8 sps:$4 sm:$0xff]  }
 0x5de   : > { %v6050_v7 = vcombine.low %v6042_v26, %v6049_v61  ;;  %6519 = vmatpush1.bf16.msra.mxu0 %v8761_v21  ;;  %v8799_v26 = vld [vmem:[#allocation14 + $0xa4] ss:$8 sps:$4 sm:$0xff]   ;;  %v8802_v61 = vld [vmem:[#allocation14 + $0x154] ss:$8 sps:$4 sm:$0xff]   ;;  %v8810_v1 = vld [vmem:[#allocation14 + $0x170] ss:$8 sps:$4 sm:$0xff]  }
 0x5df   : > { %6520 = vmatprep.subr.bf16.mxu0 %v8769_v31  ;;  %vm9235_vm7 = vmmov 0   ;;  %vm7152_vm9 = vcmask 0   ;;  %vm7159_vm4 = vcmask 8200  }
 0x5e0   : > { %v6057_v19 = vrot.slane %v6050_v7, %v9901_v36  ;;  %6355 = vmatpush1.bf16.msra.mxu1 %v8770_v10 }
 0x5e1   : > { %6356 = vmatprep.subr.bf16.mxu1 %v8778_v39 }
 0x5e2   : > { %v6058_v11 = vcombine.high %v6057_v19, %v6057_v19  ;;  %6521 = vmatpush1.bf16.msra.mxu0 %v8767_v27 }
 0x5e3   : > { %6522 = vmatprep.subr.bf16.mxu0 %v8775_v6 }
 0x5e4   : > { %6061 = vst.msk [vmem:[#allocation4 + $0x3] ss:$4 sm:$0xf] %vm5980_vm10, %v6058_v11  ;;  %6357 = vmatpush1.bf16.msra.mxu1 %v8776_v38  ;;  %v8797_v11 = vld [vmem:[#allocation14 + $0xa0] ss:$8 sps:$4 sm:$0xff]   ;;  %vm7161_vm10 = vcmask 40976  }
 0x5e5   : > { %6358 = vmatprep.subr.bf16.mxu1 %v8784_v25 }
 0x5e6   : > { %6523 = vmatpush1.bf16.msra.mxu0 %v8773_v59 }
 0x5e7   : > { %6524 = vmatprep.subr.bf16.mxu0 %v8781_v57 }
 0x5e8   : > { %6359 = vmatpush1.bf16.msra.mxu1 %v8782_v51 }
 0x5e9   : > { %6360 = vmatprep.subr.bf16.mxu1 %v8790_v63  ;;  %v8815_v63 = vld [vmem:[#allocation17 + $0x60] sm:$0xff]  }
 0x5ea   : > { %6525 = vmatpush1.bf16.msra.mxu0 %v8779_v58  ;;  %v8814_v58 = vld [vmem:[#allocation17] sm:$0xff]  }
 0x5eb   : > { %v6104_v56 = vld [vmem:[#allocation4 + $0x4] sm:$0xff]  ;;  %v6134_v36 = vld [vmem:[#allocation4 + $0xc] sm:$0xf]  ;;  %v10408_v42 = vld [vmem:[#allocation4] sm:$0xf]  ;;  %6526 = vmatprep.subr.bf16.mxu0 %v8787_v48 }
 0x5ec   : > { %v6080_v14 = vld [vmem:[#allocation4 + $0x4] sm:$0xf]  ;;  %6106 = vrot.lane.b32.xlu1 %v6104_v56, %s9232_s11  ;;  %v6112_v16 = vld [vmem:[#allocation4 + $0x8] sm:$0xf]  ;;  %6361 = vmatpush1.bf16.msra.mxu1 %v8788_v4 }
 0x5ed   : > { %6082 = vrot.lane.b32.xlu0 %v6080_v14, %s9232_s11  ;;  %v10401_v44 = vld [vmem:[#allocation4 + $0x8] sm:$0xf]  ;;  %v10406_v22 = vld [vmem:[#allocation4] sm:$0xff]  ;;  %6362 = vmatprep.subr.bf16.mxu1 %v8796_v60  ;;  %v8821_v60 = vld [vmem:[#allocation17 + $0x78] sm:$0xff]  }
 0x5ee   : > { %6527 = vmatpush1.bf16.msra.mxu0 %v8785_v17  ;;  %v6103_v9 = vld [vmem:[#allocation4 + $0x4] sm:$0xf]  ;;  %v8816_v17 = vld [vmem:[#allocation17 + $0x8] sm:$0xff]  }
 0x5ef   : > { %6528 = vmatprep.subr.bf16.mxu0 %v8793_v49  ;;  %v8817_v49 = vld [vmem:[#allocation17 + $0x68] sm:$0xff]  }
 0x5f0   : > { %6114 = vrot.lane.b32.xlu1 %v6112_v16, %s9226_s16  ;;  %6363 = vmatpush1.bf16.msra.mxu1 %v8794_v34  ;;  %v8825_v34 = vld [vmem:[#allocation17 + $0x88] sm:$0xff]  }
 0x5f1   : > { %6089 = vrot.lane.b32.xlu0 %v6080_v14, %s9226_s16  ;;  %v8805_v14 = vld [vmem:[#allocation14 + $0xb4] ss:$8 sps:$4 sm:$0xff]   ;;  %6364 = vmatprep.subr.bf16.mxu1 %v8802_v61 }
 0x5f2   : > { %6529 = vmatpush1.bf16.msra.mxu0 %v8791_v41  ;;  %v8818_v41 = vld [vmem:[#allocation17 + $0x10] sm:$0xff]   ;;  %v8829_v61 = vld [vmem:[#allocation17 + $0x98] sm:$0xff]  }
 0x5f3   : > { %6530 = vmatprep.subr.bf16.mxu0 %v8799_v26  ;;  %v8828_v26 = vld [vmem:[#allocation17 + $0x38] sm:$0xff]  }
 0x5f4   : > { %6136 = vrot.lane.b32.xlu1 %v6134_v36, %s9226_s16  ;;  %v8803_v36 = vld [vmem:[#allocation14 + $0xb0] ss:$8 sps:$4 sm:$0xff]   ;;  %6365 = vmatpush1.bf16.msra.mxu1 %v8800_v62 }
 0x5f5   : > { %6130 = vrot.lane.b32.xlu0 %v10401_v44, %s9232_s11  ;;  %6366 = vmatprep.subr.bf16.mxu1 %v8808_v46 }
 0x5f6   : > { %6531 = vmatpush1.bf16.msra.mxu0 %v8797_v11  ;;  %v8832_v11 = vld [vmem:[#allocation17 + $0x48] sm:$0xff]  }
 0x5f7   : > { %6532 = vmatprep.subr.bf16.mxu0 %v8805_v14  ;;  %v8834_v14 = vld [vmem:[#allocation17 + $0x50] sm:$0xff]  }
 0x5f8   : > { %6064 = vrot.lane.b32.xlu1 %v10408_v42, %s9232_s11  ;;  %6367 = vmatpush1.bf16.msra.mxu1 %v8806_v50 }
 0x5f9   : > { %6070 = vrot.lane.b32.xlu0 %v10406_v22, %s9226_s16  ;;  %6368 = vmatprep.subr.bf16.mxu1 %v8812_v12 }
 0x5fa   : > { %6533 = vmatpush1.bf16.msra.mxu0 %v8803_v36  ;;  %v6551_v36 = vld [vmem:[%s10559_s21] sm:$0x3] }
 0x5fb   : > { %6830 = vmatprep.subr.bf16.mxu0 %v9220_v0 }
 0x5fc   : > { %6369 = vmatpush1.bf16.msra.mxu1 %v8810_v1 }
 0x5fd   : > { %6716 = vmatprep.subr.bf16.mxu1 %v9220_v0 }
 0x65e   : > { %v6107_v40 = vpop.permute.xlu1 %6106 }
 0x65f   : > { %v6083_v5 = vpop.permute.xlu0 %6082  ;;  %v6108_v30 = vrot.slane %v6107_v40, 4 }
 0x660   : > { %v6084_v23 = vrot.slane %v6083_v5, 4 }
 0x661   : > { %v6109_v18 = vsel %vm6085_vm11, %v6107_v40, %v6108_v30 }
 0x662   : > { %v6086_v53 = vsel %vm6085_vm11, %v6084_v23, %v6083_v5  ;;  %v6115_v15 = vpop.permute.xlu1 %6114  ;;  %v6111_v43 = vmax.f32 %v6103_v9, %v6109_v18  ;;  %v8820_v18 = vld [vmem:[#allocation17 + $0x18] sm:$0xff]   ;;  %v8822_v9 = vld [vmem:[#allocation17 + $0x20] sm:$0xff]  }
 0x663   : > { %v6090_v32 = vpop.permute.xlu0 %6089  ;;  %v6088_v7 = vmax.f32 %v10406_v22, %v6086_v53  ;;  %v8819_v53 = vld [vmem:[#allocation17 + $0x70] sm:$0xff]  }
 0x664   : > { %v6091_v54 = vrot.slane %v6090_v32, 4  ;;  %v6117_v19 = vmax.f32 %v6111_v43, %v6115_v15  ;;  %v8824_v15 = vld [vmem:[#allocation17 + $0x28] sm:$0xff]   ;;  %v8823_v43 = vld [vmem:[#allocation17 + $0x80] sm:$0xff]  }
 0x666   : > { %v6092_v56 = vsel %vm6073_vm12, %v6091_v54, %v6090_v32  ;;  %v6137_v55 = vpop.permute.xlu1 %6136  ;;  %6119 = vrot.lane.b32.xlu1 %v6117_v19, %s9226_s16  ;;  %v8826_v32 = vld [vmem:[#allocation17 + $0x30] sm:$0xff]   ;;  %v8831_v19 = vld [vmem:[#allocation17 + $0xa0] sm:$0xff]   ;;  %s10560_s16 = sld [smem:[#allocation32_spill]] }
 0x667   : > { %v6094_v16 = vmax.f32 %v6088_v7, %v6092_v56  ;;  %v6131_v28 = vpop.permute.xlu0 %6130  ;;  %v8827_v54 = vld [vmem:[#allocation17 + $0x90] sm:$0xff]   ;;  %v8830_v7 = vld [vmem:[#allocation17 + $0x40] sm:$0xff]   ;;  %v8833_v56 = vld [vmem:[#allocation17 + $0xa8] sm:$0xff]  }
 0x668   : > { %v6133_v52 = vmax.f32 %v10401_v44, %v6131_v28  ;;  %v8837_v28 = vld [vmem:[#allocation17 + $0xb8] sm:$0xff]  }
 0x669   : > { %6096 = vrot.lane.b32.xlu0 %v6094_v16, %s9232_s11  ;;  %v8835_v16 = vld [vmem:[#allocation17 + $0xb0] sm:$0xff]   ;;  %s10562_s11 = sld [smem:[#allocation34_spill]] }
 0x66a   : > { %v6139_v37 = vmax.f32 %v6133_v52, %v6137_v55  ;;  %v6065_v13 = vpop.permute.xlu1 %6064  ;;  %v8836_v55 = vld [vmem:[#allocation17 + $0x58] sm:$0xff]  }
 0x66b   : > { %v6071_v35 = vpop.permute.xlu0 %6070  ;;  %v6067_v22 = vmax.f32 %v10408_v42, %v6065_v13  ;;  %v6556_v13 = vrot.slane %v6551_v36, %v9838_v2 }
 0x66c   : > { %v6072_v20 = vrot.slane %v6071_v35, 4 }
 0x66d   : > { %6141 = vrot.lane.b32.xlu0 %v6139_v37, %s9233_s25 }
 0x66e   : > { %v6074_v44 = vsel %vm6073_vm12, %v6071_v35, %v6072_v20  ;;  %v6567_v35 = vld [vmem:[#allocation16] sm:$0x3]  ;;  %v6560_v20 = vrot.slane %v6551_v36, %v9848_v8 }
 0x66f   : > { %v6076_v29 = vmax.f32 %v6067_v22, %v6074_v44  ;;  %v6572_v44 = vrot.slane %v6567_v35, %v9838_v2  ;;  %v6576_v1 = vrot.slane %v6567_v35, %v9848_v8  ;;  %v8838_v2 = vld [vmem:[#allocation17 + $0xc0] sm:$0xff]   ;;  %v7039_v35 = vld [vmem:[%s10561_s23] sm:$0x1]  ;;  %s635_s25 = scalar_lea.vmem %s10562_s11, %s7337_s26 }
 0x671   : > { %6078 = vst.msk [vmem:[#allocation5] sm:$0xf] %vm6077_vm13, %v6076_v29 }
 0x6d8   : > { %v6120_v47 = vpop.permute.xlu1 %6119 }
 0x6d9   : > { %v6121_v42 = vrot.slane %v6120_v47, 4 }
 0x6db   : > { %v6097_v3 = vpop.permute.xlu0 %6096  ;;  %v6122_v24 = vsel %vm6073_vm12, %v6121_v42, %v6120_v47 }
 0x6dc   : > { %v6098_v33 = vrot.slane %v6097_v3, 4 }
 0x6de   : > { %v6099_v45 = vsel %vm6085_vm11, %v6097_v3, %v6098_v33 }
 0x6df   : > { %6102 = vst.msk [vmem:[#allocation5] sm:$0xf] %vm6101_vm1, %v6099_v45  ;;  %v6142_v21 = vpop.permute.xlu0 %6141 }
 0x6e0   : > { %6127 = vst.msk [vmem:[#allocation5] sm:$0xff] %vm6126_vm0, %v6122_v24 }
 0x6e1   : > { %6145 = vst.msk [vmem:[#allocation5 + $0x4] sm:$0xf] %vm6144_vm2, %v6142_v21 }
 0x6e8   : > { %v6146_v31 = vld [vmem:[#allocation5] sm:$0x77] }
 0x6e9   : > { %v6176_v10 = vld [vmem:[#allocation5] sm:$0xee]  ;;  %v6148_v39 = vcombine.high %v6146_v31, %v6146_v31  ;;  %v6150_v25 = vpack.c.bf16 %v6146_v31, %v6146_v31 }
 0x6ea   : > { %v6178_v27 = vcombine.high %v6176_v10, %v6176_v10  ;;  %v6180_v6 = vpack.c.bf16 %v6176_v10, %v6176_v10 }
 0x6eb   : > { %v6151_v38 = vpack.c.bf16 %v6148_v39, %v6148_v39 }
 0x6ec   : > { %v6181_v59 = vpack.c.bf16 %v6178_v27, %v6178_v27  ;;  %v6210_v57 = vshll.u32 %v6180_v6, 16  ;;  %v6208_v30 = vshrl.u32 %v6180_v6, 16 }
 0x6ed   : > { %7819 = vmatprep.mubr.msk.bf16.mxu0 %vm6342_vm3, %v6151_v38  ;;  %v8839_v38 = vld [vmem:[#allocation17 + $0xc8] sm:$0xff]  }
 0x6ee   : > { %v6217_v51 = vshll.u32 %v6181_v59, 16  ;;  %6543 = vmatmul.mubr.bf16.vlgmr.msra.gmra.mrb[64].mxu0 %v6150_v25  ;;  %v6212_v48 = vrot.slane %v6210_v57, 1  ;;  %v6215_v40 = vshrl.u32 %v6181_v59, 16  ;;  %v8840_v59 = vld [vmem:[#allocation17 + $0xd0] sm:$0xff]   ;;  %v8841_v57 = vld [vmem:[#allocation17 + $0xd8] sm:$0xff]   ;;  %v8843_v25 = vld [vmem:[#allocation17 + $0xe8] sm:$0xff]  }
 0x6ef   : > { %6831 = vmatpush1.bf16.msra.mxu0 %v8814_v58  ;;  %v8842_v58 = vld [vmem:[#allocation17 + $0xe0] sm:$0xff]  }
 0x6f0   : > { %v6219_v5 = vrot.slane %v6217_v51, 1  ;;  %6832 = vmatprep.subr.bf16.mxu0 %v9220_v0  ;;  %v6213_v4 = vor.u32 %v6212_v48, %v6208_v30  ;;  %v8844_v51 = vld [vmem:[#allocation17 + $0xf0] sm:$0xff]   ;;  %v8845_v48 = vld [vmem:[#allocation17 + $0xf8] sm:$0xff]  }
 0x6f1   : > { %v8849_v30 = vld [vmem:[#allocation17 + $0x118] sm:$0xff]  }
 0x6f2   : > { %v6220_v23 = vor.u32 %v6219_v5, %v6215_v40  ;;  %v8846_v40 = vld [vmem:[#allocation17 + $0x100] sm:$0xff]   ;;  %v8847_v5 = vld [vmem:[#allocation17 + $0x108] sm:$0xff]  }
 0x6f3   : > { %6833 = vmatpush1.bf16.msra.mxu0 %v8816_v17  ;;  %v8848_v17 = vld [vmem:[#allocation17 + $0x110] sm:$0xff]  }
 0x6f4   : > { %7794 = vmatprep.mubr.msk.bf16.mxu1 %vm6342_vm3, %v6220_v23  ;;  %6834 = vmatprep.subr.bf16.mxu0 %v9220_v0 }
 0x6f5   : > { %6379 = vmatmul.mubr.bf16.vlgmr.msra.gmra.mrb[60].mxu1 %v6213_v4  ;;  %v9234_v4 = vmov 0.0  }
 0x6f6   : > { %6717 = vmatpush1.bf16.msra.mxu1 %v8815_v63  ;;  %v8850_v63 = vld [vmem:[#allocation20] sm:$0xff]   ;;  %7150 = vst [vmem:[%s635_s25] sm:$0xff] %v9234_v4 }
 0x6f7   : > { %6718 = vmatprep.subr.bf16.mxu1 %v9220_v0  ;;  %6835 = vmatpush1.bf16.msra.mxu0 %v8818_v41  ;;  %v8851_v41 = vld [vmem:[#allocation20 + $0x8] sm:$0xff]  }
 0x6f8   : > { %6836 = vmatprep.subr.bf16.mxu0 %v9220_v0 }
 0x6fa   : > { %6719 = vmatpush1.bf16.msra.mxu1 %v8817_v49  ;;  %v8852_v49 = vld [vmem:[#allocation20 + $0x10] sm:$0xff]  }
 0x6fb   : > { %6720 = vmatprep.subr.bf16.mxu1 %v9220_v0  ;;  %6837 = vmatpush1.bf16.msra.mxu0 %v8820_v18  ;;  %v8853_v18 = vld [vmem:[#allocation20 + $0x18] sm:$0xff]  }
 0x6fc   : > { %6838 = vmatprep.subr.bf16.mxu0 %v9220_v0 }
 0x6fe   : > { %6721 = vmatpush1.bf16.msra.mxu1 %v8819_v53  ;;  %v8855_v53 = vld [vmem:[#allocation20 + $0x28] sm:$0xff]  }
 0x6ff   : > { %6722 = vmatprep.subr.bf16.mxu1 %v9220_v0  ;;  %6839 = vmatpush1.bf16.msra.mxu0 %v8822_v9  ;;  %v8856_v9 = vld [vmem:[#allocation20 + $0x30] sm:$0xff]  }
 0x700   : > { %6840 = vmatprep.subr.bf16.mxu0 %v9220_v0 }
 0x702   : > { %6723 = vmatpush1.bf16.msra.mxu1 %v8821_v60  ;;  %v8857_v60 = vld [vmem:[#allocation20 + $0x38] sm:$0xff]  }
 0x703   : > { %6724 = vmatprep.subr.bf16.mxu1 %v9220_v0  ;;  %6841 = vmatpush1.bf16.msra.mxu0 %v8824_v15 }
 0x704   : > { %6842 = vmatprep.subr.bf16.mxu0 %v9220_v0 }
 0x706   : > { %6725 = vmatpush1.bf16.msra.mxu1 %v8823_v43 }
 0x707   : > { %6726 = vmatprep.subr.bf16.mxu1 %v9220_v0  ;;  %6843 = vmatpush1.bf16.msra.mxu0 %v8826_v32 }
 0x708   : > { %6844 = vmatprep.subr.bf16.mxu0 %v9220_v0 }
 0x70a   : > { %6727 = vmatpush1.bf16.msra.mxu1 %v8825_v34 }
 0x70b   : > { %6728 = vmatprep.subr.bf16.mxu1 %v9220_v0  ;;  %6845 = vmatpush1.bf16.msra.mxu0 %v8828_v26 }
 0x70c   : > { %6846 = vmatprep.subr.bf16.mxu0 %v9220_v0 }
 0x70e   : > { %6729 = vmatpush1.bf16.msra.mxu1 %v8827_v54 }
 0x70f   : > { %6730 = vmatprep.subr.bf16.mxu1 %v9220_v0  ;;  %6847 = vmatpush1.bf16.msra.mxu0 %v8830_v7 }
 0x710   : > { %6848 = vmatprep.subr.bf16.mxu0 %v9220_v0 }
 0x712   : > { %6731 = vmatpush1.bf16.msra.mxu1 %v8829_v61 }
 0x713   : > { %6732 = vmatprep.subr.bf16.mxu1 %v9220_v0  ;;  %6849 = vmatpush1.bf16.msra.mxu0 %v8832_v11 }
 0x714   : > { %6850 = vmatprep.subr.bf16.mxu0 %v9220_v0 }
 0x716   : > { %6733 = vmatpush1.bf16.msra.mxu1 %v8831_v19 }
 0x717   : > { %6734 = vmatprep.subr.bf16.mxu1 %v9220_v0  ;;  %6851 = vmatpush1.bf16.msra.mxu0 %v8834_v14 }
 0x718   : > { %6852 = vmatprep.subr.bf16.mxu0 %v9220_v0 }
 0x71a   : > { %6735 = vmatpush1.bf16.msra.mxu1 %v8833_v56  ;;  %v7016_v56 = vld [vmem:[%s10560_s16] sm:$0x1] }
 0x71b   : > { %6736 = vmatprep.subr.bf16.mxu1 %v9220_v0  ;;  %6853 = vmatpush1.bf16.msra.mxu0 %v8836_v55  ;;  %v7019_v55 = vld [vmem:[#allocation19] sm:$0x1] }
 0x71c   : > { %7986 = vmatprep.subr.bf16.mxu0 %v9234_v4 }
 0x71e   : > { %6737 = vmatpush1.bf16.msra.mxu1 %v8835_v16 }
 0x71f   : > { %6738 = vmatprep.subr.bf16.mxu1 %v9220_v0 }
 0x722   : > { %6739 = vmatpush1.bf16.msra.mxu1 %v8837_v28 }
 0x723   : > { %6975 = vmatprep.subr.bf16.mxu1 %v9220_v0 }
 0x7c1   : > { %v6544_v62 = vpop.f32.mrb[64].mxu0 }
 0x7c2   : > { %v6546_v52 = vpop.f32.mrb[65].mxu0 }
 0x7c3   : > { %v6548_v46 = vpop.f32.mrb[66].mxu0 }
 0x7c4   : > { %v6549_v37 = vpop.f32.mrb[67].mxu0 }
 0x7c8   : > { %v6380_v50 = vpop.f32.mrb[60].mxu1 }
 0x7c9   : > { %v6545_v22 = vadd.f32 %v6544_v62, %v6380_v50  ;;  %v6382_v12 = vpop.f32.mrb[61].mxu1 }
 0x7ca   : > { %v6547_v29 = vadd.f32 %v6546_v52, %v6382_v12  ;;  %v6384_v47 = vpop.f32.mrb[62].mxu1 }
 0x7cb   : > { %v6563_v42 = vadd.f32 %v6556_v13, %v6545_v22  ;;  %v6385_v3 = vpop.f32.mrb[63].mxu1 }
 0x7cc   : > { %v6564_v33 = vadd.f32 %v6560_v20, %v6547_v29 }
 0x7cd   : > { %vm6565_vm5 = vcmp.ge.f32.partialorder %v6563_v42, 0.0  ;;  %v6579_v45 = vmul.f32 %v6572_v44, %v6563_v42 }
 0x7ce   : > { %vm6566_vm6 = vcmp.ge.f32.partialorder %v6564_v33, 0.0  ;;  %v6580_v24 = vmul.f32 %v6576_v1, %v6564_v33 }
 0x7cf   : > { %v6581_v21 = vsel %vm6565_vm5, %v6563_v42, %v6579_v45 }
 0x7d0   : > { %v6583_v31 = vpack.c.bf16 %v6581_v21, %v6581_v21  ;;  %v6582_v10 = vsel %vm6566_vm6, %v6564_v33, %v6580_v24 }
 0x7d1   : > { %v6584_v39 = vpack.c.bf16 %v6582_v10, %v6582_v10 }
 0x7d2   : > { %v6635_v6 = vshrl.u32 %v6583_v31, 16  ;;  %v6897_v23 = vrot.slane %v6583_v31, 1 }
 0x7d3   : > { %7845 = vmatprep.mubr.msk.bf16.mxu0 %vm6342_vm3, %v6584_v39  ;;  %v6638_v27 = vshrl.u32 %v6584_v39, 16  ;;  %v6898_v8 = vrot.slane %v6584_v39, 1 }
 0x7d4   : > { %6863 = vmatmul.mubr.bf16.vlgmr.msra.gmra.mrb[68].mxu0 %v6583_v31 }
 0x7d5   : > { %7832 = vmatprep.mubr.msk.bf16.mxu1 %vm6342_vm3, %v6638_v27  ;;  %7987 = vmatpush3.bf16.msra.mxu0 %v8850_v63 }
 0x7d6   : > { %6749 = vmatmul.mubr.bf16.vlgmr.msra.gmra.mrb[64].mxu1 %v6635_v6  ;;  %7988 = vmatprep.subr.bf16.mxu0 %v9234_v4 }
 0x7d7   : > { %6976 = vmatpush1.bf16.msra.mxu1 %v8838_v2  ;;  %7858 = vmatprep.mubr.msk.bf16.mxu1 %vm6342_vm3, %v6898_v8 }
 0x7d8   : > { %6977 = vmatprep.subr.bf16.mxu1 %v9220_v0  ;;  %8002 = vmatprep.mubr.msk.bf16.mxu0 %vm9235_vm7, %v9234_v4 }
 0x7d9   : > { %7989 = vmatpush3.bf16.msra.mxu0 %v8851_v41 }
 0x7da   : > { %7990 = vmatprep.subr.bf16.mxu0 %v9234_v4 }
 0x7db   : > { %6978 = vmatpush1.bf16.msra.mxu1 %v8839_v38 }
 0x7dc   : > { %6979 = vmatprep.subr.bf16.mxu1 %v9220_v0 }
 0x7dd   : > { %7991 = vmatpush3.bf16.msra.mxu0 %v8852_v49 }
 0x7de   : > { %7992 = vmatprep.subr.bf16.mxu0 %v9234_v4 }
 0x7df   : > { %6980 = vmatpush1.bf16.msra.mxu1 %v8840_v59 }
 0x7e0   : > { %6981 = vmatprep.subr.bf16.mxu1 %v9220_v0 }
 0x7e1   : > { %7993 = vmatpush3.bf16.msra.mxu0 %v8853_v18 }
 0x7e2   : > { %7994 = vmatprep.subr.bf16.mxu0 %v9234_v4 }
 0x7e3   : > { %6982 = vmatpush1.bf16.msra.mxu1 %v8841_v57 }
 0x7e4   : > { %6983 = vmatprep.subr.bf16.mxu1 %v9220_v0 }
 0x7e7   : > { %6984 = vmatpush1.bf16.msra.mxu1 %v8842_v58 }
 0x7e8   : > { %6985 = vmatprep.subr.bf16.mxu1 %v9220_v0 }
 0x7eb   : > { %6986 = vmatpush1.bf16.msra.mxu1 %v8843_v25 }
 0x7ec   : > { %6987 = vmatprep.subr.bf16.mxu1 %v9220_v0 }
 0x7ef   : > { %6988 = vmatpush1.bf16.msra.mxu1 %v8844_v51 }
 0x7f0   : > { %6989 = vmatprep.subr.bf16.mxu1 %v9220_v0 }
 0x7f3   : > { %6990 = vmatpush1.bf16.msra.mxu1 %v8845_v48 }
 0x7f4   : > { %6991 = vmatprep.subr.bf16.mxu1 %v9220_v0 }
 0x7f7   : > { %6992 = vmatpush1.bf16.msra.mxu1 %v8846_v40 }
 0x7f8   : > { %6993 = vmatprep.subr.bf16.mxu1 %v9220_v0 }
 0x7fb   : > { %6994 = vmatpush1.bf16.msra.mxu1 %v8847_v5 }
 0x7fc   : > { %6995 = vmatprep.subr.bf16.mxu1 %v9220_v0 }
 0x7ff   : > { %6996 = vmatpush1.bf16.msra.mxu1 %v8848_v17 }
 0x800   : > { %6997 = vmatprep.subr.bf16.mxu1 %v9220_v0  ;;  %v8854_v0 = vld [vmem:[#allocation20 + $0x20] sm:$0xff]  }
 0x801   : > { %7995 = vmatpush3.bf16.msra.mxu0 %v8854_v0 }
 0x802   : > { %7996 = vmatprep.subr.bf16.mxu0 %v9234_v4 }
 0x803   : > { %6998 = vmatpush1.bf16.msra.mxu1 %v8849_v30 }
 0x805   : > { %7997 = vmatpush3.bf16.msra.mxu0 %v8855_v53 }
 0x806   : > { %7008 = vmatmul.mubr.bf16.vlgmr.msra.gmra.mrb[68].mxu1 %v6897_v23  ;;  %7998 = vmatprep.subr.bf16.mxu0 %v9234_v4 }
 0x809   : > { %7999 = vmatpush3.bf16.msra.mxu0 %v8856_v9 }
 0x80a   : > { %8000 = vmatprep.subr.bf16.mxu0 %v9234_v4 }
 0x80d   : > { %8001 = vmatpush3.bf16.msra.mxu0 %v8857_v60 }
 0x8a7   : > { %v6864_v15 = vpop.f32.mrb[68].mxu0 }
 0x8a8   : > { %v6866_v43 = vpop.f32.mrb[69].mxu0 }
 0x8a9   : > { %v6750_v32 = vpop.f32.mrb[64].mxu1  ;;  %v6867_v34 = vpop.f32.mrb[70].mxu0 }
 0x8aa   : > { %v6865_v26 = vadd.f32 %v6864_v15, %v6750_v32  ;;  %v6752_v54 = vpop.f32.mrb[65].mxu1  ;;  %v6868_v61 = vpop.f32.mrb[71].mxu0 }
 0x8ab   : > { %v6753_v7 = vpop.f32.mrb[66].mxu1 }
 0x8ac   : > { %v6754_v19 = vpop.f32.mrb[67].mxu1 }
 0x8d9   : > { %v7009_v11 = vpop.f32.mrb[68].mxu1 }
 0x8da   : > { %v7015_v14 = vadd.f32 %v7009_v11, %v6865_v26  ;;  %v7011_v16 = vpop.f32.mrb[69].mxu1 }
 0x8db   : > { %v7012_v28 = vpop.f32.mrb[70].mxu1 }
 0x8dc   : > { %v7017_v62 = vadd.f32 %v7016_v56, %v7015_v14  ;;  %v7013_v52 = vpop.f32.mrb[71].mxu1 }
 0x8de   : > { %vm7018_vm8 = vcmp.ge.f32.partialorder %v7017_v62, 0.0  ;;  %v7020_v46 = vmul.f32 %v7019_v55, %v7017_v62 }
 0x8e0   : > { %v7021_v36 = vsel %vm7018_vm8, %v7017_v62, %v7020_v46 }
 0x8e1   : > { %v7022_v37 = vpack.c.bf16 %v7021_v36, %v7021_v36 }
 0x8e3   : > { %8003 = vmatmul.mubr.bf16.vlgmr.msra.gmra.mrb[72].mxu0 %v7022_v37 }
 0x9b6   : > { %v7122_v13 = vpop.f32.mrb[72].mxu0 }
 0x9b7   : > { %v7123_v50 = vadd.f32 %v7122_v13, %v7039_v35  ;;  %v8004_v20 = vpop.f32.mrb[73].mxu0 }
 0x9b8   : > { %v7125_v22 = vpop.f32.mrb[74].mxu0 }
 0x9b9   : > { %7129 = vrot.lane.b32.xlu1 %v7123_v50, %s9236_s2  ;;  %v8005_v44 = vpop.f32.mrb[75].mxu0 }
 0xa2b   : > { %v7130_v12 = vpop.permute.xlu1 %7129 }
 0xa2c   : > { %v7132_v29 = vmax.f32 %v7123_v50, %v7130_v12 }
 0xa2e   : > { %7137 = vrot.lane.b32.xlu0 %v7132_v29, %s9237_s14  ;;  %v7133_v33 = vsub.f32 %v7123_v50, %v7132_v29 }
 0xa30   : > { %v7134_v45 = vmul.f32 1.442695, %v7133_v33 }
 0xaa0   : > { %v7138_v1 = vpop.permute.xlu0 %7137 }
 0xaa1   : > { %v7140_v47 = vsub.f32 %v7123_v50, %v7138_v1 }
 0xaa3   : > { %v7141_v42 = vmul.f32 1.442695, %v7140_v47 }
 0xaa5   : > { %8858 = vpow2.f32 %v7141_v42 }
 0xaa6   : > { %8860 = vpow2.f32 %v7134_v45 }
 0xaaf   : > { %v8859_v3 = vpop.eup %8858 }
 0xab0   : > { %7144 = vrot.lane.b32.xlu1 %v8859_v3, %s9236_s2  ;;  %v8861_v24 = vpop.eup %8860 }
 0xb22   : > { %v7145_v21 = vpop.permute.xlu1 %7144 }
 0xb23   : > { %v7147_v31 = vadd.f32 %v8861_v24, %v7145_v21 }
 0xb25   : > { %8862 = vrcp.f32 %v7147_v31 }
 0xb2f   : > { %v8863_v10 = vpop.eup %8862 }
 0xb30   : > { %v7151_v39 = vmul.f32 %v8863_v10, %v8861_v24  ;;  %7155 = vrot.lane.b32.xlu0 %v8863_v10, %s9237_s14 }
 0xb32   : > { %7153 = vst.msk [vmem:[%s635_s25] sm:$0x1] %vm7152_vm9, %v7151_v39 }
 0xba2   : > { %v7156_v27 = vpop.permute.xlu0 %7155 }
 0xba3   : > { %v7158_v2 = vmul.f32 %v8859_v3, %v7156_v27 }
 0xba5   : > { %7160 = vst.msk [vmem:[%s635_s25] sm:$0x1] %vm7159_vm4, %v7158_v2 }
 0xba6   : > { %7162 = vst.msk [vmem:[%s635_s25] sm:$0x1] %vm7161_vm10, %v7123_v50 }
 0xba7 PF: > { %p30_p7 = scmp.ge.s32.totalorder %s9566_s28, 4   ;;  %s10563_s18 = smov %s9192_s19 }
 0xba8   : > { %s10564_s19 = smov %s9196_s20  ;;  %s10565_s20 = smov %s9577_s15 }
 0xba9   : > { %s10566_s21 = smov %s9566_s28  ;;  %32 = sbr.rel (!%p30_p7) target bundleno = 15 (0xf), region = 184 }
 0xbb0   :  { %7182 = vsyncpa [#allocation7], 1 }
 0xbb1   :  { %7184 = vsyncpa [#allocation7 + $0x1], 1 }
 0xbb2   :  { %7185 = vsyncpa [#allocation9], 1 }
 0xbb3   :  { %7186 = vsyncpa [#allocation12], 1 }
 0xbb4   :  { %7187 = vsyncpa [#allocation15], 1 }
 0xbb5   :  { %7188 = vsyncpa [#allocation18], 1 }
 0xbb6   :  { %7189 = vsyncpa [#allocation21], 1 }

</bundles_post_ra>
